<compile_context>
chip_gen: v5e
topology: v5e:2x2
jax: 0.10.0
libtpu: 0.0.40
codegen_flags: <defaults>
</compile_context>

<pallas_src>
import jax
import jax.numpy as jnp
from jax import lax
from jax.experimental import pallas as pl
from jax.experimental.pallas import tpu as pltpu

# ---- module hyper-parameters (defaults of attentionGuidedResBlock) ----
SQ = 32          # squeezeFilters
EX = 64          # expandFilters
RED = 16         # SELayer reduction
HID = SQ // RED  # SE hidden width (= 2)
EPS = 1e-5       # BatchNorm eps


def attention_guided_res_block_nhwc(x, p):
    """x: (B, H, W, SQ) float32 NHWC.  Returns (B, H, W, SQ) float32 NHWC."""
    x = x.astype(jnp.float32)
    B, H, W, Cs = x.shape
    Ce = p['ex_w'].shape[1]
    HW = H * W
    inv_n = 1.0 / float(B * H * W)

    # fold the 9 depthwise taps into the pointwise weights: Wf[t] = diag(dw[t]) @ pw
    wfold = (p['dw_w'][:, :, None] * p['pw_w'][None, :, :]).astype(jnp.float32)   # (9, Ce, Ce)

    # ---------------- shared in-kernel helpers (close over static shapes) ----------------
    def scale_shift(acc_ref, gamma, beta):
        # acc_ref rows: [sum, sum_of_squares]; biased variance (train-mode BN).
        mu = acc_ref[0:1, :] * inv_n
        var = jnp.maximum(acc_ref[1:2, :] * inv_n - mu * mu, 0.0)
        s = gamma * lax.rsqrt(var + EPS)
        return s, beta - mu * s

    def dw_pw(exn, pad_ref, wf_ref):
        # exn: (HW, Ce).  Separable 3x3 (pad=1) + pointwise, folded into 9 MXU matmuls.
        # Only the 1-element halo of the padded scratch is zeroed.
        zr = jnp.zeros((1, W + 2, Ce), jnp.float32)
        zc = jnp.zeros((H + 2, 1, Ce), jnp.float32)
        pad_ref[0:1, :, :] = zr
        pad_ref[H + 1:H + 2, :, :] = zr
        pad_ref[:, 0:1, :] = zc
        pad_ref[:, W + 1:W + 2, :] = zc
        pad_ref[1:H + 1, 1:W + 1, :] = exn.reshape(H, W, Ce)
        acc = jnp.zeros((HW, Ce), jnp.float32)
        for t in range(9):
            ky, kx = divmod(t, 3)
            win = pad_ref[ky:ky + H, kx:kx + W, :].reshape(HW, Ce)
            acc = acc + jnp.dot(win, wf_ref[t], preferred_element_type=jnp.float32)
        return acc

    # -------------------- kernel 1: chained BatchNorm statistics --------------------
    def stats_kernel(x_ref, ex_w_ref, ex_b_ref, ex_g_ref, ex_bt_ref, wf_ref,
                     sp_g_ref, sp_bt_ref, sq_w_ref, sq_b_ref, sq_g_ref, sq_bt_ref,
                     ex_ss_ref, sp_ss_ref, sq_ss_ref,
                     acc_ex, acc_sp, acc_sq, pad_ref):
        ps = pl.program_id(0)   # pass: 0 = ex stats, 1 = sp stats, 2 = sq stats
        b = pl.program_id(1)    # batch image

        @pl.when((ps == 0) & (b == 0))
        def _init():
            acc_ex[...] = jnp.zeros_like(acc_ex)
            acc_sp[...] = jnp.zeros_like(acc_sp)
            acc_sq[...] = jnp.zeros_like(acc_sq)

        xf = x_ref[0].reshape(HW, Cs)

        # stage 1: expand 1x1 conv
        ex_raw = jnp.dot(xf, ex_w_ref[...], preferred_element_type=jnp.float32) + ex_b_ref[...]

        @pl.when(ps == 0)
        def _acc0():
            acc_ex[0:1, :] += jnp.sum(ex_raw, axis=0, keepdims=True)
            acc_ex[1:2, :] += jnp.sum(ex_raw * ex_raw, axis=0, keepdims=True)

        @pl.when((ps == 0) & (b == B - 1))
        def _fin0():
            s, t = scale_shift(acc_ex, ex_g_ref[...], ex_bt_ref[...])
            ex_ss_ref[0:1, :] = s
            ex_ss_ref[1:2, :] = t

        # stage 2: BN+ReLU, folded depthwise+pointwise (statistically valid for ps >= 1)
        s_ex, t_ex = scale_shift(acc_ex, ex_g_ref[...], ex_bt_ref[...])
        exn = jnp.maximum(ex_raw * s_ex + t_ex, 0.0)
        sp_raw = dw_pw(exn, pad_ref, wf_ref)

        @pl.when(ps == 1)
        def _acc1():
            acc_sp[0:1, :] += jnp.sum(sp_raw, axis=0, keepdims=True)
            acc_sp[1:2, :] += jnp.sum(sp_raw * sp_raw, axis=0, keepdims=True)

        @pl.when((ps == 1) & (b == B - 1))
        def _fin1():
            s, t = scale_shift(acc_sp, sp_g_ref[...], sp_bt_ref[...])
            sp_ss_ref[0:1, :] = s
            sp_ss_ref[1:2, :] = t

        # stage 3: BN+ReLU, squeeze 1x1 conv (statistically valid for ps == 2)
        s_sp, t_sp = scale_shift(acc_sp, sp_g_ref[...], sp_bt_ref[...])
        spn = jnp.maximum(sp_raw * s_sp + t_sp, 0.0)
        sq_raw = jnp.dot(spn, sq_w_ref[...], preferred_element_type=jnp.float32) + sq_b_ref[...]

        @pl.when(ps == 2)
        def _acc2():
            acc_sq[0:1, :] += jnp.sum(sq_raw, axis=0, keepdims=True)
            acc_sq[1:2, :] += jnp.sum(sq_raw * sq_raw, axis=0, keepdims=True)

        @pl.when((ps == 2) & (b == B - 1))
        def _fin2():
            s, t = scale_shift(acc_sq, sq_g_ref[...], sq_bt_ref[...])
            sq_ss_ref[0:1, :] = s
            sq_ss_ref[1:2, :] = t

    # -------------------- kernel 2: apply (independent per image) --------------------
    def apply_kernel(x_ref, se1_ref, se2_ref, ex_w_ref, ex_b_ref, wf_ref,
                     sq_w_ref, sq_b_ref, ex_ss_ref, sp_ss_ref, sq_ss_ref,
                     out_ref, pad_ref):
        xf = x_ref[0].reshape(HW, Cs)

        # SELayer (per-sample): GAP -> FC/ReLU -> FC/Sigmoid
        pool = jnp.sum(xf, axis=0, keepdims=True) * (1.0 / HW)                         # (1, Cs)
        h = jnp.maximum(jnp.dot(pool, se1_ref[...], preferred_element_type=jnp.float32), 0.0)
        se = jax.nn.sigmoid(jnp.dot(h, se2_ref[...], preferred_element_type=jnp.float32))  # (1, Cs)

        ex_raw = jnp.dot(xf, ex_w_ref[...], preferred_element_type=jnp.float32) + ex_b_ref[...]
        exn = jnp.maximum(ex_raw * ex_ss_ref[0:1, :] + ex_ss_ref[1:2, :], 0.0)
        sp_raw = dw_pw(exn, pad_ref, wf_ref)
        spn = jnp.maximum(sp_raw * sp_ss_ref[0:1, :] + sp_ss_ref[1:2, :], 0.0)
        sq_raw = jnp.dot(spn, sq_w_ref[...], preferred_element_type=jnp.float32) + sq_b_ref[...]
        sqn = sq_raw * sq_ss_ref[0:1, :] + sq_ss_ref[1:2, :]

        # fused residual + SE scale: x + bn(sq) + x*se  ==  x*(1 + se) + bn(sq)
        out = xf * (1.0 + se) + sqn
        out_ref[0] = out.reshape(H, W, Cs)

    def full_spec(a):
        zero = (0,) * a.ndim
        return pl.BlockSpec(a.shape, lambda *_: zero)

    # ---- call 1: statistics (sequential accumulation over (pass, batch)) ----
    stats_inputs = (x, p['ex_w'], p['ex_b'], p['ex_g'], p['ex_beta'], wfold,
                    p['sp_g'], p['sp_beta'],
                    p['sq_w'], p['sq_b'], p['sq_g'], p['sq_beta'])
    ex_ss, sp_ss, sq_ss = pl.pallas_call(
        stats_kernel,
        out_shape=(jax.ShapeDtypeStruct((2, Ce), jnp.float32),
                   jax.ShapeDtypeStruct((2, Ce), jnp.float32),
                   jax.ShapeDtypeStruct((2, Cs), jnp.float32)),
        grid=(3, B),
        in_specs=[pl.BlockSpec((1, H, W, Cs), lambda ps, b: (b, 0, 0, 0))]
                 + [full_spec(a) for a in stats_inputs[1:]],
        out_specs=(pl.BlockSpec((2, Ce), lambda ps, b: (0, 0)),
                   pl.BlockSpec((2, Ce), lambda ps, b: (0, 0)),
                   pl.BlockSpec((2, Cs), lambda ps, b: (0, 0))),
        scratch_shapes=[pltpu.VMEM((2, Ce), jnp.float32),
                        pltpu.VMEM((2, Ce), jnp.float32),
                        pltpu.VMEM((2, Cs), jnp.float32),
                        pltpu.VMEM((H + 2, W + 2, Ce), jnp.float32)],
        compiler_params=pltpu.CompilerParams(
            dimension_semantics=("arbitrary", "arbitrary")),
    )(*stats_inputs)

    # ---- call 2: apply (per image; parallel -> both TCs on v7x) ----
    apply_inputs = (x, p['se_w1'], p['se_w2'], p['ex_w'], p['ex_b'], wfold,
                    p['sq_w'], p['sq_b'], ex_ss, sp_ss, sq_ss)
    out = pl.pallas_call(
        apply_kernel,
        out_shape=jax.ShapeDtypeStruct((B, H, W, Cs), jnp.float32),
        grid=(B,),
        in_specs=[pl.BlockSpec((1, H, W, Cs), lambda b: (b, 0, 0, 0))]
                 + [full_spec(a) for a in apply_inputs[1:]],
        out_specs=pl.BlockSpec((1, H, W, Cs), lambda b: (b, 0, 0, 0)),
        scratch_shapes=[pltpu.VMEM((H + 2, W + 2, Ce), jnp.float32)],
        compiler_params=pltpu.CompilerParams(dimension_semantics=("parallel",)),
    )(*apply_inputs)
    return out


def attention_guided_res_block(x_nchw, p):
    """Compatibility wrapper for PyTorch-style NCHW inputs.

    Prefer attention_guided_res_block_nhwc: these two transposes are full-tensor
    HBM passes and should be avoided by keeping the network NHWC end-to-end.
    """
    x = jnp.transpose(x_nchw, (0, 2, 3, 1))
    return jnp.transpose(attention_guided_res_block_nhwc(x, p), (0, 3, 1, 2))


def init_params(key):
    """Deterministic synthetic parameters (shapes from the module's __init__)."""
    ks = jax.random.split(key, 14)
    n = lambda k, s, sc: sc * jax.random.normal(k, s, jnp.float32)
    return {
        # SELayer: Linear(SQ -> HID, no bias), Linear(HID -> SQ, no bias); stored (in, out)
        'se_w1': n(ks[0], (SQ, HID), 0.2),
        'se_w2': n(ks[1], (HID, SQ), 0.2),
        # exConv: Conv2d(SQ, EX, 1, bias=True) -> weight as (Cin, Cout), bias (1, Cout)
        'ex_w': n(ks[2], (SQ, EX), 0.1),
        'ex_b': n(ks[3], (1, EX), 0.1),
        'ex_g': 1.0 + 0.1 * jax.random.normal(ks[4], (1, EX), jnp.float32),
        'ex_beta': n(ks[5], (1, EX), 0.1),
        # SeparableConv2d: depthwise 3x3 (EX,1,3,3) stored as (9, EX); pointwise (EX, EX)
        'dw_w': n(ks[6], (9, EX), 0.2),
        'pw_w': n(ks[7], (EX, EX), 0.1),
        'sp_g': 1.0 + 0.1 * jax.random.normal(ks[8], (1, EX), jnp.float32),
        'sp_beta': n(ks[9], (1, EX), 0.1),
        # sqConv: Conv2d(EX, SQ, 1, bias=True)
        'sq_w': n(ks[10], (EX, SQ), 0.1),
        'sq_b': n(ks[11], (1, SQ), 0.1),
        'sq_g': 1.0 + 0.1 * jax.random.normal(ks[12], (1, SQ), jnp.float32),
        'sq_beta': n(ks[13], (1, SQ), 0.1),
    }


def reference_nhwc(x, p):
    """Pure-JAX reference in NHWC, mirroring the PyTorch forward (training-mode BN)."""
    B, H, W, C = x.shape
    pool = jnp.mean(x, axis=(1, 2))                              # (B, C)
    h = jnp.maximum(pool @ p['se_w1'], 0.0)
    y = jax.nn.sigmoid(h @ p['se_w2'])
    xDA = x * y[:, None, None, :]

    def conv1x1(v, wt, b=None):
        o = jnp.einsum('bhwc,cd->bhwd', v, wt)
        return o if b is None else o + b.reshape(1, 1, 1, -1)

    def bn(v, g, bt):
        mu = jnp.mean(v, axis=(0, 1, 2), keepdims=True)
        var = jnp.mean((v - mu) ** 2, axis=(0, 1, 2), keepdims=True)
        return (v - mu) / jnp.sqrt(var + EPS) * g.reshape(1, 1, 1, -1) + bt.reshape(1, 1, 1, -1)

    ex = jnp.maximum(bn(conv1x1(x, p['ex_w'], p['ex_b']), p['ex_g'], p['ex_beta']), 0.0)
    dw_w = p['dw_w'].reshape(3, 3, EX)
    xp = jnp.pad(ex, ((0, 0), (1, 1), (1, 1), (0, 0)))
    dw = jnp.zeros_like(ex)
    for ky in range(3):
        for kx in range(3):
            dw = dw + xp[:, ky:ky + H, kx:kx + W, :] * dw_w[ky, kx][None, None, None, :]
    sp = jnp.maximum(bn(conv1x1(dw, p['pw_w']), p['sp_g'], p['sp_beta']), 0.0)
    sq = bn(conv1x1(sp, p['sq_w'], p['sq_b']), p['sq_g'], p['sq_beta'])
    return x + sq + xDA


if __name__ == "__main__":
    key = jax.random.PRNGKey(0)
    kx, kp = jax.random.split(key)
    x = jax.random.normal(kx, (2, 16, 16, SQ), jnp.float32)      # (B, H, W, C) NHWC
    params = init_params(kp)

    out = jax.block_until_ready(attention_guided_res_block_nhwc(x, params))
    assert out.shape == x.shape and out.dtype == jnp.float32

    ref = reference_nhwc(x, params)
    err = float(jnp.max(jnp.abs(out - ref)))
    if not jnp.allclose(out, ref, atol=3e-2, rtol=3e-2):
        raise SystemExit(f"mismatch vs reference, max abs err = {err:e}")
    print("KERNEL_OK")
</pallas_src>

<mosaic_0001>
module attributes {stable_mosaic.version = 11 : i64} {
  func.func @stats_kernel(%arg0: i32, %arg1: i32, %arg2: memref<1x16x16x32xf32, #tpu.memory_space<vmem>>, %arg3: memref<32x64xf32, #tpu.memory_space<vmem>>, %arg4: memref<1x64xf32, #tpu.memory_space<vmem>>, %arg5: memref<1x64xf32, #tpu.memory_space<vmem>>, %arg6: memref<1x64xf32, #tpu.memory_space<vmem>>, %arg7: memref<9x64x64xf32, #tpu.memory_space<vmem>>, %arg8: memref<1x64xf32, #tpu.memory_space<vmem>>, %arg9: memref<1x64xf32, #tpu.memory_space<vmem>>, %arg10: memref<64x32xf32, #tpu.memory_space<vmem>>, %arg11: memref<1x32xf32, #tpu.memory_space<vmem>>, %arg12: memref<1x32xf32, #tpu.memory_space<vmem>>, %arg13: memref<1x32xf32, #tpu.memory_space<vmem>>, %arg14: memref<2x64xf32, #tpu.memory_space<vmem>>, %arg15: memref<2x64xf32, #tpu.memory_space<vmem>>, %arg16: memref<2x32xf32, #tpu.memory_space<vmem>>, %arg17: memref<2x64xf32, #tpu.memory_space<vmem>>, %arg18: memref<2x64xf32, #tpu.memory_space<vmem>>, %arg19: memref<2x32xf32, #tpu.memory_space<vmem>>, %arg20: memref<18x18x64xf32, #tpu.memory_space<vmem>>) attributes {dimension_semantics = [#tpu.dimension_semantics<arbitrary>, #tpu.dimension_semantics<arbitrary>], iteration_bounds = array<i64: 3, 2>, scalar_prefetch = 0 : i64, scratch_operands = 4 : i64, tpu.core_type = #tpu.core_type<tc>, window_params = [{transform_indices = @transform_0, window_bounds = array<i64: 1, 16, 16, 32>}, {pipeline_mode = #tpu.pipeline_mode<synchronous>, transform_indices = @transform_1, window_bounds = array<i64: 32, 64>}, {pipeline_mode = #tpu.pipeline_mode<synchronous>, transform_indices = @transform_2, window_bounds = array<i64: 1, 64>}, {pipeline_mode = #tpu.pipeline_mode<synchronous>, transform_indices = @transform_3, window_bounds = array<i64: 1, 64>}, {pipeline_mode = #tpu.pipeline_mode<synchronous>, transform_indices = @transform_4, window_bounds = array<i64: 1, 64>}, {pipeline_mode = #tpu.pipeline_mode<synchronous>, transform_indices = @transform_5, window_bounds = array<i64: 9, 64, 64>}, {pipeline_mode = #tpu.pipeline_mode<synchronous>, transform_indices = @transform_6, window_bounds = array<i64: 1, 64>}, {pipeline_mode = #tpu.pipeline_mode<synchronous>, transform_indices = @transform_7, window_bounds = array<i64: 1, 64>}, {pipeline_mode = #tpu.pipeline_mode<synchronous>, transform_indices = @transform_8, window_bounds = array<i64: 64, 32>}, {pipeline_mode = #tpu.pipeline_mode<synchronous>, transform_indices = @transform_9, window_bounds = array<i64: 1, 32>}, {pipeline_mode = #tpu.pipeline_mode<synchronous>, transform_indices = @transform_10, window_bounds = array<i64: 1, 32>}, {pipeline_mode = #tpu.pipeline_mode<synchronous>, transform_indices = @transform_11, window_bounds = array<i64: 1, 32>}, {pipeline_mode = #tpu.pipeline_mode<synchronous>, transform_indices = @transform_12, window_bounds = array<i64: 2, 64>}, {pipeline_mode = #tpu.pipeline_mode<synchronous>, transform_indices = @transform_13, window_bounds = array<i64: 2, 64>}, {pipeline_mode = #tpu.pipeline_mode<synchronous>, transform_indices = @transform_14, window_bounds = array<i64: 2, 32>}]} {
    %c0_i32 = arith.constant 0 : i32
    %0 = arith.cmpi eq, %arg0, %c0_i32 : i32
    %c0_i32_0 = arith.constant 0 : i32
    %1 = arith.cmpi eq, %arg1, %c0_i32_0 : i32
    %2 = arith.andi %0, %1 : i1
    %3 = arith.extui %2 : i1 to i32
    %c0_i32_1 = arith.constant 0 : i32
    %4 = arith.cmpi ne, %3, %c0_i32_1 : i32
    scf.if %4 {
      %cst_125 = arith.constant 0.000000e+00 : f32
      %153 = vector.broadcast %cst_125 : f32 to vector<2x64xf32>
      %c0_126 = arith.constant 0 : index
      %c0_127 = arith.constant 0 : index
      %154 = vector.load %arg17[%c0_126, %c0_127] : memref<2x64xf32, #tpu.memory_space<vmem>>, vector<2x64xf32>
      tpu.vector_store %arg17[%c0_126, %c0_127], %153 {strides = array<i32>} : memref<2x64xf32, #tpu.memory_space<vmem>>, vector<2x64xf32>,
      %cst_128 = arith.constant 0.000000e+00 : f32
      %155 = vector.broadcast %cst_128 : f32 to vector<2x64xf32>
      %c0_129 = arith.constant 0 : index
      %c0_130 = arith.constant 0 : index
      %156 = vector.load %arg18[%c0_129, %c0_130] : memref<2x64xf32, #tpu.memory_space<vmem>>, vector<2x64xf32>
      tpu.vector_store %arg18[%c0_129, %c0_130], %155 {strides = array<i32>} : memref<2x64xf32, #tpu.memory_space<vmem>>, vector<2x64xf32>,
      %cst_131 = arith.constant 0.000000e+00 : f32
      %157 = vector.broadcast %cst_131 : f32 to vector<2x32xf32>
      %c0_132 = arith.constant 0 : index
      %c0_133 = arith.constant 0 : index
      %158 = vector.load %arg19[%c0_132, %c0_133] : memref<2x32xf32, #tpu.memory_space<vmem>>, vector<2x32xf32>
      tpu.vector_store %arg19[%c0_132, %c0_133], %157 {strides = array<i32>} : memref<2x32xf32, #tpu.memory_space<vmem>>, vector<2x32xf32>,
    } else {
    }
    %c0 = arith.constant 0 : index
    %c0_2 = arith.constant 0 : index
    %c0_3 = arith.constant 0 : index
    %c0_4 = arith.constant 0 : index
    %5 = vector.load %arg2[%c0, %c0_2, %c0_3, %c0_4] : memref<1x16x16x32xf32, #tpu.memory_space<vmem>>, vector<1x16x16x32xf32>
    %6 = vector.shape_cast %5 : vector<1x16x16x32xf32> to vector<16x16x32xf32>
    %7 = vector.shape_cast %6 : vector<16x16x32xf32> to vector<256x32xf32>
    %c0_5 = arith.constant 0 : index
    %c0_6 = arith.constant 0 : index
    %8 = vector.load %arg3[%c0_5, %c0_6] : memref<32x64xf32, #tpu.memory_space<vmem>>, vector<32x64xf32>
    %cst = arith.constant dense<0.000000e+00> : vector<256x64xf32>
    %9 = tpu.matmul %7, %8, %cst {dimension_numbers = #tpu.dot_dimension_numbers<[1], [0], [0], [1], [0, 0, 1, 1], [], []>} : vector<256x32xf32>, vector<32x64xf32>, vector<256x64xf32> -> vector<256x64xf32>
    %c0_7 = arith.constant 0 : index
    %c0_8 = arith.constant 0 : index
    %10 = vector.load %arg4[%c0_7, %c0_8] : memref<1x64xf32, #tpu.memory_space<vmem>>, vector<1x64xf32>
    %11 = vector.broadcast %10 : vector<1x64xf32> to vector<256x64xf32>
    %12 = arith.addf %9, %11 : vector<256x64xf32>
    %c0_i32_9 = arith.constant 0 : i32
    %13 = arith.cmpi eq, %arg0, %c0_i32_9 : i32
    %14 = arith.extui %13 : i1 to i32
    %c0_i32_10 = arith.constant 0 : i32
    %15 = arith.cmpi ne, %14, %c0_i32_10 : i32
    scf.if %15 {
      %c0_125 = arith.constant 0 : index
      %c0_126 = arith.constant 0 : index
      %153 = vector.load %arg17[%c0_125, %c0_126] : memref<2x64xf32, #tpu.memory_space<vmem>>, vector<1x64xf32>
      %cst_127 = arith.constant dense<0.000000e+00> : vector<64xf32>
      %154 = vector.multi_reduction <add>, %12, %cst_127 [0] : vector<256x64xf32> to vector<64xf32>
      %155 = vector.shape_cast %154 : vector<64xf32> to vector<1x64xf32>
      %156 = arith.addf %153, %155 : vector<1x64xf32>
      %c0_128 = arith.constant 0 : index
      %c0_129 = arith.constant 0 : index
      %157 = vector.load %arg17[%c0_128, %c0_129] : memref<2x64xf32, #tpu.memory_space<vmem>>, vector<1x64xf32>
      tpu.vector_store %arg17[%c0_128, %c0_129], %156 {strides = array<i32>} : memref<2x64xf32, #tpu.memory_space<vmem>>, vector<1x64xf32>,
      %c1_130 = arith.constant 1 : index
      %c0_131 = arith.constant 0 : index
      %158 = vector.load %arg17[%c1_130, %c0_131] : memref<2x64xf32, #tpu.memory_space<vmem>>, vector<1x64xf32>
      %159 = arith.mulf %12, %12 : vector<256x64xf32>
      %cst_132 = arith.constant dense<0.000000e+00> : vector<64xf32>
      %160 = vector.multi_reduction <add>, %159, %cst_132 [0] : vector<256x64xf32> to vector<64xf32>
      %161 = vector.shape_cast %160 : vector<64xf32> to vector<1x64xf32>
      %162 = arith.addf %158, %161 : vector<1x64xf32>
      %c1_133 = arith.constant 1 : index
      %c0_134 = arith.constant 0 : index
      %163 = vector.load %arg17[%c1_133, %c0_134] : memref<2x64xf32, #tpu.memory_space<vmem>>, vector<1x64xf32>
      tpu.vector_store %arg17[%c1_133, %c0_134], %162 {strides = array<i32>} : memref<2x64xf32, #tpu.memory_space<vmem>>, vector<1x64xf32>,
    } else {
    }
    %c0_i32_11 = arith.constant 0 : i32
    %16 = arith.cmpi eq, %arg0, %c0_i32_11 : i32
    %c1_i32 = arith.constant 1 : i32
    %17 = arith.cmpi eq, %arg1, %c1_i32 : i32
    %18 = arith.andi %16, %17 : i1
    %19 = arith.extui %18 : i1 to i32
    %c0_i32_12 = arith.constant 0 : i32
    %20 = arith.cmpi ne, %19, %c0_i32_12 : i32
    scf.if %20 {
      %c0_125 = arith.constant 0 : index
      %c0_126 = arith.constant 0 : index
      %153 = vector.load %arg5[%c0_125, %c0_126] : memref<1x64xf32, #tpu.memory_space<vmem>>, vector<1x64xf32>
      %c0_127 = arith.constant 0 : index
      %c0_128 = arith.constant 0 : index
      %154 = vector.load %arg6[%c0_127, %c0_128] : memref<1x64xf32, #tpu.memory_space<vmem>>, vector<1x64xf32>
      %c0_129 = arith.constant 0 : index
      %c0_130 = arith.constant 0 : index
      %155 = vector.load %arg17[%c0_129, %c0_130] : memref<2x64xf32, #tpu.memory_space<vmem>>, vector<1x64xf32>
      %cst_131 = arith.constant 0.001953125 : f32
      %156 = vector.broadcast %cst_131 : f32 to vector<1x64xf32>
      %157 = arith.mulf %155, %156 : vector<1x64xf32>
      %c1_132 = arith.constant 1 : index
      %c0_133 = arith.constant 0 : index
      %158 = vector.load %arg17[%c1_132, %c0_133] : memref<2x64xf32, #tpu.memory_space<vmem>>, vector<1x64xf32>
      %cst_134 = arith.constant 0.001953125 : f32
      %159 = vector.broadcast %cst_134 : f32 to vector<1x64xf32>
      %160 = arith.mulf %158, %159 : vector<1x64xf32>
      %161 = arith.mulf %157, %157 : vector<1x64xf32>
      %162 = arith.subf %160, %161 : vector<1x64xf32>
      %cst_135 = arith.constant 0.000000e+00 : f32
      %163 = vector.broadcast %cst_135 : f32 to vector<1x64xf32>
      %164 = arith.maximumf %162, %163 : vector<1x64xf32>
      %cst_136 = arith.constant 9.99999974E-6 : f32
      %165 = vector.broadcast %cst_136 : f32 to vector<1x64xf32>
      %166 = arith.addf %164, %165 : vector<1x64xf32>
      %167 = math.rsqrt %166 : vector<1x64xf32>
      %168 = arith.mulf %153, %167 : vector<1x64xf32>
      %169 = arith.mulf %157, %168 : vector<1x64xf32>
      %170 = arith.subf %154, %169 : vector<1x64xf32>
      %c0_137 = arith.constant 0 : index
      %c0_138 = arith.constant 0 : index
      %171 = vector.load %arg14[%c0_137, %c0_138] : memref<2x64xf32, #tpu.memory_space<vmem>>, vector<1x64xf32>
      tpu.vector_store %arg14[%c0_137, %c0_138], %168 {strides = array<i32>} : memref<2x64xf32, #tpu.memory_space<vmem>>, vector<1x64xf32>,
      %c1_139 = arith.constant 1 : index
      %c0_140 = arith.constant 0 : index
      %172 = vector.load %arg14[%c1_139, %c0_140] : memref<2x64xf32, #tpu.memory_space<vmem>>, vector<1x64xf32>
      tpu.vector_store %arg14[%c1_139, %c0_140], %170 {strides = array<i32>} : memref<2x64xf32, #tpu.memory_space<vmem>>, vector<1x64xf32>,
    } else {
    }
    %c0_13 = arith.constant 0 : index
    %c0_14 = arith.constant 0 : index
    %21 = vector.load %arg5[%c0_13, %c0_14] : memref<1x64xf32, #tpu.memory_space<vmem>>, vector<1x64xf32>
    %c0_15 = arith.constant 0 : index
    %c0_16 = arith.constant 0 : index
    %22 = vector.load %arg6[%c0_15, %c0_16] : memref<1x64xf32, #tpu.memory_space<vmem>>, vector<1x64xf32>
    %c0_17 = arith.constant 0 : index
    %c0_18 = arith.constant 0 : index
    %23 = vector.load %arg17[%c0_17, %c0_18] : memref<2x64xf32, #tpu.memory_space<vmem>>, vector<1x64xf32>
    %cst_19 = arith.constant 0.001953125 : f32
    %24 = vector.broadcast %cst_19 : f32 to vector<1x64xf32>
    %25 = arith.mulf %23, %24 : vector<1x64xf32>
    %c1 = arith.constant 1 : index
    %c0_20 = arith.constant 0 : index
    %26 = vector.load %arg17[%c1, %c0_20] : memref<2x64xf32, #tpu.memory_space<vmem>>, vector<1x64xf32>
    %cst_21 = arith.constant 0.001953125 : f32
    %27 = vector.broadcast %cst_21 : f32 to vector<1x64xf32>
    %28 = arith.mulf %26, %27 : vector<1x64xf32>
    %29 = arith.mulf %25, %25 : vector<1x64xf32>
    %30 = arith.subf %28, %29 : vector<1x64xf32>
    %cst_22 = arith.constant 0.000000e+00 : f32
    %31 = vector.broadcast %cst_22 : f32 to vector<1x64xf32>
    %32 = arith.maximumf %30, %31 : vector<1x64xf32>
    %cst_23 = arith.constant 9.99999974E-6 : f32
    %33 = vector.broadcast %cst_23 : f32 to vector<1x64xf32>
    %34 = arith.addf %32, %33 : vector<1x64xf32>
    %35 = math.rsqrt %34 : vector<1x64xf32>
    %36 = arith.mulf %21, %35 : vector<1x64xf32>
    %37 = arith.mulf %25, %36 : vector<1x64xf32>
    %38 = arith.subf %22, %37 : vector<1x64xf32>
    %39 = vector.broadcast %36 : vector<1x64xf32> to vector<256x64xf32>
    %40 = arith.mulf %12, %39 : vector<256x64xf32>
    %41 = vector.broadcast %38 : vector<1x64xf32> to vector<256x64xf32>
    %42 = arith.addf %40, %41 : vector<256x64xf32>
    %cst_24 = arith.constant 0.000000e+00 : f32
    %43 = vector.broadcast %cst_24 : f32 to vector<256x64xf32>
    %44 = arith.maximumf %42, %43 : vector<256x64xf32>
    %cst_25 = arith.constant 0.000000e+00 : f32
    %45 = vector.broadcast %cst_25 : f32 to vector<1x18x64xf32>
    %cst_26 = arith.constant 0.000000e+00 : f32
    %46 = vector.broadcast %cst_26 : f32 to vector<18x1x64xf32>
    %c0_27 = arith.constant 0 : index
    %c0_28 = arith.constant 0 : index
    %c0_29 = arith.constant 0 : index
    %47 = vector.load %arg20[%c0_27, %c0_28, %c0_29] : memref<18x18x64xf32, #tpu.memory_space<vmem>>, vector<1x18x64xf32>
    tpu.vector_store %arg20[%c0_27, %c0_28, %c0_29], %45 {strides = array<i32>} : memref<18x18x64xf32, #tpu.memory_space<vmem>>, vector<1x18x64xf32>,
    %c17 = arith.constant 17 : index
    %c0_30 = arith.constant 0 : index
    %c0_31 = arith.constant 0 : index
    %48 = vector.load %arg20[%c17, %c0_30, %c0_31] : memref<18x18x64xf32, #tpu.memory_space<vmem>>, vector<1x18x64xf32>
    tpu.vector_store %arg20[%c17, %c0_30, %c0_31], %45 {strides = array<i32>} : memref<18x18x64xf32, #tpu.memory_space<vmem>>, vector<1x18x64xf32>,
    %c0_32 = arith.constant 0 : index
    %c0_33 = arith.constant 0 : index
    %c0_34 = arith.constant 0 : index
    %49 = vector.load %arg20[%c0_32, %c0_33, %c0_34] : memref<18x18x64xf32, #tpu.memory_space<vmem>>, vector<18x1x64xf32>
    tpu.vector_store %arg20[%c0_32, %c0_33, %c0_34], %46 {strides = array<i32>} : memref<18x18x64xf32, #tpu.memory_space<vmem>>, vector<18x1x64xf32>,
    %c0_35 = arith.constant 0 : index
    %c17_36 = arith.constant 17 : index
    %c0_37 = arith.constant 0 : index
    %50 = vector.load %arg20[%c0_35, %c17_36, %c0_37] : memref<18x18x64xf32, #tpu.memory_space<vmem>>, vector<18x1x64xf32>
    tpu.vector_store %arg20[%c0_35, %c17_36, %c0_37], %46 {strides = array<i32>} : memref<18x18x64xf32, #tpu.memory_space<vmem>>, vector<18x1x64xf32>,
    %51 = vector.shape_cast %44 : vector<256x64xf32> to vector<16x16x64xf32>
    %c1_38 = arith.constant 1 : index
    %c1_39 = arith.constant 1 : index
    %c0_40 = arith.constant 0 : index
    %52 = vector.load %arg20[%c1_38, %c1_39, %c0_40] : memref<18x18x64xf32, #tpu.memory_space<vmem>>, vector<16x16x64xf32>
    tpu.vector_store %arg20[%c1_38, %c1_39, %c0_40], %51 {strides = array<i32>} : memref<18x18x64xf32, #tpu.memory_space<vmem>>, vector<16x16x64xf32>,
    %cst_41 = arith.constant 0.000000e+00 : f32
    %53 = vector.broadcast %cst_41 : f32 to vector<256x64xf32>
    %c0_42 = arith.constant 0 : index
    %c0_43 = arith.constant 0 : index
    %c0_44 = arith.constant 0 : index
    %54 = vector.load %arg20[%c0_42, %c0_43, %c0_44] : memref<18x18x64xf32, #tpu.memory_space<vmem>>, vector<16x16x64xf32>
    %55 = vector.shape_cast %54 : vector<16x16x64xf32> to vector<256x64xf32>
    %c0_45 = arith.constant 0 : index
    %c0_46 = arith.constant 0 : index
    %c0_47 = arith.constant 0 : index
    %56 = vector.load %arg7[%c0_45, %c0_46, %c0_47] : memref<9x64x64xf32, #tpu.memory_space<vmem>>, vector<1x64x64xf32>
    %57 = vector.shape_cast %56 : vector<1x64x64xf32> to vector<64x64xf32>
    %cst_48 = arith.constant dense<0.000000e+00> : vector<256x64xf32>
    %58 = tpu.matmul %55, %57, %cst_48 {dimension_numbers = #tpu.dot_dimension_numbers<[1], [0], [0], [1], [0, 0, 1, 1], [], []>} : vector<256x64xf32>, vector<64x64xf32>, vector<256x64xf32> -> vector<256x64xf32>
    %59 = arith.addf %53, %58 : vector<256x64xf32>
    %c0_49 = arith.constant 0 : index
    %c1_50 = arith.constant 1 : index
    %c0_51 = arith.constant 0 : index
    %60 = vector.load %arg20[%c0_49, %c1_50, %c0_51] : memref<18x18x64xf32, #tpu.memory_space<vmem>>, vector<16x16x64xf32>
    %61 = vector.shape_cast %60 : vector<16x16x64xf32> to vector<256x64xf32>
    %c1_52 = arith.constant 1 : index
    %c0_53 = arith.constant 0 : index
    %c0_54 = arith.constant 0 : index
    %62 = vector.load %arg7[%c1_52, %c0_53, %c0_54] : memref<9x64x64xf32, #tpu.memory_space<vmem>>, vector<1x64x64xf32>
    %63 = vector.shape_cast %62 : vector<1x64x64xf32> to vector<64x64xf32>
    %cst_55 = arith.constant dense<0.000000e+00> : vector<256x64xf32>
    %64 = tpu.matmul %61, %63, %cst_55 {dimension_numbers = #tpu.dot_dimension_numbers<[1], [0], [0], [1], [0, 0, 1, 1], [], []>} : vector<256x64xf32>, vector<64x64xf32>, vector<256x64xf32> -> vector<256x64xf32>
    %65 = arith.addf %59, %64 : vector<256x64xf32>
    %c0_56 = arith.constant 0 : index
    %c2 = arith.constant 2 : index
    %c0_57 = arith.constant 0 : index
    %66 = vector.load %arg20[%c0_56, %c2, %c0_57] : memref<18x18x64xf32, #tpu.memory_space<vmem>>, vector<16x16x64xf32>
    %67 = vector.shape_cast %66 : vector<16x16x64xf32> to vector<256x64xf32>
    %c2_58 = arith.constant 2 : index
    %c0_59 = arith.constant 0 : index
    %c0_60 = arith.constant 0 : index
    %68 = vector.load %arg7[%c2_58, %c0_59, %c0_60] : memref<9x64x64xf32, #tpu.memory_space<vmem>>, vector<1x64x64xf32>
    %69 = vector.shape_cast %68 : vector<1x64x64xf32> to vector<64x64xf32>
    %cst_61 = arith.constant dense<0.000000e+00> : vector<256x64xf32>
    %70 = tpu.matmul %67, %69, %cst_61 {dimension_numbers = #tpu.dot_dimension_numbers<[1], [0], [0], [1], [0, 0, 1, 1], [], []>} : vector<256x64xf32>, vector<64x64xf32>, vector<256x64xf32> -> vector<256x64xf32>
    %71 = arith.addf %65, %70 : vector<256x64xf32>
    %c1_62 = arith.constant 1 : index
    %c0_63 = arith.constant 0 : index
    %c0_64 = arith.constant 0 : index
    %72 = vector.load %arg20[%c1_62, %c0_63, %c0_64] : memref<18x18x64xf32, #tpu.memory_space<vmem>>, vector<16x16x64xf32>
    %73 = vector.shape_cast %72 : vector<16x16x64xf32> to vector<256x64xf32>
    %c3 = arith.constant 3 : index
    %c0_65 = arith.constant 0 : index
    %c0_66 = arith.constant 0 : index
    %74 = vector.load %arg7[%c3, %c0_65, %c0_66] : memref<9x64x64xf32, #tpu.memory_space<vmem>>, vector<1x64x64xf32>
    %75 = vector.shape_cast %74 : vector<1x64x64xf32> to vector<64x64xf32>
    %cst_67 = arith.constant dense<0.000000e+00> : vector<256x64xf32>
    %76 = tpu.matmul %73, %75, %cst_67 {dimension_numbers = #tpu.dot_dimension_numbers<[1], [0], [0], [1], [0, 0, 1, 1], [], []>} : vector<256x64xf32>, vector<64x64xf32>, vector<256x64xf32> -> vector<256x64xf32>
    %77 = arith.addf %71, %76 : vector<256x64xf32>
    %c1_68 = arith.constant 1 : index
    %c1_69 = arith.constant 1 : index
    %c0_70 = arith.constant 0 : index
    %78 = vector.load %arg20[%c1_68, %c1_69, %c0_70] : memref<18x18x64xf32, #tpu.memory_space<vmem>>, vector<16x16x64xf32>
    %79 = vector.shape_cast %78 : vector<16x16x64xf32> to vector<256x64xf32>
    %c4 = arith.constant 4 : index
    %c0_71 = arith.constant 0 : index
    %c0_72 = arith.constant 0 : index
    %80 = vector.load %arg7[%c4, %c0_71, %c0_72] : memref<9x64x64xf32, #tpu.memory_space<vmem>>, vector<1x64x64xf32>
    %81 = vector.shape_cast %80 : vector<1x64x64xf32> to vector<64x64xf32>
    %cst_73 = arith.constant dense<0.000000e+00> : vector<256x64xf32>
    %82 = tpu.matmul %79, %81, %cst_73 {dimension_numbers = #tpu.dot_dimension_numbers<[1], [0], [0], [1], [0, 0, 1, 1], [], []>} : vector<256x64xf32>, vector<64x64xf32>, vector<256x64xf32> -> vector<256x64xf32>
    %83 = arith.addf %77, %82 : vector<256x64xf32>
    %c1_74 = arith.constant 1 : index
    %c2_75 = arith.constant 2 : index
    %c0_76 = arith.constant 0 : index
    %84 = vector.load %arg20[%c1_74, %c2_75, %c0_76] : memref<18x18x64xf32, #tpu.memory_space<vmem>>, vector<16x16x64xf32>
    %85 = vector.shape_cast %84 : vector<16x16x64xf32> to vector<256x64xf32>
    %c5 = arith.constant 5 : index
    %c0_77 = arith.constant 0 : index
    %c0_78 = arith.constant 0 : index
    %86 = vector.load %arg7[%c5, %c0_77, %c0_78] : memref<9x64x64xf32, #tpu.memory_space<vmem>>, vector<1x64x64xf32>
    %87 = vector.shape_cast %86 : vector<1x64x64xf32> to vector<64x64xf32>
    %cst_79 = arith.constant dense<0.000000e+00> : vector<256x64xf32>
    %88 = tpu.matmul %85, %87, %cst_79 {dimension_numbers = #tpu.dot_dimension_numbers<[1], [0], [0], [1], [0, 0, 1, 1], [], []>} : vector<256x64xf32>, vector<64x64xf32>, vector<256x64xf32> -> vector<256x64xf32>
    %89 = arith.addf %83, %88 : vector<256x64xf32>
    %c2_80 = arith.constant 2 : index
    %c0_81 = arith.constant 0 : index
    %c0_82 = arith.constant 0 : index
    %90 = vector.load %arg20[%c2_80, %c0_81, %c0_82] : memref<18x18x64xf32, #tpu.memory_space<vmem>>, vector<16x16x64xf32>
    %91 = vector.shape_cast %90 : vector<16x16x64xf32> to vector<256x64xf32>
    %c6 = arith.constant 6 : index
    %c0_83 = arith.constant 0 : index
    %c0_84 = arith.constant 0 : index
    %92 = vector.load %arg7[%c6, %c0_83, %c0_84] : memref<9x64x64xf32, #tpu.memory_space<vmem>>, vector<1x64x64xf32>
    %93 = vector.shape_cast %92 : vector<1x64x64xf32> to vector<64x64xf32>
    %cst_85 = arith.constant dense<0.000000e+00> : vector<256x64xf32>
    %94 = tpu.matmul %91, %93, %cst_85 {dimension_numbers = #tpu.dot_dimension_numbers<[1], [0], [0], [1], [0, 0, 1, 1], [], []>} : vector<256x64xf32>, vector<64x64xf32>, vector<256x64xf32> -> vector<256x64xf32>
    %95 = arith.addf %89, %94 : vector<256x64xf32>
    %c2_86 = arith.constant 2 : index
    %c1_87 = arith.constant 1 : index
    %c0_88 = arith.constant 0 : index
    %96 = vector.load %arg20[%c2_86, %c1_87, %c0_88] : memref<18x18x64xf32, #tpu.memory_space<vmem>>, vector<16x16x64xf32>
    %97 = vector.shape_cast %96 : vector<16x16x64xf32> to vector<256x64xf32>
    %c7 = arith.constant 7 : index
    %c0_89 = arith.constant 0 : index
    %c0_90 = arith.constant 0 : index
    %98 = vector.load %arg7[%c7, %c0_89, %c0_90] : memref<9x64x64xf32, #tpu.memory_space<vmem>>, vector<1x64x64xf32>
    %99 = vector.shape_cast %98 : vector<1x64x64xf32> to vector<64x64xf32>
    %cst_91 = arith.constant dense<0.000000e+00> : vector<256x64xf32>
    %100 = tpu.matmul %97, %99, %cst_91 {dimension_numbers = #tpu.dot_dimension_numbers<[1], [0], [0], [1], [0, 0, 1, 1], [], []>} : vector<256x64xf32>, vector<64x64xf32>, vector<256x64xf32> -> vector<256x64xf32>
    %101 = arith.addf %95, %100 : vector<256x64xf32>
    %c2_92 = arith.constant 2 : index
    %c2_93 = arith.constant 2 : index
    %c0_94 = arith.constant 0 : index
    %102 = vector.load %arg20[%c2_92, %c2_93, %c0_94] : memref<18x18x64xf32, #tpu.memory_space<vmem>>, vector<16x16x64xf32>
    %103 = vector.shape_cast %102 : vector<16x16x64xf32> to vector<256x64xf32>
    %c8 = arith.constant 8 : index
    %c0_95 = arith.constant 0 : index
    %c0_96 = arith.constant 0 : index
    %104 = vector.load %arg7[%c8, %c0_95, %c0_96] : memref<9x64x64xf32, #tpu.memory_space<vmem>>, vector<1x64x64xf32>
    %105 = vector.shape_cast %104 : vector<1x64x64xf32> to vector<64x64xf32>
    %cst_97 = arith.constant dense<0.000000e+00> : vector<256x64xf32>
    %106 = tpu.matmul %103, %105, %cst_97 {dimension_numbers = #tpu.dot_dimension_numbers<[1], [0], [0], [1], [0, 0, 1, 1], [], []>} : vector<256x64xf32>, vector<64x64xf32>, vector<256x64xf32> -> vector<256x64xf32>
    %107 = arith.addf %101, %106 : vector<256x64xf32>
    %c1_i32_98 = arith.constant 1 : i32
    %108 = arith.cmpi eq, %arg0, %c1_i32_98 : i32
    %109 = arith.extui %108 : i1 to i32
    %c0_i32_99 = arith.constant 0 : i32
    %110 = arith.cmpi ne, %109, %c0_i32_99 : i32
    scf.if %110 {
      %c0_125 = arith.constant 0 : index
      %c0_126 = arith.constant 0 : index
      %153 = vector.load %arg18[%c0_125, %c0_126] : memref<2x64xf32, #tpu.memory_space<vmem>>, vector<1x64xf32>
      %cst_127 = arith.constant dense<0.000000e+00> : vector<64xf32>
      %154 = vector.multi_reduction <add>, %107, %cst_127 [0] : vector<256x64xf32> to vector<64xf32>
      %155 = vector.shape_cast %154 : vector<64xf32> to vector<1x64xf32>
      %156 = arith.addf %153, %155 : vector<1x64xf32>
      %c0_128 = arith.constant 0 : index
      %c0_129 = arith.constant 0 : index
      %157 = vector.load %arg18[%c0_128, %c0_129] : memref<2x64xf32, #tpu.memory_space<vmem>>, vector<1x64xf32>
      tpu.vector_store %arg18[%c0_128, %c0_129], %156 {strides = array<i32>} : memref<2x64xf32, #tpu.memory_space<vmem>>, vector<1x64xf32>,
      %c1_130 = arith.constant 1 : index
      %c0_131 = arith.constant 0 : index
      %158 = vector.load %arg18[%c1_130, %c0_131] : memref<2x64xf32, #tpu.memory_space<vmem>>, vector<1x64xf32>
      %159 = arith.mulf %107, %107 : vector<256x64xf32>
      %cst_132 = arith.constant dense<0.000000e+00> : vector<64xf32>
      %160 = vector.multi_reduction <add>, %159, %cst_132 [0] : vector<256x64xf32> to vector<64xf32>
      %161 = vector.shape_cast %160 : vector<64xf32> to vector<1x64xf32>
      %162 = arith.addf %158, %161 : vector<1x64xf32>
      %c1_133 = arith.constant 1 : index
      %c0_134 = arith.constant 0 : index
      %163 = vector.load %arg18[%c1_133, %c0_134] : memref<2x64xf32, #tpu.memory_space<vmem>>, vector<1x64xf32>
      tpu.vector_store %arg18[%c1_133, %c0_134], %162 {strides = array<i32>} : memref<2x64xf32, #tpu.memory_space<vmem>>, vector<1x64xf32>,
    } else {
    }
    %c1_i32_100 = arith.constant 1 : i32
    %111 = arith.cmpi eq, %arg0, %c1_i32_100 : i32
    %c1_i32_101 = arith.constant 1 : i32
    %112 = arith.cmpi eq, %arg1, %c1_i32_101 : i32
    %113 = arith.andi %111, %112 : i1
    %114 = arith.extui %113 : i1 to i32
    %c0_i32_102 = arith.constant 0 : i32
    %115 = arith.cmpi ne, %114, %c0_i32_102 : i32
    scf.if %115 {
      %c0_125 = arith.constant 0 : index
      %c0_126 = arith.constant 0 : index
      %153 = vector.load %arg8[%c0_125, %c0_126] : memref<1x64xf32, #tpu.memory_space<vmem>>, vector<1x64xf32>
      %c0_127 = arith.constant 0 : index
      %c0_128 = arith.constant 0 : index
      %154 = vector.load %arg9[%c0_127, %c0_128] : memref<1x64xf32, #tpu.memory_space<vmem>>, vector<1x64xf32>
      %c0_129 = arith.constant 0 : index
      %c0_130 = arith.constant 0 : index
      %155 = vector.load %arg18[%c0_129, %c0_130] : memref<2x64xf32, #tpu.memory_space<vmem>>, vector<1x64xf32>
      %cst_131 = arith.constant 0.001953125 : f32
      %156 = vector.broadcast %cst_131 : f32 to vector<1x64xf32>
      %157 = arith.mulf %155, %156 : vector<1x64xf32>
      %c1_132 = arith.constant 1 : index
      %c0_133 = arith.constant 0 : index
      %158 = vector.load %arg18[%c1_132, %c0_133] : memref<2x64xf32, #tpu.memory_space<vmem>>, vector<1x64xf32>
      %cst_134 = arith.constant 0.001953125 : f32
      %159 = vector.broadcast %cst_134 : f32 to vector<1x64xf32>
      %160 = arith.mulf %158, %159 : vector<1x64xf32>
      %161 = arith.mulf %157, %157 : vector<1x64xf32>
      %162 = arith.subf %160, %161 : vector<1x64xf32>
      %cst_135 = arith.constant 0.000000e+00 : f32
      %163 = vector.broadcast %cst_135 : f32 to vector<1x64xf32>
      %164 = arith.maximumf %162, %163 : vector<1x64xf32>
      %cst_136 = arith.constant 9.99999974E-6 : f32
      %165 = vector.broadcast %cst_136 : f32 to vector<1x64xf32>
      %166 = arith.addf %164, %165 : vector<1x64xf32>
      %167 = math.rsqrt %166 : vector<1x64xf32>
      %168 = arith.mulf %153, %167 : vector<1x64xf32>
      %169 = arith.mulf %157, %168 : vector<1x64xf32>
      %170 = arith.subf %154, %169 : vector<1x64xf32>
      %c0_137 = arith.constant 0 : index
      %c0_138 = arith.constant 0 : index
      %171 = vector.load %arg15[%c0_137, %c0_138] : memref<2x64xf32, #tpu.memory_space<vmem>>, vector<1x64xf32>
      tpu.vector_store %arg15[%c0_137, %c0_138], %168 {strides = array<i32>} : memref<2x64xf32, #tpu.memory_space<vmem>>, vector<1x64xf32>,
      %c1_139 = arith.constant 1 : index
      %c0_140 = arith.constant 0 : index
      %172 = vector.load %arg15[%c1_139, %c0_140] : memref<2x64xf32, #tpu.memory_space<vmem>>, vector<1x64xf32>
      tpu.vector_store %arg15[%c1_139, %c0_140], %170 {strides = array<i32>} : memref<2x64xf32, #tpu.memory_space<vmem>>, vector<1x64xf32>,
    } else {
    }
    %c0_103 = arith.constant 0 : index
    %c0_104 = arith.constant 0 : index
    %116 = vector.load %arg8[%c0_103, %c0_104] : memref<1x64xf32, #tpu.memory_space<vmem>>, vector<1x64xf32>
    %c0_105 = arith.constant 0 : index
    %c0_106 = arith.constant 0 : index
    %117 = vector.load %arg9[%c0_105, %c0_106] : memref<1x64xf32, #tpu.memory_space<vmem>>, vector<1x64xf32>
    %c0_107 = arith.constant 0 : index
    %c0_108 = arith.constant 0 : index
    %118 = vector.load %arg18[%c0_107, %c0_108] : memref<2x64xf32, #tpu.memory_space<vmem>>, vector<1x64xf32>
    %cst_109 = arith.constant 0.001953125 : f32
    %119 = vector.broadcast %cst_109 : f32 to vector<1x64xf32>
    %120 = arith.mulf %118, %119 : vector<1x64xf32>
    %c1_110 = arith.constant 1 : index
    %c0_111 = arith.constant 0 : index
    %121 = vector.load %arg18[%c1_110, %c0_111] : memref<2x64xf32, #tpu.memory_space<vmem>>, vector<1x64xf32>
    %cst_112 = arith.constant 0.001953125 : f32
    %122 = vector.broadcast %cst_112 : f32 to vector<1x64xf32>
    %123 = arith.mulf %121, %122 : vector<1x64xf32>
    %124 = arith.mulf %120, %120 : vector<1x64xf32>
    %125 = arith.subf %123, %124 : vector<1x64xf32>
    %cst_113 = arith.constant 0.000000e+00 : f32
    %126 = vector.broadcast %cst_113 : f32 to vector<1x64xf32>
    %127 = arith.maximumf %125, %126 : vector<1x64xf32>
    %cst_114 = arith.constant 9.99999974E-6 : f32
    %128 = vector.broadcast %cst_114 : f32 to vector<1x64xf32>
    %129 = arith.addf %127, %128 : vector<1x64xf32>
    %130 = math.rsqrt %129 : vector<1x64xf32>
    %131 = arith.mulf %116, %130 : vector<1x64xf32>
    %132 = arith.mulf %120, %131 : vector<1x64xf32>
    %133 = arith.subf %117, %132 : vector<1x64xf32>
    %134 = vector.broadcast %131 : vector<1x64xf32> to vector<256x64xf32>
    %135 = arith.mulf %107, %134 : vector<256x64xf32>
    %136 = vector.broadcast %133 : vector<1x64xf32> to vector<256x64xf32>
    %137 = arith.addf %135, %136 : vector<256x64xf32>
    %cst_115 = arith.constant 0.000000e+00 : f32
    %138 = vector.broadcast %cst_115 : f32 to vector<256x64xf32>
    %139 = arith.maximumf %137, %138 : vector<256x64xf32>
    %c0_116 = arith.constant 0 : index
    %c0_117 = arith.constant 0 : index
    %140 = vector.load %arg10[%c0_116, %c0_117] : memref<64x32xf32, #tpu.memory_space<vmem>>, vector<64x32xf32>
    %cst_118 = arith.constant dense<0.000000e+00> : vector<256x32xf32>
    %141 = tpu.matmul %139, %140, %cst_118 {dimension_numbers = #tpu.dot_dimension_numbers<[1], [0], [0], [1], [0, 0, 1, 1], [], []>} : vector<256x64xf32>, vector<64x32xf32>, vector<256x32xf32> -> vector<256x32xf32>
    %c0_119 = arith.constant 0 : index
    %c0_120 = arith.constant 0 : index
    %142 = vector.load %arg11[%c0_119, %c0_120] : memref<1x32xf32, #tpu.memory_space<vmem>>, vector<1x32xf32>
    %143 = vector.broadcast %142 : vector<1x32xf32> to vector<256x32xf32>
    %144 = arith.addf %141, %143 : vector<256x32xf32>
    %c2_i32 = arith.constant 2 : i32
    %145 = arith.cmpi eq, %arg0, %c2_i32 : i32
    %146 = arith.extui %145 : i1 to i32
    %c0_i32_121 = arith.constant 0 : i32
    %147 = arith.cmpi ne, %146, %c0_i32_121 : i32
    scf.if %147 {
      %c0_125 = arith.constant 0 : index
      %c0_126 = arith.constant 0 : index
      %153 = vector.load %arg19[%c0_125, %c0_126] : memref<2x32xf32, #tpu.memory_space<vmem>>, vector<1x32xf32>
      %cst_127 = arith.constant dense<0.000000e+00> : vector<32xf32>
      %154 = vector.multi_reduction <add>, %144, %cst_127 [0] : vector<256x32xf32> to vector<32xf32>
      %155 = vector.shape_cast %154 : vector<32xf32> to vector<1x32xf32>
      %156 = arith.addf %153, %155 : vector<1x32xf32>
      %c0_128 = arith.constant 0 : index
      %c0_129 = arith.constant 0 : index
      %157 = vector.load %arg19[%c0_128, %c0_129] : memref<2x32xf32, #tpu.memory_space<vmem>>, vector<1x32xf32>
      tpu.vector_store %arg19[%c0_128, %c0_129], %156 {strides = array<i32>} : memref<2x32xf32, #tpu.memory_space<vmem>>, vector<1x32xf32>,
      %c1_130 = arith.constant 1 : index
      %c0_131 = arith.constant 0 : index
      %158 = vector.load %arg19[%c1_130, %c0_131] : memref<2x32xf32, #tpu.memory_space<vmem>>, vector<1x32xf32>
      %159 = arith.mulf %144, %144 : vector<256x32xf32>
      %cst_132 = arith.constant dense<0.000000e+00> : vector<32xf32>
      %160 = vector.multi_reduction <add>, %159, %cst_132 [0] : vector<256x32xf32> to vector<32xf32>
      %161 = vector.shape_cast %160 : vector<32xf32> to vector<1x32xf32>
      %162 = arith.addf %158, %161 : vector<1x32xf32>
      %c1_133 = arith.constant 1 : index
      %c0_134 = arith.constant 0 : index
      %163 = vector.load %arg19[%c1_133, %c0_134] : memref<2x32xf32, #tpu.memory_space<vmem>>, vector<1x32xf32>
      tpu.vector_store %arg19[%c1_133, %c0_134], %162 {strides = array<i32>} : memref<2x32xf32, #tpu.memory_space<vmem>>, vector<1x32xf32>,
    } else {
    }
    %c2_i32_122 = arith.constant 2 : i32
    %148 = arith.cmpi eq, %arg0, %c2_i32_122 : i32
    %c1_i32_123 = arith.constant 1 : i32
    %149 = arith.cmpi eq, %arg1, %c1_i32_123 : i32
    %150 = arith.andi %148, %149 : i1
    %151 = arith.extui %150 : i1 to i32
    %c0_i32_124 = arith.constant 0 : i32
    %152 = arith.cmpi ne, %151, %c0_i32_124 : i32
    scf.if %152 {
      %c0_125 = arith.constant 0 : index
      %c0_126 = arith.constant 0 : index
      %153 = vector.load %arg12[%c0_125, %c0_126] : memref<1x32xf32, #tpu.memory_space<vmem>>, vector<1x32xf32>
      %c0_127 = arith.constant 0 : index
      %c0_128 = arith.constant 0 : index
      %154 = vector.load %arg13[%c0_127, %c0_128] : memref<1x32xf32, #tpu.memory_space<vmem>>, vector<1x32xf32>
      %c0_129 = arith.constant 0 : index
      %c0_130 = arith.constant 0 : index
      %155 = vector.load %arg19[%c0_129, %c0_130] : memref<2x32xf32, #tpu.memory_space<vmem>>, vector<1x32xf32>
      %cst_131 = arith.constant 0.001953125 : f32
      %156 = vector.broadcast %cst_131 : f32 to vector<1x32xf32>
      %157 = arith.mulf %155, %156 : vector<1x32xf32>
      %c1_132 = arith.constant 1 : index
      %c0_133 = arith.constant 0 : index
      %158 = vector.load %arg19[%c1_132, %c0_133] : memref<2x32xf32, #tpu.memory_space<vmem>>, vector<1x32xf32>
      %cst_134 = arith.constant 0.001953125 : f32
      %159 = vector.broadcast %cst_134 : f32 to vector<1x32xf32>
      %160 = arith.mulf %158, %159 : vector<1x32xf32>
      %161 = arith.mulf %157, %157 : vector<1x32xf32>
      %162 = arith.subf %160, %161 : vector<1x32xf32>
      %cst_135 = arith.constant 0.000000e+00 : f32
      %163 = vector.broadcast %cst_135 : f32 to vector<1x32xf32>
      %164 = arith.maximumf %162, %163 : vector<1x32xf32>
      %cst_136 = arith.constant 9.99999974E-6 : f32
      %165 = vector.broadcast %cst_136 : f32 to vector<1x32xf32>
      %166 = arith.addf %164, %165 : vector<1x32xf32>
      %167 = math.rsqrt %166 : vector<1x32xf32>
      %168 = arith.mulf %153, %167 : vector<1x32xf32>
      %169 = arith.mulf %157, %168 : vector<1x32xf32>
      %170 = arith.subf %154, %169 : vector<1x32xf32>
      %c0_137 = arith.constant 0 : index
      %c0_138 = arith.constant 0 : index
      %171 = vector.load %arg16[%c0_137, %c0_138] : memref<2x32xf32, #tpu.memory_space<vmem>>, vector<1x32xf32>
      tpu.vector_store %arg16[%c0_137, %c0_138], %168 {strides = array<i32>} : memref<2x32xf32, #tpu.memory_space<vmem>>, vector<1x32xf32>,
      %c1_139 = arith.constant 1 : index
      %c0_140 = arith.constant 0 : index
      %172 = vector.load %arg16[%c1_139, %c0_140] : memref<2x32xf32, #tpu.memory_space<vmem>>, vector<1x32xf32>
      tpu.vector_store %arg16[%c1_139, %c0_140], %170 {strides = array<i32>} : memref<2x32xf32, #tpu.memory_space<vmem>>, vector<1x32xf32>,
    } else {
    }
    return
  }
  func.func @transform_0(%arg0: i32, %arg1: i32) -> (i32, i32, i32, i32) {
    %c0_i32 = arith.constant 0 : i32
    %c0_i32_0 = arith.constant 0 : i32
    %c0_i32_1 = arith.constant 0 : i32
    %c0_i32_2 = arith.constant 0 : i32
    return %arg1, %c0_i32, %c0_i32_0, %c0_i32_1 : i32, i32, i32, i32
  }
  func.func @transform_1(%arg0: i32, %arg1: i32) -> (i32, i32) {
    %c0_i32 = arith.constant 0 : i32
    %c0_i32_0 = arith.constant 0 : i32
    %c0_i32_1 = arith.constant 0 : i32
    return %c0_i32, %c0_i32_0 : i32, i32
  }
  func.func @transform_2(%arg0: i32, %arg1: i32) -> (i32, i32) {
    %c0_i32 = arith.constant 0 : i32
    %c0_i32_0 = arith.constant 0 : i32
    %c0_i32_1 = arith.constant 0 : i32
    return %c0_i32, %c0_i32_0 : i32, i32
  }
  func.func @transform_3(%arg0: i32, %arg1: i32) -> (i32, i32) {
    %c0_i32 = arith.constant 0 : i32
    %c0_i32_0 = arith.constant 0 : i32
    %c0_i32_1 = arith.constant 0 : i32
    return %c0_i32, %c0_i32_0 : i32, i32
  }
  func.func @transform_4(%arg0: i32, %arg1: i32) -> (i32, i32) {
    %c0_i32 = arith.constant 0 : i32
    %c0_i32_0 = arith.constant 0 : i32
    %c0_i32_1 = arith.constant 0 : i32
    return %c0_i32, %c0_i32_0 : i32, i32
  }
  func.func @transform_5(%arg0: i32, %arg1: i32) -> (i32, i32, i32) {
    %c0_i32 = arith.constant 0 : i32
    %c0_i32_0 = arith.constant 0 : i32
    %c0_i32_1 = arith.constant 0 : i32
    %c0_i32_2 = arith.constant 0 : i32
    return %c0_i32, %c0_i32_0, %c0_i32_1 : i32, i32, i32
  }
  func.func @transform_6(%arg0: i32, %arg1: i32) -> (i32, i32) {
    %c0_i32 = arith.constant 0 : i32
    %c0_i32_0 = arith.constant 0 : i32
    %c0_i32_1 = arith.constant 0 : i32
    return %c0_i32, %c0_i32_0 : i32, i32
  }
  func.func @transform_7(%arg0: i32, %arg1: i32) -> (i32, i32) {
    %c0_i32 = arith.constant 0 : i32
    %c0_i32_0 = arith.constant 0 : i32
    %c0_i32_1 = arith.constant 0 : i32
    return %c0_i32, %c0_i32_0 : i32, i32
  }
  func.func @transform_8(%arg0: i32, %arg1: i32) -> (i32, i32) {
    %c0_i32 = arith.constant 0 : i32
    %c0_i32_0 = arith.constant 0 : i32
    %c0_i32_1 = arith.constant 0 : i32
    return %c0_i32, %c0_i32_0 : i32, i32
  }
  func.func @transform_9(%arg0: i32, %arg1: i32) -> (i32, i32) {
    %c0_i32 = arith.constant 0 : i32
    %c0_i32_0 = arith.constant 0 : i32
    %c0_i32_1 = arith.constant 0 : i32
    return %c0_i32, %c0_i32_0 : i32, i32
  }
  func.func @transform_10(%arg0: i32, %arg1: i32) -> (i32, i32) {
    %c0_i32 = arith.constant 0 : i32
    %c0_i32_0 = arith.constant 0 : i32
    %c0_i32_1 = arith.constant 0 : i32
    return %c0_i32, %c0_i32_0 : i32, i32
  }
  func.func @transform_11(%arg0: i32, %arg1: i32) -> (i32, i32) {
    %c0_i32 = arith.constant 0 : i32
    %c0_i32_0 = arith.constant 0 : i32
    %c0_i32_1 = arith.constant 0 : i32
    return %c0_i32, %c0_i32_0 : i32, i32
  }
  func.func @transform_12(%arg0: i32, %arg1: i32) -> (i32, i32) {
    %c0_i32 = arith.constant 0 : i32
    %c0_i32_0 = arith.constant 0 : i32
    %c0_i32_1 = arith.constant 0 : i32
    return %c0_i32, %c0_i32_0 : i32, i32
  }
  func.func @transform_13(%arg0: i32, %arg1: i32) -> (i32, i32) {
    %c0_i32 = arith.constant 0 : i32
    %c0_i32_0 = arith.constant 0 : i32
    %c0_i32_1 = arith.constant 0 : i32
    return %c0_i32, %c0_i32_0 : i32, i32
  }
  func.func @transform_14(%arg0: i32, %arg1: i32) -> (i32, i32) {
    %c0_i32 = arith.constant 0 : i32
    %c0_i32_0 = arith.constant 0 : i32
    %c0_i32_1 = arith.constant 0 : i32
    return %c0_i32, %c0_i32_0 : i32, i32
  }
}

</mosaic_0001>

<bundles_post_ra>
// kernel: tpu_custom_call.1
= control target key start
LH: loop header
LB: loop body
LE: loop exit
PB: predicated region body
PF: predicated region fallthrough
CT: control target
= control target key end

     0   :  { %s7745_s0 = inlined_call_operand.hbm [shape: f32[2,16,16,32], index: 0, kind: input, shape index: {}]   ;;  %s7746_s1 = inlined_call_operand.vmem [shape: f32[32,64], index: 1, kind: input, shape index: {}]   ;;  %s7747_s2 = inlined_call_operand.vmem [shape: f32[1,64], index: 2, kind: input, shape index: {}]   ;;  %s7748_s3 = inlined_call_operand.vmem [shape: f32[1,64], index: 3, kind: input, shape index: {}]   ;;  %s7749_s4 = inlined_call_operand.vmem [shape: f32[1,64], index: 4, kind: input, shape index: {}]   ;;  %s7750_s5 = inlined_call_operand.hbm [shape: f32[9,64,64], index: 5, kind: input, shape index: {}]   ;;  %s7751_s6 = inlined_call_operand.vmem [shape: f32[1,64], index: 6, kind: input, shape index: {}]   ;;  %s7752_s7 = inlined_call_operand.vmem [shape: f32[1,64], index: 7, kind: input, shape index: {}]   ;;  %s7753_s8 = inlined_call_operand.vmem [shape: f32[64,32], index: 8, kind: input, shape index: {}]   ;;  %s7754_s9 = inlined_call_operand.vmem [shape: f32[1,32], index: 9, kind: input, shape index: {}]   ;;  %s7755_s10 = inlined_call_operand.vmem [shape: f32[1,32], index: 10, kind: input, shape index: {}]   ;;  %s7756_s11 = inlined_call_operand.vmem [shape: f32[1,32], index: 11, kind: input, shape index: {}]   ;;  %s7757_s12 = inlined_call_operand.hbm [shape: f32[2,64], index: 12, kind: output, shape index: {0}]   ;;  %s7758_s13 = inlined_call_operand.hbm [shape: f32[2,64], index: 13, kind: output, shape index: {1}]   ;;  %s7759_s14 = inlined_call_operand.hbm [shape: f32[2,32], index: 14, kind: output, shape index: {2}]  }
   0x1   :  { %7783 = sst [smem:[#allocation34_spill]] %s7750_s5 }
   0x2   :  { %7784 = sst [smem:[#allocation35_spill]] %s7753_s8 }
   0x3   :  { %7785 = sst [smem:[#allocation36_spill]] %s7754_s9 }
   0x4   :  { %7786 = sst [smem:[#allocation37_spill]] %s7755_s10 }
   0x5   :  { %7787 = sst [smem:[#allocation38_spill]] %s7756_s11 }
   0x6   :  { %7788 = sst [smem:[#allocation39_spill]] %s7757_s12 }
   0x7   :  { %7789 = sst [smem:[#allocation40_spill]] %s7758_s13 }
   0x8   :  { %7790 = sst [smem:[#allocation41_spill]] %s7759_s14 }
   0x9   :  { %20 = vsyncpa [#allocation7], 0 }
   0xa   :  { %22 = vsyncpa [#allocation7 + $0x1], 0 }
   0xb   :  { %23 = vsyncpa [#allocation10], 0 }
   0xc   :  { %24 = vsyncpa [#allocation8], 0 }
   0xd   :  { %25 = vsyncpa [#allocation13], 0  ;;  %s5366_s29 = smov 0   ;;  %s5368_s30 = smov 0  }
   0xe   :  { %s5370_s15 = smov 0   ;;  %s5372_s16 = smov 0  }
   0xf   :  { %s5374_s17 = smov 0   ;;  %s5376_s18 = smov 0  }
  0x10   :  { %s5378_s19 = smov 0   ;;  %s5380_s20 = smov 0  }
  0x11 LB: > { %7791 = sst [smem:[#allocation19_spill]] %s5277_s19  ;;  %s7760_s21 = sadd.s32 4294967295, %s5281_s20   ;;  %s5281_s20 = sphi %s5380_s20, %s31_s20   ;;  %s5277_s19 = sphi %s5378_s19, %s7850_s19   ;;  %s5273_s18 = sphi %s5376_s18, %s7855_s18   ;;  %s5269_s17 = sphi %s5374_s17, %s7848_s17   ;;  %s5265_s16 = sphi %s5372_s16, %s7854_s16   ;;  %s5261_s15 = sphi %s5370_s15, %s7853_s15   ;;  %s5257_s30 = sphi %s5368_s30, %s7852_s30   ;;  %s5253_s29 = sphi %s5366_s29, %s7851_s29  }
  0x12   : > { %p63_p0 = scmp.ne.s32.totalorder %s5257_s30, %s5253_s29  ;;  %p5408_p1 = scmp.eq.s32.totalorder %s7760_s21, 0 }
  0x13   : > { %p4547_p2 = scmp.ge.s32.totalorder %s5281_s20, 1  ;;  %p368_p3 = scmp.lt.s32.totalorder %s5281_s20, 7 }
  0x14   : > { %p5416_p4 = por %p5408_p1, %p63_p0  ;;  %s7794_s5 = sld [smem:[#allocation34_spill]] }
  0x15   : > { %p5423_p5 = pnand %p4547_p2, %p368_p3  ;;  %s5283_s28 = smov [#allocation9]  }
  0x16   : > { %s393_s29 = sshll.u32 %s5283_s28, 4  ;;  %s7761_s24 = smov 128   ;;  %s394_s29 = int_to_ptr.vmem [resolvable:$true] %s393_s29 }
  0x17   : > { %p4958_p6 = pneg %p5423_p5  ;;  %s7762_s25 = smov 8  }
  0x18   : > { %s40_s21 = sadd.s32 1, %s5273_s18  ;;  %s50_s14 = sadd.s32 1, %s5261_s15 }
  0x19   : > { %p4959_p7 = pnand %p4958_p6, %p5408_p1  ;;  %p41_p8 = scmp.ge.s32.totalorder %s40_s21, 2 }
  0x1a   : > { %s391_s26 = sshll.u32 %s7794_s5, 4  ;;  %s43_s5 = sadd.s32 1, %s5277_s19  ;;  %s392_s26 = int_to_ptr.hbm [resolvable:$true] %s391_s26 }
  0x1b   : > { %4961 = dma.hbm_to_vmem [thread:$0]  (!%p4959_p7), %s392_s26, 9216, %s394_s29, [#allocation10], %s7761_s24, %s7761_s24, %s7762_s25  }
  0x1c   : > { %p57_p9 = scmp.ne.s32.totalorder %s5261_s15, %s5257_s30  ;;  %s7857_s21 = smov (%p41_p8, %s40_s21), 0 }
  0x1d   : > { %7796 = sst [smem:[#allocation20_spill]] %s7857_s21  ;;  %s7859_s5 = smov (!%p41_p8, %s43_s5), %s5277_s19 }
  0x1e   : > { %s47_s28 = ssub.s32 %s5273_s18, %s7857_s21  ;;  %p58_p10 = scmp.eq.s32.totalorder %s5281_s20, 0 }
  0x1f   : > { %p45_p11 = scmp.ge.s32.totalorder %s7859_s5, 3  ;;  %p48_p12 = scmp.eq.s32.totalorder %s47_s28, 0 }
  0x20   : > { %p5445_p13 = por %p58_p10, %p57_p9  ;;  %s425_s29 = sand.u32 1, %s5261_s15  }
  0x21   : > { %s7861_s5 = smov (%p45_p11, %s7859_s5), 0  ;;  %s4919_s24 = sshll.u32 %s5273_s18, 8 }
  0x22   : > { %7798 = sst [smem:[#allocation21_spill]] %s7861_s5  ;;  %p4967_p0 = scmp.lt.s32.totalorder %s5281_s20, 6 }
  0x23   : > { %s5452_s26 = scalar_select %p48_p12, %s5261_s15, %s50_s14  }
  0x24   : > { %s4550_s25 = sshll.u32 %s425_s29, 8  ;;  %s434_s21 = scalar_lea.hbm %s7745_s0, %s4919_s24 }
  0x25   : > { %s435_s19 = sshll.u32 %s434_s21, 4  ;;  %s429_s10 = scalar_lea.vmem [#allocation6], %s4550_s25  ;;  %s436_s19 = int_to_ptr.hbm [resolvable:$true] %s435_s19 }
  0x26   : > { %s437_s28 = sshll.u32 %s429_s10, 4  ;;  %p4963_p2 = pnand %p4967_p0, %p5445_p13  ;;  %s438_s28 = int_to_ptr.vmem [resolvable:$true] %s437_s28 }
  0x27   : > { %s426_s9 = scalar_lea.sflag [#allocation7], %s425_s29  ;;  %s7799_s8 = smov 8  }
  0x28   : > { %s7800_s5 = smov 128   ;;  %449 = sbr.rel (%p5423_p5) target bundleno = 2070 (0x816), region = 68 }
  0x29   : > { %4965 = dma.hbm_to_vmem [thread:$0]  (!%p4963_p2), %s436_s19, 4096, %s438_s28, %s426_s9, %s7800_s5, %s7800_s5, %s7799_s8  }
  0x2d   : > { %s451_s14 = sand.u32 1, %s5257_s30  }
  0x2e   : > { %s4554_s11 = sshll.u32 %s451_s14, 8  ;;  %s452_s13 = scalar_lea.sflag [#allocation7], %s451_s14 }
  0x2f   : > { %s5468_s21 = scalar_lea.vmem [#allocation6], %s4554_s11 }
  0x30   : > { %5236 = dma.done.wait (%p5416_p4), %s452_s13, 4096  }
  0x31   : > { %5238 = vsyncadd (%p5416_p4), %s452_s13, 4294963200 }
  0x32   : > { %5240 = dma.done.wait (%p5408_p1), [#allocation10], 9216  }
  0x33   : > { %5242 = vsyncadd (%p5408_p1), [#allocation10], 4294958080  ;;  %p501_p3 = scmp.eq.s32.totalorder %s5269_s17, 0  ;;  %p502_p5 = scmp.eq.s32.totalorder %s5265_s16, 0 }
  0x35   : > { %p503_p6 = pnand %p502_p5, %p501_p3 }
  0x37   : > { %506 = sbr.rel (%p503_p6) target bundleno = 64 (0x40), region = 80 }
  0x3c   : > { %vm507_vm0 = vcmask 517120   ;;  %vm510_vm1 = vcmask 254976   ;;  %v5286_v0 = vmov 0.0  }
  0x3d   : > { %508 = vst.msk [vmem:[#allocation2] sm:$0x3] %vm507_vm0, %v5286_v0 }
  0x3e   : > { %509 = vst.msk [vmem:[#allocation3] sm:$0x3] %vm507_vm0, %v5286_v0 }
  0x3f   : > { %511 = vst.msk [vmem:[#allocation4] sm:$0x3] %vm510_vm1, %v5286_v0 }
  0x40 PF: > { %v547_v1 = vld [vmem:[%s7746_s1 + $0x18] sm:$0xff]  ;;  %v546_v2 = vld [vmem:[%s7746_s1 + $0x10] sm:$0xff]  ;;  %v545_v3 = vld [vmem:[%s7746_s1 + $0x8] sm:$0xff]  ;;  %vm552_vm2 = vcmask 261120   ;;  %p4588_p1 = scmp.ne.s32.totalorder %s5269_s17, 0 }
  0x41   : > { %661 = vmatpush.msra.mxu0 %v547_v1  ;;  %4920 = vmatpush.msra.mxu3 %v547_v1  ;;  %v544_v4 = vld [vmem:[%s7746_s1] sm:$0xff]  ;;  %v512_v5 = vld [vmem:[%s5468_s21] sm:$0xff]  ;;  %v515_v8 = vld [vmem:[%s5468_s21 + $0x18] sm:$0xff] }
  0x42   : > { %v513_v6 = vld [vmem:[%s5468_s21 + $0x8] sm:$0xff]  ;;  %v514_v7 = vld [vmem:[%s5468_s21 + $0x10] sm:$0xff]  ;;  %v516_v9 = vld [vmem:[%s5468_s21 + $0x20] sm:$0xff] }
  0x43   : > { %662 = vmatpush.msra.mxu0 %v546_v2  ;;  %4921 = vmatpush.msra.mxu3 %v546_v2  ;;  %v517_v10 = vld [vmem:[%s5468_s21 + $0x28] sm:$0xff]  ;;  %v518_v11 = vld [vmem:[%s5468_s21 + $0x30] sm:$0xff]  ;;  %v519_v12 = vld [vmem:[%s5468_s21 + $0x38] sm:$0xff] }
  0x44   : > { %v520_v13 = vld [vmem:[%s5468_s21 + $0x40] sm:$0xff]  ;;  %v521_v14 = vld [vmem:[%s5468_s21 + $0x48] sm:$0xff]  ;;  %v522_v15 = vld [vmem:[%s5468_s21 + $0x50] sm:$0xff] }
  0x45   : > { %663 = vmatpush.msra.mxu0 %v545_v3  ;;  %4922 = vmatpush.msra.mxu3 %v545_v3  ;;  %v523_v16 = vld [vmem:[%s5468_s21 + $0x58] sm:$0xff]  ;;  %v524_v17 = vld [vmem:[%s5468_s21 + $0x60] sm:$0xff]  ;;  %v525_v18 = vld [vmem:[%s5468_s21 + $0x68] sm:$0xff] }
  0x46   : > { %v537_v19 = vld [vmem:[%s5468_s21 + $0xc8] sm:$0xff]  ;;  %v526_v20 = vld [vmem:[%s5468_s21 + $0x70] sm:$0xff]  ;;  %v527_v22 = vld [vmem:[%s5468_s21 + $0x78] sm:$0xff] }
  0x47   : > { %664 = vmatpush.msra.mxu0 %v544_v4  ;;  %4923 = vmatpush.msra.mxu3 %v544_v4  ;;  %v538_v21 = vld [vmem:[%s5468_s21 + $0xd0] sm:$0xff]  ;;  %v539_v23 = vld [vmem:[%s5468_s21 + $0xd8] sm:$0xff]  ;;  %v5535_v24 = vld [vmem:[%s7747_s2] ss:$0 sm:$0xff] }
  0x48   : > { %4556 = vmatmul.msk.f32.vlgmr.msra.gmra.mxu0 %vm552_vm2, %v512_v5  ;;  %4581 = vmatmul.msk.f32.vlgmr.msra.gmra.mxu3 %vm552_vm2, %v537_v19  ;;  %v528_v26 = vld [vmem:[%s5468_s21 + $0x80] sm:$0xff]  ;;  %v529_v30 = vld [vmem:[%s5468_s21 + $0x88] sm:$0xff]  ;;  %v530_v34 = vld [vmem:[%s5468_s21 + $0x90] sm:$0xff] }
  0x49   : > { %v540_v28 = vld [vmem:[%s5468_s21 + $0xe0] sm:$0xff]  ;;  %v541_v32 = vld [vmem:[%s5468_s21 + $0xe8] sm:$0xff]  ;;  %v542_v36 = vld [vmem:[%s5468_s21 + $0xf0] sm:$0xff] }
  0x4a   : > { %v531_v38 = vld [vmem:[%s5468_s21 + $0x98] sm:$0xff]  ;;  %v532_v42 = vld [vmem:[%s5468_s21 + $0xa0] sm:$0xff]  ;;  %v533_v45 = vld [vmem:[%s5468_s21 + $0xa8] sm:$0xff] }
  0x4b   : > { %v543_v40 = vld [vmem:[%s5468_s21 + $0xf8] sm:$0xff]  ;;  %v534_v48 = vld [vmem:[%s5468_s21 + $0xb0] sm:$0xff]  ;;  %v536_v54 = vld [vmem:[%s5468_s21 + $0xc0] sm:$0xff] }
  0x4c   : > { %v535_v51 = vld [vmem:[%s5468_s21 + $0xb8] sm:$0xff] }
  0x50   : > { %4557 = vmatmul.msk.f32.gmra.mxu0 %vm552_vm2, %v513_v6  ;;  %4582 = vmatmul.msk.f32.gmra.mxu3 %vm552_vm2, %v538_v21 }
  0x58   : > { %4558 = vmatmul.msk.f32.gmra.mxu0 %vm552_vm2, %v514_v7  ;;  %4583 = vmatmul.msk.f32.gmra.mxu3 %vm552_vm2, %v539_v23 }
  0x60   : > { %4559 = vmatmul.msk.f32.gmra.mxu0 %vm552_vm2, %v515_v8  ;;  %4584 = vmatmul.msk.f32.gmra.mxu3 %vm552_vm2, %v540_v28 }
  0x68   : > { %4560 = vmatmul.msk.f32.gmra.mxu0 %vm552_vm2, %v516_v9  ;;  %4585 = vmatmul.msk.f32.gmra.mxu3 %vm552_vm2, %v541_v32 }
  0x70   : > { %4561 = vmatmul.msk.f32.gmra.mxu0 %vm552_vm2, %v517_v10  ;;  %4586 = vmatmul.msk.f32.gmra.mxu3 %vm552_vm2, %v542_v36 }
  0x78   : > { %4562 = vmatmul.msk.f32.gmra.mxu0 %vm552_vm2, %v518_v11  ;;  %4587 = vmatmul.msk.f32.gmra.mxu3 %vm552_vm2, %v543_v40 }
  0x80   : > { %4563 = vmatmul.msk.f32.gmra.mxu0 %vm552_vm2, %v519_v12 }
  0x88   : > { %4564 = vmatmul.msk.f32.gmra.mxu0 %vm552_vm2, %v520_v13 }
  0x90   : > { %4565 = vmatmul.msk.f32.gmra.mxu0 %vm552_vm2, %v521_v14 }
  0x98   : > { %4566 = vmatmul.msk.f32.gmra.mxu0 %vm552_vm2, %v522_v15 }
  0xa0   : > { %4567 = vmatmul.msk.f32.gmra.mxu0 %vm552_vm2, %v523_v16 }
  0xa8   : > { %4568 = vmatmul.msk.f32.gmra.mxu0 %vm552_vm2, %v524_v17 }
  0xb0   : > { %4569 = vmatmul.msk.f32.gmra.mxu0 %vm552_vm2, %v525_v18 }
  0xb8   : > { %4570 = vmatmul.msk.f32.gmra.mxu0 %vm552_vm2, %v526_v20 }
  0xc0   : > { %4571 = vmatmul.msk.f32.gmra.mxu0 %vm552_vm2, %v527_v22 }
  0xc5   : > { %v666_v25 = vpop.f32.mrf.mxu0 }
  0xc6   : > { %v5539_v27 = vadd.f32 %v5535_v24, %v666_v25 }
  0xc8   : > { %4572 = vmatmul.msk.f32.gmra.mxu0 %vm552_vm2, %v528_v26 }
  0xcb   : > { %v741_v3 = vpop.f32.mrf.mxu3 }
  0xcc   : > { %v5609_v5 = vadd.f32 %v5535_v24, %v741_v3 }
  0xcd   : > { %v669_v29 = vpop.f32.mrf.mxu0 }
  0xce   : > { %v5546_v31 = vadd.f32 %v5535_v24, %v669_v29 }
  0xd0   : > { %4573 = vmatmul.msk.f32.gmra.mxu0 %vm552_vm2, %v529_v30 }
  0xd3   : > { %v744_v7 = vpop.f32.mrf.mxu3 }
  0xd4   : > { %v5615_v9 = vadd.f32 %v5535_v24, %v744_v7 }
  0xd5   : > { %v672_v33 = vpop.f32.mrf.mxu0 }
  0xd6   : > { %v5553_v35 = vadd.f32 %v5535_v24, %v672_v33 }
  0xd8   : > { %4574 = vmatmul.msk.f32.gmra.mxu0 %vm552_vm2, %v530_v34 }
  0xdb   : > { %v747_v11 = vpop.f32.mrf.mxu3 }
  0xdc   : > { %v5621_v13 = vadd.f32 %v5535_v24, %v747_v11 }
  0xdd   : > { %v675_v37 = vpop.f32.mrf.mxu0 }
  0xde   : > { %v5560_v39 = vadd.f32 %v5535_v24, %v675_v37 }
  0xe0   : > { %4575 = vmatmul.msk.f32.gmra.mxu0 %vm552_vm2, %v531_v38 }
  0xe3   : > { %v750_v15 = vpop.f32.mrf.mxu3 }
  0xe4   : > { %v5627_v17 = vadd.f32 %v5535_v24, %v750_v15 }
  0xe5   : > { %v678_v41 = vpop.f32.mrf.mxu0 }
  0xe6   : > { %v5567_v43 = vadd.f32 %v5535_v24, %v678_v41 }
  0xe8   : > { %4576 = vmatmul.msk.f32.gmra.mxu0 %vm552_vm2, %v532_v42 }
  0xeb   : > { %v753_v19 = vpop.f32.mrf.mxu3 }
  0xec   : > { %v5633_v21 = vadd.f32 %v5535_v24, %v753_v19 }
  0xed   : > { %v681_v44 = vpop.f32.mrf.mxu0 }
  0xee   : > { %v5572_v46 = vadd.f32 %v5535_v24, %v681_v44 }
  0xf0   : > { %4577 = vmatmul.msk.f32.gmra.mxu0 %vm552_vm2, %v533_v45 }
  0xf3   : > { %v756_v23 = vpop.f32.mrf.mxu3 }
  0xf4   : > { %v5639_v26 = vadd.f32 %v5535_v24, %v756_v23 }
  0xf5   : > { %v684_v47 = vpop.f32.mrf.mxu0 }
  0xf6   : > { %v5577_v49 = vadd.f32 %v5535_v24, %v684_v47  ;;  %7801 = vst [vmem:[#allocation22_spill] sm:$0xff] %v5639_v26 }
  0xf8   : > { %4578 = vmatmul.msk.f32.gmra.mxu0 %vm552_vm2, %v534_v48 }
  0xfb   : > { %v759_v29 = vpop.f32.mrf.mxu3 }
  0xfc   : > { %v5645_v32 = vadd.f32 %v5535_v24, %v759_v29 }
  0xfd   : > { %v687_v50 = vpop.f32.mrf.mxu0 }
  0xfe   : > { %v5582_v52 = vadd.f32 %v5535_v24, %v687_v50  ;;  %7802 = vst [vmem:[#allocation23_spill] sm:$0xff] %v5645_v32 }
 0x100   : > { %4579 = vmatmul.msk.f32.gmra.mxu0 %vm552_vm2, %v535_v51 }
 0x105   : > { %v690_v53 = vpop.f32.mrf.mxu0 }
 0x106   : > { %v5587_v55 = vadd.f32 %v5535_v24, %v690_v53 }
 0x108   : > { %4580 = vmatmul.msk.f32.gmra.mxu0 %vm552_vm2, %v536_v54 }
 0x10d   : > { %v693_v56 = vpop.f32.mrf.mxu0 }
 0x10e   : > { %v5591_v57 = vadd.f32 %v5535_v24, %v693_v56 }
 0x115   : > { %v696_v58 = vpop.f32.mrf.mxu0 }
 0x116   : > { %v5594_v59 = vadd.f32 %v5535_v24, %v696_v58 }
 0x11d   : > { %v699_v60 = vpop.f32.mrf.mxu0 }
 0x11e   : > { %v5597_v61 = vadd.f32 %v5535_v24, %v699_v60 }
 0x125   : > { %v702_v62 = vpop.f32.mrf.mxu0 }
 0x126   : > { %v5600_v63 = vadd.f32 %v5535_v24, %v702_v62 }
 0x12d   : > { %v705_v0 = vpop.f32.mrf.mxu0 }
 0x12e   : > { %v5603_v1 = vadd.f32 %v5535_v24, %v705_v0 }
 0x135   : > { %v708_v2 = vpop.f32.mrf.mxu0 }
 0x136   : > { %v5606_v4 = vadd.f32 %v5535_v24, %v708_v2 }
 0x13d   : > { %v711_v6 = vpop.f32.mrf.mxu0 }
 0x13e   : > { %v5612_v8 = vadd.f32 %v5535_v24, %v711_v6 }
 0x145   : > { %v714_v10 = vpop.f32.mrf.mxu0 }
 0x146   : > { %v5618_v12 = vadd.f32 %v5535_v24, %v714_v10 }
 0x14d   : > { %v717_v14 = vpop.f32.mrf.mxu0 }
 0x14e   : > { %v5624_v16 = vadd.f32 %v5535_v24, %v717_v14 }
 0x155   : > { %v720_v18 = vpop.f32.mrf.mxu0 }
 0x156   : > { %v5630_v20 = vadd.f32 %v5535_v24, %v720_v18 }
 0x15d   : > { %v723_v22 = vpop.f32.mrf.mxu0 }
 0x15e   : > { %v5636_v25 = vadd.f32 %v5535_v24, %v723_v22 }
 0x165   : > { %v726_v28 = vpop.f32.mrf.mxu0 }
 0x166   : > { %v5642_v30 = vadd.f32 %v5535_v24, %v726_v28 }
 0x16d   : > { %v729_v33 = vpop.f32.mrf.mxu0 }
 0x16e   : > { %v5648_v34 = vadd.f32 %v5535_v24, %v729_v33 }
 0x175   : > { %v732_v36 = vpop.f32.mrf.mxu0 }
 0x176   : > { %v5651_v37 = vadd.f32 %v5535_v24, %v732_v36 }
 0x17d   : > { %v735_v38 = vpop.f32.mrf.mxu0 }
 0x17e   : > { %v5654_v40 = vadd.f32 %v5535_v24, %v735_v38 }
 0x182   : > { %764 = sbr.rel (%p4588_p1) target bundleno = 473 (0x1d9), region = 84 }
 0x185   : > { %v738_v41 = vpop.f32.mrf.mxu0 }
 0x186   : > { %v5657_v42 = vadd.f32 %v5535_v24, %v738_v41 }
 0x187   : > { %vm766_vm3 = vcmask 523264   ;;  %v840_v60 = vmul.f32 %v5539_v27, %v5539_v27  ;;  %v841_v62 = vmul.f32 %v5546_v31, %v5546_v31  ;;  %v842_v2 = vmul.f32 %v5553_v35, %v5553_v35 }
 0x188   : > { %v767_v44 = vsel %vm766_vm3, %v5539_v27, 0.0  ;;  %v768_v45 = vsel %vm766_vm3, %v5546_v31, 0.0  ;;  %v770_v47 = vsel %vm766_vm3, %v5553_v35, 0.0  ;;  %v772_v50 = vsel %vm766_vm3, %v5560_v39, 0.0 }
 0x189   : > { %v769_v48 = vadd.f32 %v768_v45, %v767_v44  ;;  %v774_v24 = vsel %vm766_vm3, %v5567_v43, 0.0  ;;  %v776_v54 = vsel %vm766_vm3, %v5572_v46, 0.0  ;;  %v778_v58 = vsel %vm766_vm3, %v5577_v49, 0.0 }
 0x18a   : > { %v780_v3 = vsel %vm766_vm3, %v5582_v52, 0.0  ;;  %v843_v6 = vmul.f32 %v5560_v39, %v5560_v39  ;;  %v782_v10 = vsel %vm766_vm3, %v5587_v55, 0.0  ;;  %v844_v11 = vmul.f32 %v5567_v43, %v5567_v43 }
 0x18b   : > { %v771_v51 = vadd.f32 %v770_v47, %v769_v48  ;;  %v872_v14 = vsel %vm766_vm3, %v840_v60, 0.0  ;;  %v873_v15 = vsel %vm766_vm3, %v841_v62, 0.0  ;;  %v875_v22 = vsel %vm766_vm3, %v842_v2, 0.0 }
 0x18c   : > { %v874_v19 = vadd.f32 %v873_v15, %v872_v14  ;;  %v784_v23 = vsel %vm766_vm3, %v5591_v57, 0.0  ;;  %v845_v28 = vmul.f32 %v5572_v46, %v5572_v46  ;;  %v877_v29 = vsel %vm766_vm3, %v843_v6, 0.0 }
 0x18d   : > { %v773_v53 = vadd.f32 %v772_v50, %v771_v51  ;;  %v786_v38 = vsel %vm766_vm3, %v5594_v59, 0.0  ;;  %v846_v41 = vmul.f32 %v5577_v49, %v5577_v49  ;;  %v879_v44 = vsel %vm766_vm3, %v844_v11, 0.0 }
 0x18e   : > { %v876_v36 = vadd.f32 %v875_v22, %v874_v19  ;;  %v788_v48 = vsel %vm766_vm3, %v5597_v61, 0.0  ;;  %v847_v50 = vmul.f32 %v5582_v52, %v5582_v52  ;;  %v881_v51 = vsel %vm766_vm3, %v845_v28, 0.0 }
 0x18f   : > { %v775_v56 = vadd.f32 %v774_v24, %v773_v53  ;;  %v849_v2 = vmul.f32 %v5591_v57, %v5591_v57  ;;  %v850_v11 = vmul.f32 %v5594_v59, %v5594_v59  ;;  %v796_v19 = vsel %vm766_vm3, %v5612_v8, 0.0 }
 0x190   : > { %v878_v47 = vadd.f32 %v877_v29, %v876_v36  ;;  %v851_v22 = vmul.f32 %v5597_v61, %v5597_v61  ;;  %v852_v36 = vmul.f32 %v5600_v63, %v5600_v63  ;;  %vm837_vm4 = vcmask 516096  }
 0x191   : > { %v777_v0 = vadd.f32 %v776_v54, %v775_v56  ;;  %v790_v54 = vsel %vm766_vm3, %v5600_v63, 0.0  ;;  %v848_v56 = vmul.f32 %v5587_v55, %v5587_v55 }
 0x192   : > { %v880_v53 = vadd.f32 %v879_v44, %v878_v47  ;;  %v853_v47 = vmul.f32 %v5603_v1, %v5603_v1 }
 0x193   : > { %v779_v7 = vadd.f32 %v778_v58, %v777_v0  ;;  %v883_v58 = vsel %vm766_vm3, %v846_v41, 0.0  ;;  %v792_v0 = vsel %vm766_vm3, %v5603_v1, 0.0  ;;  %v887_v14 = vsel %vm766_vm3, %v848_v56, 0.0 }
 0x194   : > { %v882_v62 = vadd.f32 %v881_v51, %v880_v53  ;;  %v854_v53 = vmul.f32 %v5606_v4, %v5606_v4 }
 0x195   : > { %v781_v18 = vadd.f32 %v780_v3, %v779_v7  ;;  %v885_v3 = vsel %vm766_vm3, %v847_v50, 0.0 }
 0x196   : > { %v884_v7 = vadd.f32 %v883_v58, %v882_v62  ;;  %v855_v62 = vmul.f32 %v5612_v8, %v5612_v8 }
 0x197   : > { %v783_v33 = vadd.f32 %v782_v10, %v781_v18  ;;  %v794_v10 = vsel %vm766_vm3, %v5606_v4, 0.0 }
 0x198   : > { %v886_v18 = vadd.f32 %v885_v3, %v884_v7  ;;  %v856_v7 = vmul.f32 %v5618_v12, %v5618_v12 }
 0x199   : > { %v785_v45 = vadd.f32 %v784_v23, %v783_v33  ;;  %v889_v23 = vsel %vm766_vm3, %v849_v2, 0.0  ;;  %v798_v33 = vsel %vm766_vm3, %v5618_v12, 0.0 }
 0x19a   : > { %v888_v29 = vadd.f32 %v887_v14, %v886_v18  ;;  %v857_v18 = vmul.f32 %v5624_v16, %v5624_v16 }
 0x19b   : > { %v787_v24 = vadd.f32 %v786_v38, %v785_v45  ;;  %v891_v38 = vsel %vm766_vm3, %v850_v11, 0.0  ;;  %v800_v45 = vsel %vm766_vm3, %v5624_v16, 0.0 }
 0x19c   : > { %v890_v44 = vadd.f32 %v889_v23, %v888_v29  ;;  %v858_v29 = vmul.f32 %v5630_v20, %v5630_v20 }
 0x19d   : > { %v789_v60 = vadd.f32 %v788_v48, %v787_v24  ;;  %v893_v48 = vsel %vm766_vm3, %v851_v22, 0.0  ;;  %v802_v24 = vsel %vm766_vm3, %v5630_v20, 0.0 }
 0x19e   : > { %v892_v51 = vadd.f32 %v891_v38, %v890_v44  ;;  %v859_v44 = vmul.f32 %v5636_v25, %v5636_v25 }
 0x19f   : > { %v791_v6 = vadd.f32 %v790_v54, %v789_v60  ;;  %v895_v54 = vsel %vm766_vm3, %v852_v36, 0.0  ;;  %v804_v60 = vsel %vm766_vm3, %v5636_v25, 0.0 }
 0x1a0   : > { %v894_v58 = vadd.f32 %v893_v48, %v892_v51  ;;  %v860_v51 = vmul.f32 %v5642_v30, %v5642_v30 }
 0x1a1   : > { %v793_v15 = vadd.f32 %v792_v0, %v791_v6  ;;  %v897_v0 = vsel %vm766_vm3, %v853_v47, 0.0  ;;  %v806_v6 = vsel %vm766_vm3, %v5642_v30, 0.0 }
 0x1a2   : > { %v896_v3 = vadd.f32 %v895_v54, %v894_v58  ;;  %v861_v58 = vmul.f32 %v5648_v34, %v5648_v34 }
 0x1a3   : > { %v795_v28 = vadd.f32 %v794_v10, %v793_v15  ;;  %v899_v10 = vsel %vm766_vm3, %v854_v53, 0.0  ;;  %v808_v15 = vsel %vm766_vm3, %v5648_v34, 0.0 }
 0x1a4   : > { %v898_v14 = vadd.f32 %v897_v0, %v896_v3  ;;  %v862_v3 = vmul.f32 %v5651_v37, %v5651_v37 }
 0x1a5   : > { %v797_v41 = vadd.f32 %v796_v19, %v795_v28  ;;  %v901_v19 = vsel %vm766_vm3, %v855_v62, 0.0  ;;  %v810_v28 = vsel %vm766_vm3, %v5651_v37, 0.0 }
 0x1a6   : > { %v900_v23 = vadd.f32 %v899_v10, %v898_v14  ;;  %v863_v14 = vmul.f32 %v5654_v40, %v5654_v40 }
 0x1a7   : > { %v799_v50 = vadd.f32 %v798_v33, %v797_v41  ;;  %v903_v33 = vsel %vm766_vm3, %v856_v7, 0.0  ;;  %v812_v41 = vsel %vm766_vm3, %v5654_v40, 0.0 }
 0x1a8   : > { %v902_v38 = vadd.f32 %v901_v19, %v900_v23  ;;  %v864_v23 = vmul.f32 %v5657_v42, %v5657_v42 }
 0x1a9   : > { %v801_v56 = vadd.f32 %v800_v45, %v799_v50  ;;  %v905_v45 = vsel %vm766_vm3, %v857_v18, 0.0  ;;  %v814_v50 = vsel %vm766_vm3, %v5657_v42, 0.0 }
 0x1aa   : > { %v904_v48 = vadd.f32 %v903_v33, %v902_v38  ;;  %v865_v38 = vmul.f32 %v5609_v5, %v5609_v5 }
 0x1ab   : > { %v803_v2 = vadd.f32 %v802_v24, %v801_v56  ;;  %v907_v24 = vsel %vm766_vm3, %v858_v29, 0.0  ;;  %v816_v56 = vsel %vm766_vm3, %v5609_v5, 0.0 }
 0x1ac   : > { %v906_v54 = vadd.f32 %v905_v45, %v904_v48  ;;  %v866_v48 = vmul.f32 %v5615_v9, %v5615_v9 }
 0x1ad   : > { %v805_v11 = vadd.f32 %v804_v60, %v803_v2  ;;  %v909_v60 = vsel %vm766_vm3, %v859_v44, 0.0  ;;  %v818_v2 = vsel %vm766_vm3, %v5615_v9, 0.0 }
 0x1ae   : > { %v908_v0 = vadd.f32 %v907_v24, %v906_v54  ;;  %v867_v54 = vmul.f32 %v5621_v13, %v5621_v13 }
 0x1af   : > { %v807_v22 = vadd.f32 %v806_v6, %v805_v11  ;;  %v911_v6 = vsel %vm766_vm3, %v860_v51, 0.0  ;;  %v820_v11 = vsel %vm766_vm3, %v5621_v13, 0.0 }
 0x1b0   : > { %v910_v10 = vadd.f32 %v909_v60, %v908_v0  ;;  %v923_v0 = vsel %vm766_vm3, %v866_v48, 0.0 }
 0x1b1   : > { %v809_v36 = vadd.f32 %v808_v15, %v807_v22  ;;  %v913_v15 = vsel %vm766_vm3, %v861_v58, 0.0  ;;  %v822_v22 = vsel %vm766_vm3, %v5627_v17, 0.0 }
 0x1b2   : > { %v912_v19 = vadd.f32 %v911_v6, %v910_v10  ;;  %v869_v6 = vmul.f32 %v5633_v21, %v5633_v21 }
 0x1b3   : > { %v811_v47 = vadd.f32 %v810_v28, %v809_v36  ;;  %v915_v28 = vsel %vm766_vm3, %v862_v3, 0.0  ;;  %v824_v36 = vsel %vm766_vm3, %v5633_v21, 0.0 }
 0x1b4   : > { %v914_v33 = vadd.f32 %v913_v15, %v912_v19 }
 0x1b5   : > { %v813_v53 = vadd.f32 %v812_v41, %v811_v47  ;;  %v917_v41 = vsel %vm766_vm3, %v863_v14, 0.0  ;;  %v826_v47 = vsel %vm766_vm3, %v5639_v26, 0.0  ;;  %v870_v14 = vmul.f32 %v5639_v26, %v5639_v26 }
 0x1b6   : > { %v916_v45 = vadd.f32 %v915_v28, %v914_v33 }
 0x1b7   : > { %v815_v62 = vadd.f32 %v814_v50, %v813_v53  ;;  %v919_v50 = vsel %vm766_vm3, %v864_v23, 0.0  ;;  %v828_v53 = vsel %vm766_vm3, %v5645_v32, 0.0  ;;  %v929_v23 = vsel %vm766_vm3, %v869_v6, 0.0 }
 0x1b8   : > { %v918_v24 = vadd.f32 %v917_v41, %v916_v45  ;;  %v931_v33 = vsel %vm766_vm3, %v870_v14, 0.0 }
 0x1b9   : > { %v817_v7 = vadd.f32 %v816_v56, %v815_v62  ;;  %v921_v56 = vsel %vm766_vm3, %v865_v38, 0.0  ;;  %v868_v62 = vmul.f32 %v5627_v17, %v5627_v17 }
 0x1ba   : > { %v920_v60 = vadd.f32 %v919_v50, %v918_v24 }
 0x1bb   : > { %v819_v18 = vadd.f32 %v818_v2, %v817_v7  ;;  %v925_v7 = vsel %vm766_vm3, %v867_v54, 0.0  ;;  %v927_v15 = vsel %vm766_vm3, %v868_v62, 0.0 }
 0x1bc   : > { %v922_v3 = vadd.f32 %v921_v56, %v920_v60  ;;  %v839_v60 = vld [vmem:[#allocation2 + $0x1] sm:$0x1] }
 0x1bd   : > { %v821_v29 = vadd.f32 %v820_v11, %v819_v18 }
 0x1be   : > { %v924_v11 = vadd.f32 %v923_v0, %v922_v3 }
 0x1bf   : > { %v823_v44 = vadd.f32 %v822_v22, %v821_v29  ;;  %v871_v22 = vmul.f32 %v5645_v32, %v5645_v32 }
 0x1c0   : > { %v926_v19 = vadd.f32 %v925_v7, %v924_v11 }
 0x1c1   : > { %v825_v51 = vadd.f32 %v824_v36, %v823_v44  ;;  %v933_v41 = vsel %vm766_vm3, %v871_v22, 0.0 }
 0x1c2   : > { %v928_v29 = vadd.f32 %v927_v15, %v926_v19 }
 0x1c3   : > { %v827_v58 = vadd.f32 %v826_v47, %v825_v51  ;;  %v765_v47 = vld [vmem:[#allocation2] sm:$0x1] }
 0x1c4   : > { %v930_v38 = vadd.f32 %v929_v23, %v928_v29 }
 0x1c5   : > { %v829_v2 = vadd.f32 %v828_v53, %v827_v58 }
 0x1c6   : > { %v932_v45 = vadd.f32 %v931_v33, %v930_v38 }
 0x1c7   : > { %v830_v10 = vrot.slane %v829_v2, 4 }
 0x1c8   : > { %v934_v50 = vadd.f32 %v933_v41, %v932_v45 }
 0x1c9   : > { %v831_v18 = vadd.f32 %v830_v10, %v829_v2 }
 0x1ca   : > { %v935_v24 = vrot.slane %v934_v50, 4 }
 0x1cb   : > { %v832_v28 = vrot.slane %v831_v18, 2 }
 0x1cc   : > { %v936_v53 = vadd.f32 %v935_v24, %v934_v50 }
 0x1cd   : > { %v833_v36 = vadd.f32 %v832_v28, %v831_v18 }
 0x1ce   : > { %v937_v54 = vrot.slane %v936_v53, 2 }
 0x1cf   : > { %v834_v44 = vrot.slane %v833_v36, 1 }
 0x1d0   : > { %v938_v56 = vadd.f32 %v937_v54, %v936_v53 }
 0x1d1   : > { %v835_v48 = vadd.f32 %v834_v44, %v833_v36 }
 0x1d2   : > { %v939_v58 = vrot.slane %v938_v56, 1 }
 0x1d3   : > { %v836_v51 = vadd.f32 %v835_v48, %v765_v47 }
 0x1d4   : > { %v940_v62 = vadd.f32 %v939_v58, %v938_v56 }
 0x1d5   : > { %838 = vst.msk [vmem:[#allocation2] sm:$0x1] %vm837_vm4, %v836_v51 }
 0x1d6   : > { %v941_v0 = vadd.f32 %v940_v62, %v839_v60 }
 0x1d8   : > { %942 = vst.msk [vmem:[#allocation2 + $0x1] sm:$0x1] %vm837_vm4, %v941_v0 }
 0x1d9 PF: > { %p943_p4 = scmp.eq.s32.totalorder %s5265_s16, 1 }
 0x1db   : > { %p944_p7 = pnand %p943_p4, %p501_p3 }
 0x1dd   : > { %947 = sbr.rel (%p944_p7) target bundleno = 518 (0x206), region = 88 }
 0x1e2   : > { %v950_v2 = vld [vmem:[#allocation2] sm:$0x1]  ;;  %v952_v3 = vld [vmem:[#allocation2 + $0x1] sm:$0x1]  ;;  %vm971_vm8 = vcmask 516096  }
 0x1e3   : > { %v951_v6 = vmul.f32 0.001953125, %v950_v2  ;;  %v953_v7 = vmul.f32 0.001953125, %v952_v3  ;;  %v948_v29 = vld [vmem:[%s7748_s3] sm:$0x1] }
 0x1e4   : > { %v949_v41 = vld [vmem:[%s7749_s4] sm:$0x1] }
 0x1e5   : > { %v954_v10 = vmul.f32 %v951_v6, %v951_v6 }
 0x1e7   : > { %v955_v11 = vsub.f32 %v953_v7, %v954_v10 }
 0x1e9   : > { %v956_v14 = vmax.f32 %v955_v11, 0.0 }
 0x1eb   : > { %v957_v15 = vadd.f32 1e-05, %v956_v14 }
 0x1ed   : > { %5048 = vrsqrt.f32 %v957_v15  ;;  %vm964_vm5 = vweird.f32 %v957_v15 }
 0x1f3   : > { %v5049_v18 = vpop.eup %5048 }
 0x1f4   : > { %v959_v19 = vmul.f32 %v5049_v18, %v957_v15  ;;  %vm965_vm6 = vweird.f32 %v5049_v18 }
 0x1f5   : > { %vm966_vm7 = vmor %vm964_vm5, %vm965_vm6 }
 0x1f6   : > { %v960_v22 = vmul.f32 %v5049_v18, %v959_v19 }
 0x1f8   : > { %v961_v23 = vmul.f32 0.5, %v960_v22 }
 0x1fa   : > { %v962_v28 = vsub.f32 1.5, %v961_v23 }
 0x1fc   : > { %v963_v33 = vmul.f32 %v5049_v18, %v962_v28 }
 0x1fe   : > { %v967_v36 = vsel %vm966_vm7, %v5049_v18, %v963_v33 }
 0x1ff   : > { %v968_v38 = vmul.f32 %v967_v36, %v948_v29 }
 0x201   : > { %972 = vst.msk [vmem:[#allocation11] sm:$0x1] %vm971_vm8, %v968_v38  ;;  %v969_v44 = vmul.f32 %v968_v38, %v951_v6 }
 0x203   : > { %v970_v45 = vsub.f32 %v949_v41, %v969_v44 }
 0x205   : > { %973 = vst.msk [vmem:[#allocation11 + $0x1] sm:$0x1] %vm971_vm8, %v970_v45 }
 0x206 PF: > { %v5831_v47 = vld [vmem:[#allocation9 + $0x38] sm:$0xff]  ;;  %v5833_v48 = vld [vmem:[#allocation9 + $0x30] sm:$0xff]  ;;  %vm1099_vm9 = vcmask 523264   ;;  %vm1108_vm10 = vcmask 516096   ;;  %v5287_v24 = vmov 0.0   ;;  %v5838_v53 = vld [vmem:[#allocation9 + $0x28] sm:$0xff] }
 0x207   : > { %1572 = vmatpush.msra.mxu2 %v5831_v47  ;;  %v1258_v50 = vld [vmem:[#allocation9 + $0x78] sm:$0xff]  ;;  %v1257_v51 = vld [vmem:[#allocation9 + $0x70] sm:$0xff]  ;;  %1100 = vst.msk [vmem:[#allocation5] sm:$0xff] %vm1099_vm9, %v5287_v24  ;;  %v1256_v54 = vld [vmem:[#allocation9 + $0x68] sm:$0xff]  ;;  %vm1102_vm14 = vcmask 517120   ;;  %p3652_p8 = scmp.eq.s32.totalorder %s5269_s17, 1 }
 0x208   : > { %1363 = vmatpush.msra.mxu1 %v1258_v50  ;;  %1109 = vst.msk [vmem:[#allocation5] sm:$0x1] %vm1108_vm10, %v5287_v24  ;;  %4924 = vmatpush.msrb.mxu3 %v1258_v50  ;;  %v5845_v56 = vld [vmem:[#allocation9 + $0x20] sm:$0xff]  ;;  %v976_v60 = vld [vmem:[#allocation2] sm:$0x1]  ;;  %v5852_v62 = vld [vmem:[#allocation9 + $0x18] sm:$0xff] }
 0x209   : > { %1573 = vmatpush.msra.mxu2 %v5833_v48  ;;  %1101 = vst.msk [vmem:[#allocation5 + $0x8] sm:$0xff] %vm1099_vm9, %v5287_v24  ;;  %v1255_v58 = vld [vmem:[#allocation9 + $0x60] sm:$0xff]  ;;  %v5856_v0 = vmul.f32 0.001953125, %v976_v60  ;;  %v1254_v2 = vld [vmem:[#allocation9 + $0x58] sm:$0xff]  ;;  %v978_v3 = vld [vmem:[#allocation2 + $0x1] sm:$0x1] }
 0x20a   : > { %1364 = vmatpush.msra.mxu1 %v1257_v51  ;;  %1105 = vst.msk [vmem:[#allocation5 + $0x198] sm:$0xff] %vm1099_vm9, %v5287_v24  ;;  %4925 = vmatpush.msrb.mxu3 %v1257_v51  ;;  %v5861_v6 = vld [vmem:[#allocation9 + $0x10] sm:$0xff]  ;;  %v979_v7 = vmul.f32 0.001953125, %v978_v3  ;;  %v1211_v14 = vld [vmem:[#allocation9 + $0x8] sm:$0xff]  ;;  %v1210_v19 = vld [vmem:[#allocation9] sm:$0xff]  ;;  %p4877_p9 = scmp.ne.s32.totalorder %s5269_s17, 1 }
 0x20b   : > { %1574 = vmatpush.msra.mxu2 %v5838_v53  ;;  %1106 = vst.msk [vmem:[#allocation5 + $0x1a0] sm:$0xff] %vm1099_vm9, %v5287_v24  ;;  %v980_v10 = vmul.f32 %v5856_v0, %v5856_v0  ;;  %v1253_v11 = vld [vmem:[#allocation9 + $0x50] sm:$0xff]  ;;  %v1252_v18 = vld [vmem:[#allocation9 + $0x48] sm:$0xff]  ;;  %v1251_v28 = vld [vmem:[#allocation9 + $0x40] sm:$0xff] }
 0x20c   : > { %1365 = vmatpush.msra.mxu1 %v1256_v54  ;;  %1110 = vst.msk [vmem:[#allocation5 + $0x18] sm:$0x1] %vm1108_vm10, %v5287_v24  ;;  %4926 = vmatpush.msrb.mxu3 %v1256_v54  ;;  %v2281_v36 = vld [vmem:[#allocation9 + $0x138] sm:$0xff]  ;;  %v974_v50 = vld [vmem:[%s7748_s3] sm:$0x1]  ;;  %v3127_v26 = vld [vmem:[#allocation9 + $0x1f0] sm:$0xff] }
 0x20d   : > { %1575 = vmatpush.msra.mxu2 %v5845_v56  ;;  %1111 = vst.msk [vmem:[#allocation5 + $0x30] sm:$0x1] %vm1108_vm10, %v5287_v24  ;;  %v981_v15 = vsub.f32 %v979_v7, %v980_v10 }
 0x20e   : > { %1366 = vmatpush.msra.mxu1 %v1255_v58  ;;  %1112 = vst.msk [vmem:[#allocation5 + $0x48] sm:$0x1] %vm1108_vm10, %v5287_v24  ;;  %4927 = vmatpush.msrb.mxu3 %v1255_v58  ;;  %v975_v58 = vld [vmem:[%s7749_s4] sm:$0x1] }
 0x20f   : > { %1576 = vmatpush.msra.mxu2 %v5852_v62  ;;  %1113 = vst.msk [vmem:[#allocation5 + $0x60] sm:$0x1] %vm1108_vm10, %v5287_v24  ;;  %v982_v22 = vmax.f32 %v981_v15, 0.0  ;;  %v1178_v23 = vld [vmem:[#allocation5] sm:$0xff] }
 0x210   : > { %1367 = vmatpush.msra.mxu1 %v1254_v2  ;;  %1114 = vst.msk [vmem:[#allocation5 + $0x78] sm:$0x1] %vm1108_vm10, %v5287_v24  ;;  %4928 = vmatpush.msrb.mxu3 %v1254_v2  ;;  %v1218_v29 = vld [vmem:[#allocation5 + $0x1] sm:$0xff] }
 0x211   : > { %1577 = vmatpush.msra.mxu2 %v5861_v6  ;;  %1115 = vst.msk [vmem:[#allocation5 + $0x90] sm:$0x1] %vm1108_vm10, %v5287_v24  ;;  %v983_v33 = vadd.f32 1e-05, %v982_v22  ;;  %v1179_v38 = vld [vmem:[#allocation5 + $0x8] sm:$0xff] }
 0x212   : > { %1116 = vst.msk [vmem:[#allocation5 + $0xa8] sm:$0x1] %vm1108_vm10, %v5287_v24  ;;  %1368 = vmatpush.msra.mxu1 %v1253_v11  ;;  %4929 = vmatpush.msrb.mxu3 %v1253_v11 }
 0x213   : > { %1578 = vmatpush.msra.mxu2 %v1211_v14  ;;  %1117 = vst.msk [vmem:[#allocation5 + $0xc0] sm:$0x1] %vm1108_vm10, %v5287_v24  ;;  %5050 = vrsqrt.f32 %v983_v33  ;;  %vm990_vm11 = vweird.f32 %v983_v33 }
 0x214   : > { %1118 = vst.msk [vmem:[#allocation5 + $0xd8] sm:$0x1] %vm1108_vm10, %v5287_v24  ;;  %1369 = vmatpush.msra.mxu1 %v1252_v18  ;;  %4930 = vmatpush.msrb.mxu3 %v1252_v18 }
 0x215   : > { %1579 = vmatpush.msra.mxu2 %v1210_v19  ;;  %1119 = vst.msk [vmem:[#allocation5 + $0xf0] sm:$0x1] %vm1108_vm10, %v5287_v24 }
 0x216   : > { %4621 = vmatmul.msk.f32.vlgmr.msra.gmra.mxu2 %vm1099_vm9, %v1178_v23  ;;  %1120 = vst.msk [vmem:[#allocation5 + $0x108] sm:$0x1] %vm1108_vm10, %v5287_v24  ;;  %1370 = vmatpush.msra.mxu1 %v1251_v28 }
 0x217   : > { %1121 = vst.msk [vmem:[#allocation5 + $0x120] sm:$0x1] %vm1108_vm10, %v5287_v24  ;;  %4589 = vmatmul.msk.f32.vlgmr.msra.gmra.mxu1 %vm1099_vm9, %v1218_v29  ;;  %4931 = vmatpush.msrb.mxu3 %v1251_v28 }
 0x218   : > { %1122 = vst.msk [vmem:[#allocation5 + $0x138] sm:$0x1] %vm1108_vm10, %v5287_v24  ;;  %2386 = vmatpush.msrb.mxu1 %v2281_v36 }
 0x219   : > { %4932 = vmatpush.msra.mxu3 %v5831_v47  ;;  %1123 = vst.msk [vmem:[#allocation5 + $0x150] sm:$0x1] %vm1108_vm10, %v5287_v24  ;;  %v5051_v41 = vpop.eup %5050 }
 0x21a   : > { %1124 = vst.msk [vmem:[#allocation5 + $0x168] sm:$0x1] %vm1108_vm10, %v5287_v24  ;;  %v985_v44 = vmul.f32 %v5051_v41, %v983_v33  ;;  %vm991_vm12 = vweird.f32 %v5051_v41 }
 0x21b   : > { %4933 = vmatpush.msra.mxu3 %v5833_v48  ;;  %1125 = vst.msk [vmem:[#allocation5 + $0x180] sm:$0x1] %vm1108_vm10, %v5287_v24  ;;  %vm992_vm13 = vmor %vm990_vm11, %vm991_vm12 }
 0x21c   : > { %1128 = vst.msk [vmem:[#allocation5 + $0x29] sm:$0x1] %vm1108_vm10, %v5287_v24  ;;  %v986_v45 = vmul.f32 %v5051_v41, %v985_v44 }
 0x21d   : > { %4934 = vmatpush.msra.mxu3 %v5838_v53  ;;  %1129 = vst.msk [vmem:[#allocation5 + $0x41] sm:$0x1] %vm1108_vm10, %v5287_v24  ;;  %v2280_v53 = vld [vmem:[#allocation9 + $0x130] sm:$0xff] }
 0x21e   : > { %1130 = vst.msk [vmem:[#allocation5 + $0x59] sm:$0x1] %vm1108_vm10, %v5287_v24  ;;  %4622 = vmatmul.msk.f32.gmra.mxu2 %vm1099_vm9, %v1179_v38  ;;  %v987_v47 = vmul.f32 0.5, %v986_v45  ;;  %2387 = vmatpush.msrb.mxu1 %v2280_v53 }
 0x21f   : > { %4935 = vmatpush.msra.mxu3 %v5845_v56  ;;  %1131 = vst.msk [vmem:[#allocation5 + $0x71] sm:$0x1] %vm1108_vm10, %v5287_v24 }
 0x220   : > { %1132 = vst.msk [vmem:[#allocation5 + $0x89] sm:$0x1] %vm1108_vm10, %v5287_v24  ;;  %v988_v48 = vsub.f32 1.5, %v987_v47 }
 0x221   : > { %4936 = vmatpush.msra.mxu3 %v5852_v62  ;;  %1133 = vst.msk [vmem:[#allocation5 + $0xa1] sm:$0x1] %vm1108_vm10, %v5287_v24 }
 0x222   : > { %1134 = vst.msk [vmem:[#allocation5 + $0xb9] sm:$0x1] %vm1108_vm10, %v5287_v24  ;;  %v989_v51 = vmul.f32 %v5051_v41, %v988_v48 }
 0x223   : > { %4937 = vmatpush.msra.mxu3 %v5861_v6  ;;  %1135 = vst.msk [vmem:[#allocation5 + $0xd1] sm:$0x1] %vm1108_vm10, %v5287_v24 }
 0x224   : > { %1136 = vst.msk [vmem:[#allocation5 + $0xe9] sm:$0x1] %vm1108_vm10, %v5287_v24  ;;  %v993_v54 = vsel %vm992_vm13, %v5051_v41, %v989_v51 }
 0x225   : > { %4938 = vmatpush.msra.mxu3 %v1211_v14  ;;  %1137 = vst.msk [vmem:[#allocation5 + $0x101] sm:$0x1] %vm1108_vm10, %v5287_v24  ;;  %v994_v56 = vmul.f32 %v993_v54, %v974_v50 }
 0x226   : > { %1138 = vst.msk [vmem:[#allocation5 + $0x119] sm:$0x1] %vm1108_vm10, %v5287_v24 }
 0x227   : > { %4939 = vmatpush.msra.mxu3 %v1210_v19  ;;  %1139 = vst.msk [vmem:[#allocation5 + $0x131] sm:$0x1] %vm1108_vm10, %v5287_v24  ;;  %v995_v60 = vmul.f32 %v994_v56, %v5856_v0  ;;  %v5941_v62 = vperm.slane %v994_v56, 0 }
 0x228   : > { %1140 = vst.msk [vmem:[#allocation5 + $0x149] sm:$0x1] %vm1108_vm10, %v5287_v24 }
 0x229   : > { %1141 = vst.msk [vmem:[#allocation5 + $0x161] sm:$0x1] %vm1108_vm10, %v5287_v24  ;;  %v996_v2 = vsub.f32 %v975_v58, %v995_v60  ;;  %v1000_v3 = vmul.f32 %v5941_v62, %v5539_v27  ;;  %v1022_v6 = vmul.f32 %v5941_v62, %v5651_v37  ;;  %v1001_v7 = vmul.f32 %v5941_v62, %v5546_v31  ;;  %v2279_v60 = vld [vmem:[#allocation9 + $0x128] sm:$0xff] }
 0x22a   : > { %1142 = vst.msk [vmem:[#allocation5 + $0x179] sm:$0x1] %vm1108_vm10, %v5287_v24  ;;  %v1023_v0 = vmul.f32 %v5941_v62, %v5654_v40  ;;  %v1002_v10 = vmul.f32 %v5941_v62, %v5553_v35  ;;  %v1024_v11 = vmul.f32 %v5941_v62, %v5657_v42  ;;  %v1003_v37 = vmul.f32 %v5941_v62, %v5560_v39 }
 0x22b   : > { %7803 = vst [vmem:[#allocation24_spill] sm:$0xff] %v5941_v62  ;;  %v5961_v27 = vperm.slane %v996_v2, 0  ;;  %v1025_v31 = vmul.f32 %v5941_v62, %v5609_v5  ;;  %v1004_v40 = vmul.f32 %v5941_v62, %v5567_v43  ;;  %v1026_v5 = vmul.f32 %v5941_v62, %v5615_v9  ;;  %2388 = vmatpush.msrb.mxu1 %v2279_v60 }
 0x22c   : > { %1143 = vst.msk [vmem:[#allocation5 + $0x191] sm:$0x1] %vm1108_vm10, %v5287_v24  ;;  %v1005_v45 = vmul.f32 %v5941_v62, %v5572_v46  ;;  %v1027_v47 = vmul.f32 %v5941_v62, %v5621_v13  ;;  %v1006_v2 = vmul.f32 %v5941_v62, %v5577_v49  ;;  %v1007_v49 = vmul.f32 %v5941_v62, %v5582_v52 }
 0x22d   : > { %1126 = vst.msk [vmem:[#allocation5 + $0x198] sm:$0x1] %vm1108_vm10, %v5287_v24  ;;  %v1035_v35 = vadd.f32 %v5961_v27, %v1000_v3  ;;  %v1057_v42 = vadd.f32 %v5961_v27, %v1022_v6  ;;  %v1036_v14 = vadd.f32 %v5961_v27, %v1001_v7  ;;  %v1058_v39 = vadd.f32 %v5961_v27, %v1023_v0 }
 0x22e   : > { %1103 = vst.msk [vmem:[#allocation5 + $0x10] sm:$0x3] %vm1102_vm14, %v5287_v24  ;;  %v1037_v15 = vadd.f32 %v5961_v27, %v1002_v10  ;;  %v1059_v18 = vadd.f32 %v5961_v27, %v1024_v11  ;;  %v1060_v28 = vadd.f32 %v5961_v27, %v1025_v31  ;;  %v1039_v36 = vadd.f32 %v5961_v27, %v1004_v40 }
 0x22f   : > { %1107 = vst.msk [vmem:[#allocation5 + $0x1a8] sm:$0x3] %vm1102_vm14, %v5287_v24  ;;  %v1067_v19 = vmax.f32 %v1035_v35, 0.0  ;;  %v1089_v43 = vmax.f32 %v1057_v42, 0.0  ;;  %v1068_v22 = vmax.f32 %v1036_v14, 0.0  ;;  %v1090_v23 = vmax.f32 %v1058_v39, 0.0 }
 0x230   : > { %7804 = vst [vmem:[#allocation25_spill] sm:$0xff] %v5961_v27  ;;  %v1069_v33 = vmax.f32 %v1037_v15, 0.0  ;;  %v1091_v38 = vmax.f32 %v1059_v18, 0.0  ;;  %v1061_v9 = vadd.f32 %v5961_v27, %v1026_v5  ;;  %v1092_v44 = vmax.f32 %v1060_v28, 0.0 }
 0x231   : > { %1127 = vst.msk [vmem:[#allocation5 + $0x11] sm:$0x1] %vm1108_vm10, %v5287_v24  ;;  %v1071_v48 = vmax.f32 %v1039_v36, 0.0  ;;  %v1040_v51 = vadd.f32 %v5961_v27, %v1005_v45  ;;  %v1062_v53 = vadd.f32 %v5961_v27, %v1027_v47  ;;  %v1028_v3 = vmul.f32 %v5941_v62, %v5627_v17 }
 0x232   : > { %1144 = vst.msk [vmem:[#allocation5 + $0x1a9] sm:$0x1] %vm1108_vm10, %v5287_v24  ;;  %v1038_v24 = vadd.f32 %v5961_v27, %v1003_v37  ;;  %v1093_v50 = vmax.f32 %v1061_v9, 0.0  ;;  %v1041_v7 = vadd.f32 %v5961_v27, %v1006_v2  ;;  %v1029_v17 = vmul.f32 %v5941_v62, %v5633_v21 }
 0x233   : > { %1146 = vst.msk [vmem:[#allocation5 + $0x19] sm:$0xff] %vm1099_vm9, %v1067_v19  ;;  %v1072_v46 = vmax.f32 %v1040_v51, 0.0  ;;  %v1094_v13 = vmax.f32 %v1062_v53, 0.0  ;;  %v1063_v0 = vadd.f32 %v5961_v27, %v1028_v3  ;;  %v1042_v35 = vadd.f32 %v5961_v27, %v1007_v49  ;;  %v1717_v49 = vld [vmem:[#allocation9 + $0xb8] sm:$0xff] }
 0x234   : > { %1168 = vst.msk [vmem:[#allocation5 + $0x121] sm:$0xff] %vm1099_vm9, %v1089_v43  ;;  %v1070_v41 = vmax.f32 %v1038_v24, 0.0  ;;  %v1073_v37 = vmax.f32 %v1041_v7, 0.0  ;;  %v1064_v42 = vadd.f32 %v5961_v27, %v1029_v17  ;;  %v1008_v52 = vmul.f32 %v5941_v62, %v5587_v55  ;;  %v2278_v24 = vld [vmem:[#allocation9 + $0x120] sm:$0xff] }
 0x235   : > { %v1219_v29 = vld [vmem:[#allocation5 + $0x9] sm:$0xff]  ;;  %1147 = vst.msk [vmem:[#allocation5 + $0x21] sm:$0xff] %vm1099_vm9, %v1068_v22  ;;  %v1095_v31 = vmax.f32 %v1063_v0, 0.0  ;;  %v1074_v15 = vmax.f32 %v1042_v35, 0.0  ;;  %2389 = vmatpush.msrb.mxu1 %v2278_v24  ;;  %v1009_v55 = vmul.f32 %v5941_v62, %v5591_v57  ;;  %v1010_v57 = vmul.f32 %v5941_v62, %v5594_v59 }
 0x236   : > { %4590 = vmatmul.msk.f32.gmra.mxu1 %vm1099_vm9, %v1219_v29  ;;  %1169 = vst.msk [vmem:[#allocation5 + $0x129] sm:$0xff] %vm1099_vm9, %v1090_v23  ;;  %v1096_v18 = vmax.f32 %v1064_v42, 0.0  ;;  %v1043_v5 = vadd.f32 %v5961_v27, %v1008_v52  ;;  %v1011_v59 = vmul.f32 %v5941_v62, %v5597_v61  ;;  %v1012_v61 = vmul.f32 %v5941_v62, %v5600_v63 }
 0x237   : > { %1148 = vst.msk [vmem:[#allocation5 + $0x31] sm:$0xff] %vm1099_vm9, %v1069_v33  ;;  %v1044_v28 = vadd.f32 %v5961_v27, %v1009_v55  ;;  %v1045_v9 = vadd.f32 %v5961_v27, %v1010_v57  ;;  %v1013_v63 = vmul.f32 %v5941_v62, %v5603_v1  ;;  %v1014_v1 = vmul.f32 %v5941_v62, %v5606_v4  ;;  %v1716_v4 = vld [vmem:[#allocation9 + $0xb0] sm:$0xff] }
 0x238   : > { %1170 = vst.msk [vmem:[#allocation5 + $0x139] sm:$0xff] %vm1099_vm9, %v1091_v38  ;;  %v1075_v22 = vmax.f32 %v1043_v5, 0.0  ;;  %v1015_v52 = vmul.f32 %v5941_v62, %v5612_v8  ;;  %v1016_v8 = vmul.f32 %v5941_v62, %v5618_v12  ;;  %v1713_v12 = vld [vmem:[#allocation9 + $0x98] sm:$0xff] }
 0x239   : > { %1149 = vst.msk [vmem:[#allocation5 + $0x39] sm:$0xff] %vm1099_vm9, %v1070_v41  ;;  %v1076_v36 = vmax.f32 %v1044_v28, 0.0  ;;  %v1077_v45 = vmax.f32 %v1045_v9, 0.0  ;;  %v1048_v0 = vadd.f32 %v5961_v27, %v1013_v63  ;;  %v1049_v35 = vadd.f32 %v5961_v27, %v1014_v1  ;;  %v1995_v1 = vld [vmem:[#allocation9 + $0xd8] sm:$0xff] }
 0x23a   : > { %v5999_v54 = vld [vmem:[#allocation5 + $0x19] sm:$0xff]  ;;  %1171 = vst.msk [vmem:[#allocation5 + $0x141] sm:$0xff] %vm1099_vm9, %v1092_v44 }
 0x23b   : > { %v6001_v56 = vld [vmem:[#allocation5 + $0x18] sm:$0xff]  ;;  %v1242_v58 = vld [vmem:[#allocation5 + $0x121] sm:$0xff]  ;;  %1150 = vst.msk [vmem:[#allocation5 + $0x49] sm:$0xff] %vm1099_vm9, %v1071_v48  ;;  %v1046_v48 = vadd.f32 %v5961_v27, %v1011_v59 }
 0x23c   : > { %4623 = vmatmul.msk.f32.gmra.mxu2 %vm1099_vm9, %v6001_v56  ;;  %4613 = vmatmul.msk.f32.vlgmr.msrb.gmra.mxu3 %vm1099_vm9, %v1242_v58  ;;  %1172 = vst.msk [vmem:[#allocation5 + $0x151] sm:$0xff] %vm1099_vm9, %v1093_v50  ;;  %v6017_v6 = vld [vmem:[#allocation5 + $0x20] sm:$0xff]  ;;  %v1047_v58 = vadd.f32 %v5961_v27, %v1012_v61  ;;  %v1999_v59 = vld [vmem:[#allocation9 + $0xf8] sm:$0xff]  ;;  %v1711_v61 = vld [vmem:[#allocation9 + $0x88] sm:$0xff] }
 0x23d   : > { %1151 = vst.msk [vmem:[#allocation5 + $0x51] sm:$0xff] %vm1099_vm9, %v1072_v46  ;;  %v6021_v10 = vld [vmem:[#allocation5 + $0x21] sm:$0xff]  ;;  %v1243_v11 = vld [vmem:[#allocation5 + $0x129] sm:$0xff]  ;;  %v1078_v53 = vmax.f32 %v1046_v48, 0.0  ;;  %1822 = vmatpush.msrb.mxu3 %v1717_v49  ;;  %2104 = vmatpush.msrb.mxu0 %v1999_v59 }
 0x23e   : > { %4591 = vmatmul.msk.f32.gmra.mxu1 %vm1099_vm9, %v5999_v54  ;;  %1173 = vst.msk [vmem:[#allocation5 + $0x159] sm:$0xff] %vm1099_vm9, %v1094_v13  ;;  %v6034_v40 = vld [vmem:[#allocation5 + $0x30] sm:$0xff]  ;;  %v2277_v46 = vld [vmem:[#allocation9 + $0x118] sm:$0xff]  ;;  %v1079_v3 = vmax.f32 %v1047_v58, 0.0  ;;  %v1712_v48 = vld [vmem:[#allocation9 + $0x90] sm:$0xff] }
 0x23f   : > { %1152 = vst.msk [vmem:[#allocation5 + $0x61] sm:$0xff] %vm1099_vm9, %v1073_v37  ;;  %v6038_v14 = vld [vmem:[#allocation5 + $0x31] sm:$0xff]  ;;  %v1244_v39 = vld [vmem:[#allocation5 + $0x139] sm:$0xff]  ;;  %2390 = vmatpush.msrb.mxu1 %v2277_v46  ;;  %1823 = vmatpush.msrb.mxu3 %v1716_v4 }
 0x240   : > { %1174 = vst.msk [vmem:[#allocation5 + $0x169] sm:$0xff] %vm1099_vm9, %v1095_v31  ;;  %v6049_v21 = vld [vmem:[#allocation5 + $0x38] sm:$0xff]  ;;  %v6119_v37 = vld [vmem:[#allocation5 + $0x120] sm:$0xff]  ;;  %v1080_v31 = vmax.f32 %v1048_v0, 0.0  ;;  %v1710_v0 = vld [vmem:[#allocation9 + $0x80] sm:$0xff] }
 0x241   : > { %1153 = vst.msk [vmem:[#allocation5 + $0x69] sm:$0xff] %vm1099_vm9, %v1074_v15  ;;  %v6052_v19 = vld [vmem:[#allocation5 + $0x39] sm:$0xff]  ;;  %v1245_v43 = vld [vmem:[#allocation5 + $0x141] sm:$0xff]  ;;  %v1081_v15 = vmax.f32 %v1049_v35, 0.0 }
 0x242   : > { %1175 = vst.msk [vmem:[#allocation5 + $0x171] sm:$0xff] %vm1099_vm9, %v1096_v18  ;;  %v6062_v23 = vld [vmem:[#allocation5 + $0x48] sm:$0xff]  ;;  %v2276_v18 = vld [vmem:[#allocation9 + $0x110] sm:$0xff]  ;;  %v6151_v24 = vld [vmem:[#allocation5 + $0x138] sm:$0xff] }
 0x243   : > { %1154 = vst.msk [vmem:[#allocation5 + $0x79] sm:$0xff] %vm1099_vm9, %v1075_v22  ;;  %v6065_v29 = vld [vmem:[#allocation5 + $0x49] sm:$0xff]  ;;  %v1246_v33 = vld [vmem:[#allocation5 + $0x151] sm:$0xff]  ;;  %2391 = vmatpush.msrb.mxu1 %v2276_v18  ;;  %v1205_v9 = vld [vmem:[#allocation5 + $0x140] sm:$0xff] }
 0x244   : > { %4624 = vmatmul.msk.f32.gmra.mxu2 %vm1099_vm9, %v6017_v6  ;;  %4614 = vmatmul.msk.f32.gmra.mxu3 %vm1099_vm9, %v1243_v11  ;;  %1155 = vst.msk [vmem:[#allocation5 + $0x81] sm:$0xff] %vm1099_vm9, %v1076_v36  ;;  %v6075_v38 = vld [vmem:[#allocation5 + $0x50] sm:$0xff]  ;;  %v1051_v36 = vadd.f32 %v5961_v27, %v1016_v8  ;;  %v1997_v58 = vld [vmem:[#allocation9 + $0xe8] sm:$0xff]  ;;  %v1994_v35 = vld [vmem:[#allocation9 + $0xd0] sm:$0xff] }
 0x245   : > { %v6078_v41 = vld [vmem:[#allocation5 + $0x51] sm:$0xff]  ;;  %v1247_v44 = vld [vmem:[#allocation5 + $0x159] sm:$0xff]  ;;  %1156 = vst.msk [vmem:[#allocation5 + $0x91] sm:$0xff] %vm1099_vm9, %v1077_v45 }
 0x246   : > { %4592 = vmatmul.msk.f32.gmra.mxu1 %vm1099_vm9, %v6021_v10  ;;  %v6088_v47 = vld [vmem:[#allocation5 + $0x60] sm:$0xff]  ;;  %1157 = vst.msk [vmem:[#allocation5 + $0x99] sm:$0xff] %vm1099_vm9, %v1078_v53  ;;  %v1083_v45 = vmax.f32 %v1051_v36, 0.0  ;;  %v1017_v53 = vmul.f32 %v5941_v62, %v5624_v16  ;;  %v1206_v63 = vld [vmem:[#allocation5 + $0x150] sm:$0xff]  ;;  %v2275_v16 = vld [vmem:[#allocation9 + $0x108] sm:$0xff] }
 0x247   : > { %v6091_v50 = vld [vmem:[#allocation5 + $0x61] sm:$0xff]  ;;  %v1248_v51 = vld [vmem:[#allocation5 + $0x169] sm:$0xff]  ;;  %1158 = vst.msk [vmem:[#allocation5 + $0xa9] sm:$0xff] %vm1099_vm9, %v1079_v3  ;;  %2392 = vmatpush.msrb.mxu1 %v2275_v16  ;;  %v1993_v4 = vld [vmem:[#allocation9 + $0xc8] sm:$0xff] }
 0x248   : > { %v6101_v13 = vld [vmem:[#allocation5 + $0x68] sm:$0xff]  ;;  %1159 = vst.msk [vmem:[#allocation5 + $0xb1] sm:$0xff] %vm1099_vm9, %v1080_v31  ;;  %v1996_v31 = vld [vmem:[#allocation9 + $0xe0] sm:$0xff]  ;;  %v1682_v32 = vld [vmem:[#allocation5 + $0x3a] sm:$0xff] }
 0x249   : > { %v6104_v60 = vld [vmem:[#allocation5 + $0x69] sm:$0xff]  ;;  %v1249_v2 = vld [vmem:[#allocation5 + $0x171] sm:$0xff]  ;;  %1160 = vst.msk [vmem:[#allocation5 + $0xc1] sm:$0xff] %vm1099_vm9, %v1081_v15  ;;  %v1018_v15 = vmul.f32 %v5941_v62, %v5630_v20  ;;  %v1019_v20 = vmul.f32 %v5941_v62, %v5636_v25  ;;  %v1020_v25 = vmul.f32 %v5941_v62, %v5642_v30 }
 0x24a   : > { %v6114_v7 = vld [vmem:[#allocation5 + $0x78] sm:$0xff]  ;;  %1162 = vst.msk [vmem:[#allocation5 + $0xd9] sm:$0xff] %vm1099_vm9, %v1083_v45  ;;  %v1992_v8 = vld [vmem:[#allocation9 + $0xc0] sm:$0xff] }
 0x24b   : > { %v6117_v11 = vld [vmem:[#allocation5 + $0x79] sm:$0xff]  ;;  %v6133_v42 = vld [vmem:[#allocation5 + $0x81] sm:$0xff] }
 0x24c   : > { %4625 = vmatmul.msk.f32.gmra.mxu2 %vm1099_vm9, %v6034_v40  ;;  %4615 = vmatmul.msk.f32.gmra.mxu3 %vm1099_vm9, %v1244_v39  ;;  %v6130_v17 = vld [vmem:[#allocation5 + $0x80] sm:$0xff]  ;;  %v6135_v39 = vld [vmem:[#allocation5 + $0x128] sm:$0xff]  ;;  %v6146_v5 = vld [vmem:[#allocation5 + $0x90] sm:$0xff] }
 0x24d   : > { %v6149_v22 = vld [vmem:[#allocation5 + $0x91] sm:$0xff]  ;;  %v6165_v57 = vld [vmem:[#allocation5 + $0x99] sm:$0xff] }
 0x24e   : > { %4593 = vmatmul.msk.f32.gmra.mxu1 %vm1099_vm9, %v6038_v14  ;;  %v6162_v28 = vld [vmem:[#allocation5 + $0x98] sm:$0xff]  ;;  %v6175_v46 = vld [vmem:[#allocation5 + $0xa8] sm:$0xff] }
 0x24f   : > { %v6178_v3 = vld [vmem:[#allocation5 + $0xa9] sm:$0xff] }
 0x250   : > { %v6188_v18 = vld [vmem:[#allocation5 + $0xb0] sm:$0xff]  ;;  %v6208_v45 = vld [vmem:[#allocation5 + $0xc1] sm:$0xff] }
 0x251   : > { %v6244_v16 = vld [vmem:[#allocation5 + $0xd9] sm:$0xff] }
 0x254   : > { %4626 = vmatmul.msk.f32.gmra.mxu2 %vm1099_vm9, %v6049_v21  ;;  %4616 = vmatmul.msk.f32.gmra.mxu3 %vm1099_vm9, %v1245_v43  ;;  %v1050_v43 = vadd.f32 %v5961_v27, %v1015_v52  ;;  %v1053_v52 = vadd.f32 %v5961_v27, %v1018_v15  ;;  %v2562_v15 = vld [vmem:[#allocation9 + $0x170] sm:$0xff] }
 0x256   : > { %4594 = vmatmul.msk.f32.gmra.mxu1 %vm1099_vm9, %v6052_v19  ;;  %v1082_v55 = vmax.f32 %v1050_v43, 0.0  ;;  %v6191_v43 = vld [vmem:[#allocation5 + $0xb1] sm:$0xff] }
 0x258   : > { %1161 = vst.msk [vmem:[#allocation5 + $0xc9] sm:$0xff] %vm1099_vm9, %v1082_v55  ;;  %v1207_v55 = vld [vmem:[#allocation5 + $0x158] sm:$0xff] }
 0x25c   : > { %4627 = vmatmul.msk.f32.gmra.mxu2 %vm1099_vm9, %v6062_v23  ;;  %4617 = vmatmul.msk.f32.gmra.mxu3 %vm1099_vm9, %v1246_v33  ;;  %v1715_v33 = vld [vmem:[#allocation9 + $0xa8] sm:$0xff] }
 0x25d   : > { %1824 = vmatpush.msrb.mxu3 %v1715_v33  ;;  %v1085_v33 = vmax.f32 %v1053_v52, 0.0 }
 0x25e   : > { %4595 = vmatmul.msk.f32.gmra.mxu1 %vm1099_vm9, %v6065_v29 }
 0x25f   : > { %1164 = vst.msk [vmem:[#allocation5 + $0xf1] sm:$0xff] %vm1099_vm9, %v1085_v33 }
 0x264   : > { %4628 = vmatmul.msk.f32.gmra.mxu2 %vm1099_vm9, %v6075_v38  ;;  %4618 = vmatmul.msk.f32.gmra.mxu3 %vm1099_vm9, %v1247_v44  ;;  %v1714_v44 = vld [vmem:[#allocation9 + $0xa0] sm:$0xff] }
 0x265   : > { %1825 = vmatpush.msrb.mxu3 %v1714_v44  ;;  %v1054_v44 = vadd.f32 %v5961_v27, %v1019_v20 }
 0x266   : > { %4596 = vmatmul.msk.f32.gmra.mxu1 %vm1099_vm9, %v6078_v41 }
 0x267   : > { %1826 = vmatpush.msrb.mxu3 %v1713_v12  ;;  %v1208_v12 = vld [vmem:[#allocation5 + $0x168] sm:$0xff]  ;;  %v1086_v59 = vmax.f32 %v1054_v44, 0.0 }
 0x268   : > { %v1678_v44 = vld [vmem:[#allocation5 + $0xa] sm:$0xff] }
 0x269   : > { %1827 = vmatpush.msrb.mxu3 %v1712_v48  ;;  %1165 = vst.msk [vmem:[#allocation5 + $0xf9] sm:$0xff] %vm1099_vm9, %v1086_v59  ;;  %v2560_v59 = vld [vmem:[#allocation9 + $0x160] sm:$0xff] }
 0x26b   : > { %1828 = vmatpush.msrb.mxu3 %v1711_v61  ;;  %v6227_v61 = vld [vmem:[#allocation5 + $0xc9] sm:$0xff] }
 0x26c   : > { %4629 = vmatmul.msk.f32.gmra.mxu2 %vm1099_vm9, %v6088_v47  ;;  %4619 = vmatmul.msk.f32.gmra.mxu3 %vm1099_vm9, %v1248_v51  ;;  %v1998_v51 = vld [vmem:[#allocation9 + $0xf0] sm:$0xff] }
 0x26d   : > { %2105 = vmatpush.msrb.mxu0 %v1998_v51  ;;  %1829 = vmatpush.msrb.mxu3 %v1710_v0  ;;  %v1055_v51 = vadd.f32 %v5961_v27, %v1020_v25  ;;  %v6241_v0 = vld [vmem:[#allocation5 + $0xd8] sm:$0xff] }
 0x26e   : > { %4597 = vmatmul.msk.f32.gmra.mxu1 %vm1099_vm9, %v6091_v50 }
 0x26f   : > { %2106 = vmatpush.msrb.mxu0 %v1997_v58  ;;  %v1209_v58 = vld [vmem:[#allocation5 + $0x170] sm:$0xff] }
 0x271   : > { %2107 = vmatpush.msrb.mxu0 %v1996_v31 }
 0x273   : > { %2108 = vmatpush.msrb.mxu0 %v1995_v1  ;;  %v1677_v1 = vld [vmem:[#allocation5 + $0x2] sm:$0xff] }
 0x274   : > { %4630 = vmatmul.msk.f32.gmra.mxu2 %vm1099_vm9, %v6101_v13  ;;  %4620 = vmatmul.msk.f32.gmra.mxu3 %vm1099_vm9, %v1249_v2  ;;  %v1052_v2 = vadd.f32 %v5961_v27, %v1017_v53 }
 0x275   : > { %2109 = vmatpush.msrb.mxu0 %v1994_v35 }
 0x276   : > { %4598 = vmatmul.msk.f32.gmra.mxu1 %vm1099_vm9, %v6104_v60  ;;  %v1084_v49 = vmax.f32 %v1052_v2, 0.0  ;;  %v1087_v2 = vmax.f32 %v1055_v51, 0.0  ;;  %v2558_v51 = vld [vmem:[#allocation9 + $0x150] sm:$0xff] }
 0x277   : > { %2110 = vmatpush.msrb.mxu0 %v1993_v4 }
 0x278   : > { %1163 = vst.msk [vmem:[#allocation5 + $0xe1] sm:$0xff] %vm1099_vm9, %v1084_v49 }
 0x279   : > { %2111 = vmatpush.msrb.mxu0 %v1992_v8  ;;  %1166 = vst.msk [vmem:[#allocation5 + $0x109] sm:$0xff] %vm1099_vm9, %v1087_v2  ;;  %v2561_v8 = vld [vmem:[#allocation9 + $0x168] sm:$0xff] }
 0x27a   : > { %4685 = vmatmul.msk.f32.vlgmr.msrb.gmra.mxu0 %vm1099_vm9, %v6001_v56  ;;  %v6222_v56 = vld [vmem:[#allocation5 + $0xc8] sm:$0xff] }
 0x27c   : > { %4631 = vmatmul.msk.f32.gmra.mxu2 %vm1099_vm9, %v6114_v7  ;;  %4645 = vmatmul.msk.f32.vlgmr.msra.gmra.mxu3 %vm1099_vm9, %v6119_v37 }
 0x27e   : > { %4599 = vmatmul.msk.f32.gmra.mxu1 %vm1099_vm9, %v6117_v11 }
 0x27f   : > { %v6260_v20 = vld [vmem:[#allocation5 + $0xe1] sm:$0xff] }
 0x282   : > { %4686 = vmatmul.msk.f32.gmra.mxu0 %vm1099_vm9, %v6017_v6  ;;  %v2274_v6 = vld [vmem:[#allocation9 + $0x100] sm:$0xff] }
 0x283   : > { %2393 = vmatpush.msrb.mxu1 %v2274_v6  ;;  %v6273_v6 = vld [vmem:[#allocation5 + $0xf0] sm:$0xff] }
 0x284   : > { %4632 = vmatmul.msk.f32.gmra.mxu2 %vm1099_vm9, %v6130_v17  ;;  %4646 = vmatmul.msk.f32.gmra.mxu3 %vm1099_vm9, %v6135_v39 }
 0x286   : > { %4600 = vmatmul.msk.f32.gmra.mxu1 %vm1099_vm9, %v6133_v42 }
 0x28a   : > { %4687 = vmatmul.msk.f32.gmra.mxu0 %vm1099_vm9, %v6034_v40  ;;  %v2563_v40 = vld [vmem:[#allocation9 + $0x178] sm:$0xff] }
 0x28b   : > { %2668 = vmatpush.msrb.mxu2 %v2563_v40  ;;  %v3410_v40 = vld [vmem:[#allocation9 + $0x238] sm:$0xff] }
 0x28c   : > { %4633 = vmatmul.msk.f32.gmra.mxu2 %vm1099_vm9, %v6146_v5  ;;  %4647 = vmatmul.msk.f32.gmra.mxu3 %vm1099_vm9, %v6151_v24 }
 0x28d   : > { %2669 = vmatpush.msrb.mxu2 %v2562_v15  ;;  %3515 = vmatpush.msra.mxu1 %v3410_v40 }
 0x28e   : > { %4601 = vmatmul.msk.f32.gmra.mxu1 %vm1099_vm9, %v6149_v22 }
 0x28f   : > { %2670 = vmatpush.msrb.mxu2 %v2561_v8 }
 0x291   : > { %2671 = vmatpush.msrb.mxu2 %v2560_v59  ;;  %v1680_v59 = vld [vmem:[#allocation5 + $0x22] sm:$0xff] }
 0x292   : > { %4688 = vmatmul.msk.f32.gmra.mxu0 %vm1099_vm9, %v6049_v21  ;;  %v2559_v21 = vld [vmem:[#allocation9 + $0x158] sm:$0xff] }
 0x293   : > { %2672 = vmatpush.msrb.mxu2 %v2559_v21 }
 0x294   : > { %4634 = vmatmul.msk.f32.gmra.mxu2 %vm1099_vm9, %v6162_v28  ;;  %4648 = vmatmul.msk.f32.gmra.mxu3 %vm1099_vm9, %v1205_v9  ;;  %v6203_v36 = vpop.f32.mrf.mxu1  ;;  %v6205_v9 = vld [vmem:[#allocation5 + $0xc0] sm:$0xff] }
 0x295   : > { %2673 = vmatpush.msrb.mxu2 %v2558_v51  ;;  %v6303_v51 = vld [vmem:[#allocation5 + $0x108] sm:$0xff] }
 0x296   : > { %4602 = vmatmul.msk.f32.gmra.mxu1 %vm1099_vm9, %v6165_v57 }
 0x299   : > { %v6212_v48 = vpop.f32.mrf.mxu2 }
 0x29a   : > { %4689 = vmatmul.msk.f32.gmra.mxu0 %vm1099_vm9, %v6062_v23  ;;  %v2556_v23 = vld [vmem:[#allocation9 + $0x140] sm:$0xff] }
 0x29c   : > { %4635 = vmatmul.msk.f32.gmra.mxu2 %vm1099_vm9, %v6175_v46  ;;  %4649 = vmatmul.msk.f32.gmra.mxu3 %vm1099_vm9, %v1206_v63  ;;  %v1021_v63 = vmul.f32 %v5941_v62, %v5648_v34  ;;  %v1683_v62 = vld [vmem:[#allocation5 + $0x4a] sm:$0xff] }
 0x29e   : > { %4603 = vmatmul.msk.f32.gmra.mxu1 %vm1099_vm9, %v6178_v3  ;;  %v1056_v31 = vadd.f32 %v5961_v27, %v1021_v63  ;;  %v2845_v27 = vld [vmem:[#allocation9 + $0x1b0] sm:$0xff] }
 0x2a0   : > { %v1088_v35 = vmax.f32 %v1056_v31, 0.0  ;;  %v6275_v31 = vld [vmem:[#allocation5 + $0xf1] sm:$0xff] }
 0x2a1   : > { %v6235_v30 = vpop.f32.mrf.mxu2 }
 0x2a2   : > { %1167 = vst.msk [vmem:[#allocation5 + $0x111] sm:$0xff] %vm1099_vm9, %v1088_v35  ;;  %v2557_v35 = vld [vmem:[#allocation9 + $0x148] sm:$0xff]  ;;  %4690 = vmatmul.msk.f32.gmra.mxu0 %vm1099_vm9, %v6075_v38 }
 0x2a3   : > { %2674 = vmatpush.msrb.mxu2 %v2557_v35  ;;  %v1681_v35 = vld [vmem:[#allocation5 + $0x32] sm:$0xff] }
 0x2a4   : > { %4636 = vmatmul.msk.f32.gmra.mxu2 %vm1099_vm9, %v6188_v18  ;;  %4650 = vmatmul.msk.f32.gmra.mxu3 %vm1099_vm9, %v1207_v55  ;;  %v6258_v55 = vld [vmem:[#allocation5 + $0xe0] sm:$0xff] }
 0x2a5   : > { %2675 = vmatpush.msrb.mxu2 %v2556_v23 }
 0x2a6   : > { %4604 = vmatmul.msk.f32.gmra.mxu1 %vm1099_vm9, %v6191_v43 }
 0x2aa   : > { %4691 = vmatmul.msk.f32.gmra.mxu0 %vm1099_vm9, %v6088_v47 }
 0x2ac   : > { %4637 = vmatmul.msk.f32.gmra.mxu2 %vm1099_vm9, %v6205_v9  ;;  %4651 = vmatmul.msk.f32.gmra.mxu3 %vm1099_vm9, %v1208_v12  ;;  %v2846_v12 = vld [vmem:[#allocation9 + $0x1b8] sm:$0xff] }
 0x2ad   : > { %2951 = vmatpush.msra.mxu3 %v2846_v12  ;;  %v6290_v12 = vld [vmem:[#allocation5 + $0xf9] sm:$0xff] }
 0x2ae   : > { %4605 = vmatmul.msk.f32.gmra.mxu1 %vm1099_vm9, %v6208_v45  ;;  %7805 = vst [vmem:[#allocation26_spill] sm:$0xff] %v6290_v12 }
 0x2af   : > { %2952 = vmatpush.msra.mxu3 %v2845_v27  ;;  %v3409_v27 = vld [vmem:[#allocation9 + $0x230] sm:$0xff] }
 0x2b0   : > { %3516 = vmatpush.msra.mxu1 %v3409_v27 }
 0x2b2   : > { %4692 = vmatmul.msk.f32.gmra.mxu0 %vm1099_vm9, %v6101_v13 }
 0x2b3   : > { %v6225_v53 = vpop.f32.mrf.mxu1 }
 0x2b4   : > { %4638 = vmatmul.msk.f32.gmra.mxu2 %vm1099_vm9, %v6222_v56  ;;  %4652 = vmatmul.msk.f32.gmra.mxu3 %vm1099_vm9, %v1209_v58 }
 0x2b6   : > { %4606 = vmatmul.msk.f32.gmra.mxu1 %vm1099_vm9, %v6227_v61 }
 0x2ba   : > { %4693 = vmatmul.msk.f32.gmra.mxu0 %vm1099_vm9, %v6114_v7 }
 0x2bb   : > { %v1378_v49 = vpop.f32.mrf.mxu1 }
 0x2bc   : > { %4639 = vmatmul.msk.f32.gmra.mxu2 %vm1099_vm9, %v6241_v0  ;;  %4653 = vmatmul.msk.f32.vlgmr.msrb.gmra.mxu3 %vm1099_vm9, %v1677_v1  ;;  %v3128_v1 = vld [vmem:[#allocation9 + $0x1f8] sm:$0xff] }
 0x2bd   : > { %3233 = vmatpush.msra.mxu0 %v3128_v1  ;;  %v6305_v1 = vld [vmem:[#allocation5 + $0x109] sm:$0xff] }
 0x2be   : > { %4607 = vmatmul.msk.f32.gmra.mxu1 %vm1099_vm9, %v6244_v16  ;;  %7806 = vst [vmem:[#allocation27_spill] sm:$0xff] %v6305_v1 }
 0x2bf   : > { %v1587_v34 = vpop.f32.mrf.mxu2  ;;  %v6254_v4 = vpop.f32.mrf.mxu3  ;;  %3234 = vmatpush.msra.mxu0 %v3127_v26 }
 0x2c0   : > { %v6256_v52 = vadd.f32 %v1587_v34, %v1378_v49  ;;  %v1679_v49 = vld [vmem:[#allocation5 + $0x1a] sm:$0xff] }
 0x2c2   : > { %4694 = vmatmul.msk.f32.gmra.mxu0 %vm1099_vm9, %v6130_v17 }
 0x2c3   : > { %v1381_v33 = vpop.f32.mrf.mxu1 }
 0x2c4   : > { %4640 = vmatmul.msk.f32.gmra.mxu2 %vm1099_vm9, %v6258_v55  ;;  %4654 = vmatmul.msk.f32.gmra.mxu3 %vm1099_vm9, %v1678_v44 }
 0x2c6   : > { %4608 = vmatmul.msk.f32.gmra.mxu1 %vm1099_vm9, %v6260_v20 }
 0x2c7   : > { %v1590_v25 = vpop.f32.mrf.mxu2  ;;  %v6269_v58 = vpop.f32.mrf.mxu3 }
 0x2c8   : > { %v6271_v2 = vadd.f32 %v1590_v25, %v1381_v33  ;;  %v6288_v33 = vld [vmem:[#allocation5 + $0xf8] sm:$0xff] }
 0x2ca   : > { %4695 = vmatmul.msk.f32.gmra.mxu0 %vm1099_vm9, %v6146_v5 }
 0x2cb   : > { %v1384_v63 = vpop.f32.mrf.mxu1 }
 0x2cc   : > { %4641 = vmatmul.msk.f32.gmra.mxu2 %vm1099_vm9, %v6273_v6  ;;  %4655 = vmatmul.msk.f32.gmra.mxu3 %vm1099_vm9, %v1679_v49 }
 0x2ce   : > { %4609 = vmatmul.msk.f32.gmra.mxu1 %vm1099_vm9, %v6275_v31 }
 0x2cf   : > { %v1593_v34 = vpop.f32.mrf.mxu2  ;;  %v6284_v15 = vpop.f32.mrf.mxu3 }
 0x2d0   : > { %v6286_v8 = vadd.f32 %v1593_v34, %v1384_v63  ;;  %v6318_v34 = vld [vmem:[#allocation5 + $0x110] sm:$0xff] }
 0x2d2   : > { %4696 = vmatmul.msk.f32.gmra.mxu0 %vm1099_vm9, %v6162_v28 }
 0x2d3   : > { %v1387_v44 = vpop.f32.mrf.mxu1 }
 0x2d4   : > { %4642 = vmatmul.msk.f32.gmra.mxu2 %vm1099_vm9, %v6288_v33  ;;  %4656 = vmatmul.msk.f32.gmra.mxu3 %vm1099_vm9, %v1680_v59 }
 0x2d6   : > { %4610 = vmatmul.msk.f32.gmra.mxu1 %vm1099_vm9, %v6290_v12  ;;  %v1684_v12 = vld [vmem:[#allocation5 + $0x52] sm:$0xff] }
 0x2d7   : > { %v1596_v38 = vpop.f32.mrf.mxu2  ;;  %v6299_v21 = vpop.f32.mrf.mxu3 }
 0x2d8   : > { %v6301_v25 = vadd.f32 %v1596_v38, %v1387_v44  ;;  %v6320_v38 = vld [vmem:[#allocation5 + $0x111] sm:$0xff] }
 0x2d9   : > { %7807 = vst [vmem:[#allocation28_spill] sm:$0xff] %v6320_v38 }
 0x2da   : > { %4697 = vmatmul.msk.f32.gmra.mxu0 %vm1099_vm9, %v6175_v46 }
 0x2db   : > { %v1390_v63 = vpop.f32.mrf.mxu1 }
 0x2dc   : > { %4643 = vmatmul.msk.f32.gmra.mxu2 %vm1099_vm9, %v6303_v51  ;;  %4657 = vmatmul.msk.f32.gmra.mxu3 %vm1099_vm9, %v1681_v35 }
 0x2de   : > { %4611 = vmatmul.msk.f32.gmra.mxu1 %vm1099_vm9, %v6305_v1 }
 0x2df   : > { %v1599_v23 = vpop.f32.mrf.mxu2  ;;  %v6314_v47 = vpop.f32.mrf.mxu3 }
 0x2e0   : > { %v6316_v40 = vadd.f32 %v1599_v23, %v1390_v63 }
 0x2e2   : > { %4698 = vmatmul.msk.f32.gmra.mxu0 %vm1099_vm9, %v6188_v18 }
 0x2e3   : > { %v1393_v44 = vpop.f32.mrf.mxu1 }
 0x2e4   : > { %4644 = vmatmul.msk.f32.gmra.mxu2 %vm1099_vm9, %v6318_v34  ;;  %4658 = vmatmul.msk.f32.gmra.mxu3 %vm1099_vm9, %v1682_v32 }
 0x2e6   : > { %4612 = vmatmul.msk.f32.gmra.mxu1 %vm1099_vm9, %v6320_v38 }
 0x2e7   : > { %v1602_v13 = vpop.f32.mrf.mxu2  ;;  %v6329_v63 = vpop.f32.mrf.mxu3 }
 0x2e8   : > { %v6331_v23 = vadd.f32 %v1602_v13, %v1393_v44 }
 0x2ea   : > { %4699 = vmatmul.msk.f32.gmra.mxu0 %vm1099_vm9, %v6205_v9 }
 0x2eb   : > { %v1396_v1 = vpop.f32.mrf.mxu1 }
 0x2ec   : > { %4749 = vmatmul.msk.f32.vlgmr.msrb.gmra.mxu2 %vm1099_vm9, %v1679_v49  ;;  %4659 = vmatmul.msk.f32.gmra.mxu3 %vm1099_vm9, %v1683_v62 }
 0x2ee   : > { %4717 = vmatmul.msk.f32.vlgmr.msrb.gmra.mxu1 %vm1099_vm9, %v5999_v54 }
 0x2ef   : > { %v1605_v38 = vpop.f32.mrf.mxu2  ;;  %v6339_v7 = vpop.f32.mrf.mxu3 }
 0x2f0   : > { %v6341_v44 = vadd.f32 %v1605_v38, %v1396_v1  ;;  %v1685_v1 = vld [vmem:[#allocation5 + $0x62] sm:$0xff] }
 0x2f2   : > { %4700 = vmatmul.msk.f32.gmra.mxu0 %vm1099_vm9, %v6222_v56 }
 0x2f3   : > { %v1399_v13 = vpop.f32.mrf.mxu1 }
 0x2f4   : > { %4750 = vmatmul.msk.f32.gmra.mxu2 %vm1099_vm9, %v1680_v59  ;;  %4660 = vmatmul.msk.f32.gmra.mxu3 %vm1099_vm9, %v1684_v12 }
 0x2f6   : > { %4718 = vmatmul.msk.f32.gmra.mxu1 %vm1099_vm9, %v6021_v10 }
 0x2f7   : > { %v1608_v26 = vpop.f32.mrf.mxu2  ;;  %v6349_v54 = vpop.f32.mrf.mxu3 }
 0x2f8   : > { %v6351_v17 = vadd.f32 %v1608_v26, %v1399_v13  ;;  %v1686_v13 = vld [vmem:[#allocation5 + $0x6a] sm:$0xff]  ;;  %v2844_v26 = vld [vmem:[#allocation9 + $0x1a8] sm:$0xff] }
 0x2f9   : > { %2953 = vmatpush.msra.mxu3 %v2844_v26 }
 0x2fa   : > { %4701 = vmatmul.msk.f32.gmra.mxu0 %vm1099_vm9, %v6241_v0 }
 0x2fb   : > { %v1402_v49 = vpop.f32.mrf.mxu1 }
 0x2fc   : > { %4751 = vmatmul.msk.f32.gmra.mxu2 %vm1099_vm9, %v1681_v35  ;;  %4661 = vmatmul.msk.f32.gmra.mxu3 %vm1099_vm9, %v1685_v1 }
 0x2fe   : > { %4719 = vmatmul.msk.f32.gmra.mxu1 %vm1099_vm9, %v6038_v14 }
 0x2ff   : > { %v1611_v59 = vpop.f32.mrf.mxu2  ;;  %v1653_v5 = vpop.f32.mrf.mxu3 }
 0x300   : > { %v6359_v10 = vadd.f32 %v1611_v59, %v1402_v49  ;;  %v6362_v38 = vadd.f32 %v1653_v5, %v6254_v4  ;;  %v1687_v59 = vld [vmem:[#allocation5 + $0x7a] sm:$0xff] }
 0x301   : > { %v3126_v5 = vld [vmem:[#allocation9 + $0x1e8] sm:$0xff] }
 0x302   : > { %3235 = vmatpush.msra.mxu0 %v3126_v5 }
 0x303   : > { %v1405_v27 = vpop.f32.mrf.mxu1  ;;  %4702 = vmatmul.msk.f32.gmra.mxu0 %vm1099_vm9, %v6258_v55 }
 0x304   : > { %4752 = vmatmul.msk.f32.gmra.mxu2 %vm1099_vm9, %v1682_v32  ;;  %4662 = vmatmul.msk.f32.gmra.mxu3 %vm1099_vm9, %v1686_v13  ;;  %v3408_v32 = vld [vmem:[#allocation9 + $0x228] sm:$0xff] }
 0x305   : > { %3517 = vmatpush.msra.mxu1 %v3408_v32  ;;  %v1690_v32 = vld [vmem:[#allocation5 + $0x9a] sm:$0xff] }
 0x306   : > { %4720 = vmatmul.msk.f32.gmra.mxu1 %vm1099_vm9, %v6052_v19 }
 0x307   : > { %v1614_v14 = vpop.f32.mrf.mxu2  ;;  %v1656_v35 = vpop.f32.mrf.mxu3 }
 0x308   : > { %v6370_v28 = vadd.f32 %v1614_v14, %v1405_v27  ;;  %v6373_v4 = vadd.f32 %v1656_v35, %v6269_v58  ;;  %v1688_v14 = vld [vmem:[#allocation5 + $0x82] sm:$0xff] }
 0x30b   : > { %v1408_v49 = vpop.f32.mrf.mxu1  ;;  %4703 = vmatmul.msk.f32.gmra.mxu0 %vm1099_vm9, %v6273_v6 }
 0x30c   : > { %4753 = vmatmul.msk.f32.gmra.mxu2 %vm1099_vm9, %v1683_v62  ;;  %4663 = vmatmul.msk.f32.gmra.mxu3 %vm1099_vm9, %v1687_v59 }
 0x30e   : > { %4721 = vmatmul.msk.f32.gmra.mxu1 %vm1099_vm9, %v6065_v29 }
 0x30f   : > { %v1617_v19 = vpop.f32.mrf.mxu2  ;;  %v1659_v58 = vpop.f32.mrf.mxu3 }
 0x310   : > { %v6381_v46 = vadd.f32 %v1617_v19, %v1408_v49  ;;  %v6384_v27 = vadd.f32 %v1659_v58, %v6284_v15  ;;  %v1689_v49 = vld [vmem:[#allocation5 + $0x92] sm:$0xff] }
 0x311   : > { %v2843_v19 = vld [vmem:[#allocation9 + $0x1a0] sm:$0xff] }
 0x312   : > { %2954 = vmatpush.msra.mxu3 %v2843_v19 }
 0x313   : > { %v1411_v26 = vpop.f32.mrf.mxu1  ;;  %4704 = vmatmul.msk.f32.gmra.mxu0 %vm1099_vm9, %v6288_v33 }
 0x314   : > { %4754 = vmatmul.msk.f32.gmra.mxu2 %vm1099_vm9, %v1684_v12  ;;  %4664 = vmatmul.msk.f32.gmra.mxu3 %vm1099_vm9, %v1688_v14 }
 0x316   : > { %4722 = vmatmul.msk.f32.gmra.mxu1 %vm1099_vm9, %v6078_v41 }
 0x317   : > { %v1620_v62 = vpop.f32.mrf.mxu2  ;;  %v1662_v18 = vpop.f32.mrf.mxu3 }
 0x318   : > { %v6392_v29 = vadd.f32 %v1620_v62, %v1411_v26  ;;  %v6395_v35 = vadd.f32 %v1662_v18, %v6299_v21  ;;  %v1691_v62 = vld [vmem:[#allocation5 + $0xaa] sm:$0xff] }
 0x31b   : > { %v1414_v15 = vpop.f32.mrf.mxu1  ;;  %4705 = vmatmul.msk.f32.gmra.mxu0 %vm1099_vm9, %v6303_v51 }
 0x31c   : > { %4755 = vmatmul.msk.f32.gmra.mxu2 %vm1099_vm9, %v1685_v1  ;;  %4665 = vmatmul.msk.f32.gmra.mxu3 %vm1099_vm9, %v1689_v49  ;;  %v2113_v1 = vpop.f32.mrf.mxu0 }
 0x31e   : > { %4723 = vmatmul.msk.f32.gmra.mxu1 %vm1099_vm9, %v6091_v50 }
 0x31f   : > { %v1623_v41 = vpop.f32.mrf.mxu2  ;;  %v1665_v12 = vpop.f32.mrf.mxu3 }
 0x320   : > { %v6403_v9 = vadd.f32 %v1623_v41, %v1414_v15  ;;  %v6406_v5 = vadd.f32 %v1665_v12, %v6314_v47  ;;  %v1692_v12 = vld [vmem:[#allocation5 + $0xb2] sm:$0xff] }
 0x323   : > { %v1417_v21 = vpop.f32.mrf.mxu1  ;;  %4706 = vmatmul.msk.f32.gmra.mxu0 %vm1099_vm9, %v6318_v34 }
 0x324   : > { %4756 = vmatmul.msk.f32.gmra.mxu2 %vm1099_vm9, %v1686_v13  ;;  %4666 = vmatmul.msk.f32.gmra.mxu3 %vm1099_vm9, %v1690_v32  ;;  %v3125_v13 = vld [vmem:[#allocation9 + $0x1e0] sm:$0xff]  ;;  %v2116_v18 = vpop.f32.mrf.mxu0 }
 0x325   : > { %3236 = vmatpush.msra.mxu0 %v3125_v13 }
 0x326   : > { %4724 = vmatmul.msk.f32.gmra.mxu1 %vm1099_vm9, %v6104_v60  ;;  %v3407_v60 = vld [vmem:[#allocation9 + $0x220] sm:$0xff] }
 0x327   : > { %v1626_v50 = vpop.f32.mrf.mxu2  ;;  %v1668_v47 = vpop.f32.mrf.mxu3  ;;  %3518 = vmatpush.msra.mxu1 %v3407_v60 }
 0x328   : > { %v6414_v56 = vadd.f32 %v1626_v50, %v1417_v21  ;;  %v6417_v58 = vadd.f32 %v1668_v47, %v6329_v63  ;;  %v1693_v47 = vld [vmem:[#allocation5 + $0xc2] sm:$0xff] }
 0x32b   : > { %v1420_v26 = vpop.f32.mrf.mxu1  ;;  %4707 = vmatmul.msk.f32.gmra.mxu0 %vm1099_vm9, %v6119_v37 }
 0x32c   : > { %4757 = vmatmul.msk.f32.gmra.mxu2 %vm1099_vm9, %v1687_v59  ;;  %4667 = vmatmul.msk.f32.gmra.mxu3 %vm1099_vm9, %v1691_v62  ;;  %v2119_v21 = vpop.f32.mrf.mxu0 }
 0x32e   : > { %4725 = vmatmul.msk.f32.gmra.mxu1 %vm1099_vm9, %v6117_v11 }
 0x32f   : > { %v1629_v0 = vpop.f32.mrf.mxu2  ;;  %v1671_v15 = vpop.f32.mrf.mxu3 }
 0x330   : > { %v6425_v63 = vadd.f32 %v1629_v0, %v1420_v26  ;;  %v6428_v41 = vadd.f32 %v1671_v15, %v6339_v7  ;;  %v1694_v0 = vld [vmem:[#allocation5 + $0xca] sm:$0xff] }
 0x331   : > { %v2842_v15 = vld [vmem:[#allocation9 + $0x198] sm:$0xff] }
 0x332   : > { %2955 = vmatpush.msra.mxu3 %v2842_v15 }
 0x333   : > { %v1423_v59 = vpop.f32.mrf.mxu1  ;;  %4708 = vmatmul.msk.f32.gmra.mxu0 %vm1099_vm9, %v6135_v39 }
 0x334   : > { %4758 = vmatmul.msk.f32.gmra.mxu2 %vm1099_vm9, %v1688_v14  ;;  %4668 = vmatmul.msk.f32.gmra.mxu3 %vm1099_vm9, %v1692_v12  ;;  %v2122_v14 = vpop.f32.mrf.mxu0 }
 0x336   : > { %4726 = vmatmul.msk.f32.gmra.mxu1 %vm1099_vm9, %v6133_v42  ;;  %v1582_v42 = vadd.f32 %v6212_v48, %v6203_v36 }
 0x337   : > { %v1632_v11 = vpop.f32.mrf.mxu2  ;;  %v1674_v19 = vpop.f32.mrf.mxu3 }
 0x338   : > { %v6436_v55 = vadd.f32 %v1632_v11, %v1423_v59  ;;  %v6439_v7 = vadd.f32 %v1674_v19, %v6349_v54 }
 0x33b   : > { %v1426_v50 = vpop.f32.mrf.mxu1  ;;  %4709 = vmatmul.msk.f32.gmra.mxu0 %vm1099_vm9, %v6151_v24  ;;  %v3405_v24 = vld [vmem:[#allocation9 + $0x210] sm:$0xff] }
 0x33c   : > { %4759 = vmatmul.msk.f32.gmra.mxu2 %vm1099_vm9, %v1689_v49  ;;  %4669 = vmatmul.msk.f32.gmra.mxu3 %vm1099_vm9, %v1693_v47  ;;  %v2125_v59 = vpop.f32.mrf.mxu0 }
 0x33e   : > { %4727 = vmatmul.msk.f32.gmra.mxu1 %vm1099_vm9, %v6149_v22  ;;  %v1585_v22 = vadd.f32 %v6235_v30, %v6225_v53 }
 0x33f   : > { %v1635_v6 = vpop.f32.mrf.mxu2  ;;  %v1831_v54 = vpop.f32.mrf.mxu3 }
 0x340   : > { %v6449_v26 = vadd.f32 %v1635_v6, %v1426_v50  ;;  %v1927_v13 = vadd.f32 %v1831_v54, %v1582_v42  ;;  %v3124_v50 = vld [vmem:[#allocation9 + $0x1d8] sm:$0xff] }
 0x341   : > { %3237 = vmatpush.msra.mxu0 %v3124_v50 }
 0x342   : > { %v6451_v49 = vadd.f32 %v2113_v1, %v1927_v13 }
 0x343   : > { %v1429_v60 = vpop.f32.mrf.mxu1 }
 0x344   : > { %4760 = vmatmul.msk.f32.gmra.mxu2 %vm1099_vm9, %v1690_v32  ;;  %4670 = vmatmul.msk.f32.gmra.mxu3 %vm1099_vm9, %v1694_v0  ;;  %v1695_v32 = vld [vmem:[#allocation5 + $0xda] sm:$0xff]  ;;  %v2128_v42 = vpop.f32.mrf.mxu0 }
 0x346   : > { %4728 = vmatmul.msk.f32.gmra.mxu1 %vm1099_vm9, %v6165_v57  ;;  %v3406_v57 = vld [vmem:[#allocation9 + $0x218] sm:$0xff] }
 0x347   : > { %v1638_v36 = vpop.f32.mrf.mxu2  ;;  %v1834_v33 = vpop.f32.mrf.mxu3  ;;  %3519 = vmatpush.msra.mxu1 %v3406_v57  ;;  %v6510_v57 = vld [vmem:[#allocation5 + $0x10a] sm:$0xff] }
 0x348   : > { %v6461_v48 = vadd.f32 %v1638_v36, %v1429_v60  ;;  %v1928_v1 = vadd.f32 %v1834_v33, %v1585_v22 }
 0x349   : > { %3520 = vmatpush.msra.mxu1 %v3405_v24  ;;  %v7808_v24 = vld [vmem:[#allocation26_spill] sm:$0xff] }
 0x34a   : > { %v6463_v19 = vadd.f32 %v2116_v18, %v1928_v1 }
 0x34b   : > { %v1432_v11 = vpop.f32.mrf.mxu1 }
 0x34c   : > { %4761 = vmatmul.msk.f32.gmra.mxu2 %vm1099_vm9, %v1691_v62  ;;  %4671 = vmatmul.msk.f32.gmra.mxu3 %vm1099_vm9, %v1695_v32  ;;  %v1696_v62 = vld [vmem:[#allocation5 + $0xe2] sm:$0xff]  ;;  %v2131_v13 = vpop.f32.mrf.mxu0 }
 0x34e   : > { %4729 = vmatmul.msk.f32.gmra.mxu1 %vm1099_vm9, %v6178_v3 }
 0x34f   : > { %v1641_v53 = vpop.f32.mrf.mxu2  ;;  %v1837_v51 = vpop.f32.mrf.mxu3 }
 0x350   : > { %v6471_v30 = vadd.f32 %v1641_v53, %v1432_v11  ;;  %v1929_v18 = vadd.f32 %v1837_v51, %v6256_v52  ;;  %v3123_v53 = vld [vmem:[#allocation9 + $0x1d0] sm:$0xff] }
 0x351   : > { %3238 = vmatpush.msra.mxu0 %v3123_v53  ;;  %v2840_v53 = vld [vmem:[#allocation9 + $0x188] sm:$0xff] }
 0x352   : > { %v6474_v54 = vadd.f32 %v2119_v21, %v1929_v18  ;;  %v1697_v21 = vld [vmem:[#allocation5 + $0xf2] sm:$0xff] }
 0x353   : > { %v1435_v6 = vpop.f32.mrf.mxu1 }
 0x354   : > { %4762 = vmatmul.msk.f32.gmra.mxu2 %vm1099_vm9, %v1692_v12  ;;  %4672 = vmatmul.msk.f32.gmra.mxu3 %vm1099_vm9, %v1696_v62  ;;  %v2134_v12 = vpop.f32.mrf.mxu0 }
 0x356   : > { %4730 = vmatmul.msk.f32.gmra.mxu1 %vm1099_vm9, %v6191_v43 }
 0x357   : > { %v1644_v3 = vpop.f32.mrf.mxu2  ;;  %v1840_v60 = vpop.f32.mrf.mxu3 }
 0x358   : > { %v6482_v34 = vadd.f32 %v1644_v3, %v1435_v6  ;;  %v1930_v52 = vadd.f32 %v1840_v60, %v6271_v2  ;;  %v6527_v60 = vld [vmem:[#allocation5 + $0x112] sm:$0xff] }
 0x35a   : > { %v6485_v22 = vadd.f32 %v2122_v14, %v1930_v52  ;;  %v6496_v14 = vld [vmem:[#allocation5 + $0xfa] sm:$0xff] }
 0x35b   : > { %v1438_v15 = vpop.f32.mrf.mxu1 }
 0x35c   : > { %4763 = vmatmul.msk.f32.gmra.mxu2 %vm1099_vm9, %v1693_v47  ;;  %4673 = vmatmul.msk.f32.gmra.mxu3 %vm1099_vm9, %v1697_v21  ;;  %v2841_v47 = vld [vmem:[#allocation9 + $0x190] sm:$0xff]  ;;  %v2137_v11 = vpop.f32.mrf.mxu0 }
 0x35d   : > { %2956 = vmatpush.msra.mxu3 %v2841_v47 }
 0x35e   : > { %4731 = vmatmul.msk.f32.gmra.mxu1 %vm1099_vm9, %v6208_v45 }
 0x35f   : > { %v1647_v43 = vpop.f32.mrf.mxu2  ;;  %v1843_v36 = vpop.f32.mrf.mxu3  ;;  %2957 = vmatpush.msra.mxu3 %v2840_v53 }
 0x360   : > { %v6493_v37 = vadd.f32 %v1647_v43, %v1438_v15  ;;  %v1931_v2 = vadd.f32 %v1843_v36, %v6286_v8 }
 0x362   : > { %v6498_v1 = vadd.f32 %v2125_v59, %v1931_v2  ;;  %v6546_v2 = vld [vmem:[#allocation5 + $0x122] sm:$0xff] }
 0x363   : > { %v1441_v33 = vpop.f32.mrf.mxu1 }
 0x364   : > { %4764 = vmatmul.msk.f32.gmra.mxu2 %vm1099_vm9, %v1694_v0  ;;  %4674 = vmatmul.msk.f32.gmra.mxu3 %vm1099_vm9, %v6496_v14  ;;  %v2140_v51 = vpop.f32.mrf.mxu0 }
 0x366   : > { %4732 = vmatmul.msk.f32.gmra.mxu1 %vm1099_vm9, %v6227_v61  ;;  %v6515_v61 = vld [vmem:[#allocation5 + $0x140] sm:$0xff] }
 0x367   : > { %v1650_v39 = vpop.f32.mrf.mxu2  ;;  %v1846_v8 = vpop.f32.mrf.mxu3  ;;  %4710 = vmatmul.msk.f32.gmra.mxu0 %vm1099_vm9, %v6515_v61 }
 0x368   : > { %v6507_v45 = vadd.f32 %v1650_v39, %v1441_v33  ;;  %v1932_v59 = vadd.f32 %v1846_v8, %v6301_v25 }
 0x36a   : > { %v6512_v0 = vadd.f32 %v2128_v42, %v1932_v59  ;;  %v6565_v59 = vld [vmem:[#allocation5 + $0x12a] sm:$0xff] }
 0x36b   : > { %v2395_v50 = vpop.f32.mrf.mxu1 }
 0x36c   : > { %4765 = vmatmul.msk.f32.gmra.mxu2 %vm1099_vm9, %v1695_v32  ;;  %4675 = vmatmul.msk.f32.gmra.mxu3 %vm1099_vm9, %v6510_v57  ;;  %v2491_v25 = vadd.f32 %v2395_v50, %v6451_v49  ;;  %v6534_v49 = vld [vmem:[#allocation5 + $0x150] sm:$0xff] }
 0x36e   : > { %4733 = vmatmul.msk.f32.gmra.mxu1 %vm1099_vm9, %v6244_v16  ;;  %v6532_v16 = vpop.f32.mrf.mxu0 }
 0x36f   : > { %v2677_v18 = vpop.f32.mrf.mxu2  ;;  %v1849_v42 = vpop.f32.mrf.mxu3  ;;  %4711 = vmatmul.msk.f32.gmra.mxu0 %vm1099_vm9, %v6534_v49 }
 0x370   : > { %v6524_v32 = vadd.f32 %v2677_v18, %v2491_v25  ;;  %v1933_v6 = vadd.f32 %v1849_v42, %v6316_v40  ;;  %v7810_v18 = vld [vmem:[#allocation24_spill] sm:$0xff] }
 0x372   : > { %v6529_v52 = vadd.f32 %v2131_v13, %v1933_v6 }
 0x373   : > { %v2398_v3 = vpop.f32.mrf.mxu1 }
 0x374   : > { %4766 = vmatmul.msk.f32.gmra.mxu2 %vm1099_vm9, %v1696_v62  ;;  %4676 = vmatmul.msk.f32.gmra.mxu3 %vm1099_vm9, %v6527_v60  ;;  %v2492_v15 = vadd.f32 %v2398_v3, %v6463_v19 }
 0x376   : > { %4734 = vmatmul.msk.f32.gmra.mxu1 %vm1099_vm9, %v6260_v20  ;;  %v6551_v47 = vpop.f32.mrf.mxu0  ;;  %v6553_v20 = vld [vmem:[#allocation5 + $0x158] sm:$0xff] }
 0x377   : > { %v2680_v40 = vpop.f32.mrf.mxu2  ;;  %v1852_v13 = vpop.f32.mrf.mxu3  ;;  %4712 = vmatmul.msk.f32.gmra.mxu0 %vm1099_vm9, %v6553_v20 }
 0x378   : > { %v6543_v43 = vadd.f32 %v2680_v40, %v2492_v15  ;;  %v1934_v62 = vadd.f32 %v1852_v13, %v6331_v23  ;;  %v7811_v15 = vld [vmem:[#allocation25_spill] sm:$0xff] }
 0x37a   : > { %v6548_v33 = vadd.f32 %v2134_v12, %v1934_v62  ;;  %v6588_v62 = vld [vmem:[#allocation5 + $0x13a] sm:$0xff] }
 0x37b   : > { %v2401_v36 = vpop.f32.mrf.mxu1 }
 0x37c   : > { %4767 = vmatmul.msk.f32.gmra.mxu2 %vm1099_vm9, %v1697_v21  ;;  %4677 = vmatmul.msk.f32.gmra.mxu3 %vm1099_vm9, %v6546_v2  ;;  %v2493_v19 = vadd.f32 %v2401_v36, %v6474_v54  ;;  %v6573_v54 = vld [vmem:[#allocation5 + $0x168] sm:$0xff] }
 0x37e   : > { %4735 = vmatmul.msk.f32.gmra.mxu1 %vm1099_vm9, %v6275_v31  ;;  %v6571_v31 = vpop.f32.mrf.mxu0 }
 0x37f   : > { %v2683_v23 = vpop.f32.mrf.mxu2  ;;  %v1855_v12 = vpop.f32.mrf.mxu3  ;;  %4713 = vmatmul.msk.f32.gmra.mxu0 %vm1099_vm9, %v6573_v54 }
 0x380   : > { %v6562_v39 = vadd.f32 %v2683_v23, %v2493_v19  ;;  %v1935_v21 = vadd.f32 %v1855_v12, %v6341_v44  ;;  %v6596_v12 = vld [vmem:[#allocation5 + $0x170] sm:$0xff] }
 0x382   : > { %v6567_v50 = vadd.f32 %v2137_v11, %v1935_v21  ;;  %v7809_v11 = vld [vmem:[#allocation22_spill] sm:$0xff] }
 0x383   : > { %v2404_v8 = vpop.f32.mrf.mxu1  ;;  %v3404_v21 = vld [vmem:[#allocation9 + $0x208] sm:$0xff] }
 0x384   : > { %4768 = vmatmul.msk.f32.gmra.mxu2 %vm1099_vm9, %v6496_v14  ;;  %4678 = vmatmul.msk.f32.gmra.mxu3 %vm1099_vm9, %v6565_v59  ;;  %v2494_v44 = vadd.f32 %v2404_v8, %v6485_v22  ;;  %v1030_v14 = vmul.f32 %v7810_v18, %v7809_v11  ;;  %v3122_v22 = vld [vmem:[#allocation9 + $0x1c8] sm:$0xff] }
 0x385   : > { %3239 = vmatpush.msra.mxu0 %v3122_v22  ;;  %3521 = vmatpush.msra.mxu1 %v3404_v21  ;;  %v6636_v21 = vld [vmem:[#allocation5 + $0x121] sm:$0xff] }
 0x386   : > { %4736 = vmatmul.msk.f32.gmra.mxu1 %vm1099_vm9, %v7808_v24  ;;  %v1065_v40 = vadd.f32 %v7811_v15, %v1030_v14  ;;  %v6594_v23 = vpop.f32.mrf.mxu0 }
 0x387   : > { %v2686_v25 = vpop.f32.mrf.mxu2  ;;  %v1858_v42 = vpop.f32.mrf.mxu3  ;;  %4714 = vmatmul.msk.f32.gmra.mxu0 %vm1099_vm9, %v6596_v12 }
 0x388   : > { %v6584_v6 = vadd.f32 %v2686_v25, %v2494_v44  ;;  %v1936_v3 = vadd.f32 %v1858_v42, %v6351_v17  ;;  %v1097_v19 = vmax.f32 %v1065_v40, 0.0  ;;  %v7812_v17 = vld [vmem:[#allocation27_spill] sm:$0xff] }
 0x389   : > { %v6612_v42 = vld [vmem:[#allocation5 + $0x142] sm:$0xff] }
 0x38a   : > { %v6590_v36 = vadd.f32 %v2140_v51, %v1936_v3  ;;  %1176 = vst.msk [vmem:[#allocation5 + $0x181] sm:$0xff] %vm1099_vm9, %v1097_v19 }
 0x38b   : > { %v2407_v13 = vpop.f32.mrf.mxu1  ;;  %7814 = vst [vmem:[#allocation26_spill] sm:$0xff] %v6612_v42 }
 0x38c   : > { %4769 = vmatmul.msk.f32.gmra.mxu2 %vm1099_vm9, %v6510_v57  ;;  %4679 = vmatmul.msk.f32.gmra.mxu3 %vm1099_vm9, %v6588_v62  ;;  %v2495_v51 = vadd.f32 %v2407_v13, %v6498_v1  ;;  %v7813_v57 = vld [vmem:[#allocation23_spill] sm:$0xff] }
 0x38d   : > { %v1031_v53 = vmul.f32 %v7810_v18, %v7813_v57 }
 0x38e   : > { %4737 = vmatmul.msk.f32.gmra.mxu1 %vm1099_vm9, %v7812_v17  ;;  %v6619_v40 = vpop.f32.mrf.mxu0  ;;  %v6634_v17 = vld [vmem:[#allocation5 + $0x152] sm:$0xff] }
 0x38f   : > { %v2689_v8 = vpop.f32.mrf.mxu2  ;;  %v1861_v24 = vpop.f32.mrf.mxu3  ;;  %v1066_v11 = vadd.f32 %v7811_v15, %v1031_v53  ;;  %7816 = vst [vmem:[#allocation22_spill] sm:$0xff] %v6634_v17 }
 0x390   : > { %v6608_v44 = vadd.f32 %v2689_v8, %v2495_v51  ;;  %v1937_v25 = vadd.f32 %v1861_v24, %v6359_v10  ;;  %v7815_v10 = vld [vmem:[#allocation28_spill] sm:$0xff]  ;;  %v2839_v8 = vld [vmem:[#allocation9 + $0x180] sm:$0xff] }
 0x391   : > { %v1098_v3 = vmax.f32 %v1066_v11, 0.0  ;;  %v6621_v18 = vld [vmem:[#allocation5 + $0x180] sm:$0xff]  ;;  %2958 = vmatpush.msra.mxu3 %v2839_v8 }
 0x392   : > { %v6615_v1 = vadd.f32 %v6532_v16, %v1937_v25  ;;  %4715 = vmatmul.msk.f32.gmra.mxu0 %vm1099_vm9, %v6621_v18  ;;  %v6657_v11 = vld [vmem:[#allocation5 + $0x15a] sm:$0xff] }
 0x393   : > { %v2410_v14 = vpop.f32.mrf.mxu1  ;;  %1177 = vst.msk [vmem:[#allocation5 + $0x189] sm:$0xff] %vm1099_vm9, %v1098_v3  ;;  %v6677_v8 = vld [vmem:[#allocation5 + $0x139] sm:$0xff] }
 0x394   : > { %4770 = vmatmul.msk.f32.gmra.mxu2 %vm1099_vm9, %v6527_v60  ;;  %4680 = vmatmul.msk.f32.gmra.mxu3 %vm1099_vm9, %v6612_v42  ;;  %v2496_v15 = vadd.f32 %v2410_v14, %v6512_v0  ;;  %7818 = vst [vmem:[#allocation25_spill] sm:$0xff] %v6657_v11  ;;  %v6659_v14 = vld [vmem:[#allocation5 + $0x129] sm:$0xff] }
 0x396   : > { %4738 = vmatmul.msk.f32.gmra.mxu1 %vm1099_vm9, %v7815_v10  ;;  %v6643_v0 = vpop.f32.mrf.mxu0  ;;  %v3121_v10 = vld [vmem:[#allocation9 + $0x1c0] sm:$0xff] }
 0x397   : > { %v2692_v16 = vpop.f32.mrf.mxu2  ;;  %v1864_v13 = vpop.f32.mrf.mxu3  ;;  %3240 = vmatpush.msra.mxu0 %v3121_v10 }
 0x398   : > { %v6631_v60 = vadd.f32 %v2692_v16, %v2496_v15  ;;  %v1938_v22 = vadd.f32 %v1864_v13, %v6370_v28  ;;  %v3088_v15 = vld [vmem:[#allocation5 + $0x31] sm:$0xff] }
 0x39a   : > { %v6639_v51 = vadd.f32 %v6551_v47, %v1938_v22  ;;  %v6645_v57 = vld [vmem:[#allocation5 + $0x188] sm:$0xff] }
 0x39b   : > { %v2413_v19 = vpop.f32.mrf.mxu1  ;;  %7817 = vst [vmem:[#allocation24_spill] sm:$0xff] %v6645_v57  ;;  %4716 = vmatmul.msk.f32.gmra.mxu0 %vm1099_vm9, %v6645_v57  ;;  %v3097_v57 = vld [vmem:[#allocation5 + $0x99] sm:$0xff] }
 0x39c   : > { %4771 = vmatmul.msk.f32.gmra.mxu2 %vm1099_vm9, %v6546_v2  ;;  %4681 = vmatmul.msk.f32.gmra.mxu3 %vm1099_vm9, %v6634_v17  ;;  %v2497_v28 = vadd.f32 %v2413_v19, %v6529_v52  ;;  %v6675_v19 = vld [vmem:[#allocation5 + $0x16a] sm:$0xff] }
 0x39d   : > { %7819 = vst [vmem:[#allocation27_spill] sm:$0xff] %v6675_v19 }
 0x39e   : > { %4739 = vmatmul.msk.f32.gmra.mxu1 %vm1099_vm9, %v6636_v21  ;;  %v2161_v52 = vpop.f32.mrf.mxu0 }
 0x39f   : > { %v2695_v53 = vpop.f32.mrf.mxu2  ;;  %v1867_v47 = vpop.f32.mrf.mxu3 }
 0x3a0   : > { %v6654_v24 = vadd.f32 %v2695_v53, %v2497_v28  ;;  %v1939_v2 = vadd.f32 %v1867_v47, %v6381_v46  ;;  %v3089_v53 = vld [vmem:[#allocation5 + $0x39] sm:$0xff] }
 0x3a2   : > { %v6662_v3 = vadd.f32 %v6571_v31, %v1939_v2 }
 0x3a3   : > { %v2416_v25 = vpop.f32.mrf.mxu1  ;;  %4813 = vmatmul.msk.f32.vlgmr.msra.gmra.mxu0 %vm1099_vm9, %v3088_v15  ;;  %v6693_v15 = vld [vmem:[#allocation5 + $0x172] sm:$0xff] }
 0x3a4   : > { %4772 = vmatmul.msk.f32.gmra.mxu2 %vm1099_vm9, %v6565_v59  ;;  %4682 = vmatmul.msk.f32.gmra.mxu3 %vm1099_vm9, %v6657_v11  ;;  %v2498_v46 = vadd.f32 %v2416_v25, %v6548_v33  ;;  %7820 = vst [vmem:[#allocation23_spill] sm:$0xff] %v6693_v15 }
 0x3a6   : > { %4740 = vmatmul.msk.f32.gmra.mxu1 %vm1099_vm9, %v6659_v14  ;;  %v2164_v33 = vpop.f32.mrf.mxu0 }
 0x3a7   : > { %v2698_v16 = vpop.f32.mrf.mxu2  ;;  %v1870_v31 = vpop.f32.mrf.mxu3 }
 0x3a8   : > { %v6672_v13 = vadd.f32 %v2698_v16, %v2498_v46  ;;  %v1940_v22 = vadd.f32 %v1870_v31, %v6392_v29  ;;  %v3403_v29 = vld [vmem:[#allocation9 + $0x200] sm:$0xff]  ;;  %v6695_v46 = vld [vmem:[#allocation5 + $0x141] sm:$0xff] }
 0x3a9   : > { %3522 = vmatpush.msra.mxu1 %v3403_v29  ;;  %v3090_v31 = vld [vmem:[#allocation5 + $0x49] sm:$0xff] }
 0x3aa   : > { %v6680_v28 = vadd.f32 %v6594_v23, %v1940_v22 }
 0x3ab   : > { %v2419_v59 = vpop.f32.mrf.mxu1  ;;  %4814 = vmatmul.msk.f32.gmra.mxu0 %vm1099_vm9, %v3089_v53 }
 0x3ac   : > { %4773 = vmatmul.msk.f32.gmra.mxu2 %vm1099_vm9, %v6588_v62  ;;  %4683 = vmatmul.msk.f32.gmra.mxu3 %vm1099_vm9, %v6675_v19  ;;  %v2499_v47 = vadd.f32 %v2419_v59, %v6567_v50 }
 0x3ae   : > { %4741 = vmatmul.msk.f32.gmra.mxu1 %vm1099_vm9, %v6677_v8  ;;  %v2167_v50 = vpop.f32.mrf.mxu0 }
 0x3af   : > { %v2701_v2 = vpop.f32.mrf.mxu2  ;;  %v1873_v23 = vpop.f32.mrf.mxu3 }
 0x3b0   : > { %v6690_v25 = vadd.f32 %v2701_v2, %v2499_v47  ;;  %v1941_v62 = vadd.f32 %v1873_v23, %v6403_v9  ;;  %v6711_v47 = vld [vmem:[#allocation5 + $0x151] sm:$0xff] }
 0x3b1   : > { %v2806_v2 = vld [vmem:[#allocation5 + $0x30] sm:$0xff] }
 0x3b2   : > { %v6698_v16 = vadd.f32 %v6619_v40, %v1941_v62 }
 0x3b3   : > { %v2422_v10 = vpop.f32.mrf.mxu1  ;;  %4815 = vmatmul.msk.f32.gmra.mxu0 %vm1099_vm9, %v3090_v31 }
 0x3b4   : > { %4774 = vmatmul.msk.f32.gmra.mxu2 %vm1099_vm9, %v6612_v42  ;;  %4684 = vmatmul.msk.f32.gmra.mxu3 %vm1099_vm9, %v6693_v15  ;;  %v2500_v9 = vadd.f32 %v2422_v10, %v6590_v36  ;;  %v3091_v36 = vld [vmem:[#allocation5 + $0x51] sm:$0xff]  ;;  %v3092_v42 = vld [vmem:[#allocation5 + $0x61] sm:$0xff] }
 0x3b6   : > { %4742 = vmatmul.msk.f32.gmra.mxu1 %vm1099_vm9, %v6695_v46  ;;  %v2170_v62 = vpop.f32.mrf.mxu0 }
 0x3b7   : > { %v2704_v22 = vpop.f32.mrf.mxu2  ;;  %v1876_v59 = vpop.f32.mrf.mxu3 }
 0x3b8   : > { %v6708_v53 = vadd.f32 %v2704_v22, %v2500_v9  ;;  %v1942_v40 = vadd.f32 %v1876_v59, %v6414_v56  ;;  %v6726_v59 = vld [vmem:[#allocation5 + $0x159] sm:$0xff] }
 0x3ba   : > { %v6714_v23 = vadd.f32 %v6643_v0, %v1942_v40  ;;  %v2807_v40 = vld [vmem:[#allocation5 + $0x38] sm:$0xff] }
 0x3bb   : > { %v2425_v29 = vpop.f32.mrf.mxu1  ;;  %4816 = vmatmul.msk.f32.gmra.mxu0 %vm1099_vm9, %v3091_v36 }
 0x3bc   : > { %4775 = vmatmul.msk.f32.gmra.mxu2 %vm1099_vm9, %v6634_v17  ;;  %4781 = vmatmul.msk.f32.vlgmr.msra.gmra.mxu3 %vm1099_vm9, %v2806_v2  ;;  %v2501_v10 = vadd.f32 %v2425_v29, %v6615_v1 }
 0x3be   : > { %4743 = vmatmul.msk.f32.gmra.mxu1 %vm1099_vm9, %v6711_v47  ;;  %v2173_v2 = vpop.f32.mrf.mxu0 }
 0x3bf   : > { %v2707_v56 = vpop.f32.mrf.mxu2  ;;  %v1879_v31 = vpop.f32.mrf.mxu3 }
 0x3c0   : > { %v6723_v9 = vadd.f32 %v2707_v56, %v2501_v10  ;;  %v1943_v0 = vadd.f32 %v1879_v31, %v6425_v63  ;;  %v6740_v56 = vld [vmem:[#allocation5 + $0x169] sm:$0xff] }
 0x3c1   : > { %v2808_v31 = vld [vmem:[#allocation5 + $0x48] sm:$0xff] }
 0x3c2   : > { %v6728_v17 = vadd.f32 %v2161_v52, %v1943_v0 }
 0x3c3   : > { %v2428_v22 = vpop.f32.mrf.mxu1  ;;  %4817 = vmatmul.msk.f32.gmra.mxu0 %vm1099_vm9, %v3092_v42 }
 0x3c4   : > { %4776 = vmatmul.msk.f32.gmra.mxu2 %vm1099_vm9, %v6657_v11  ;;  %4782 = vmatmul.msk.f32.gmra.mxu3 %vm1099_vm9, %v2807_v40  ;;  %v2502_v1 = vadd.f32 %v2428_v22, %v6639_v51  ;;  %v3093_v11 = vld [vmem:[#allocation5 + $0x69] sm:$0xff] }
 0x3c6   : > { %4744 = vmatmul.msk.f32.gmra.mxu1 %vm1099_vm9, %v6726_v59  ;;  %v2176_v40 = vpop.f32.mrf.mxu0 }
 0x3c7   : > { %v2710_v29 = vpop.f32.mrf.mxu2  ;;  %v1882_v63 = vpop.f32.mrf.mxu3 }
 0x3c8   : > { %v6737_v36 = vadd.f32 %v2710_v29, %v2502_v1  ;;  %v1944_v52 = vadd.f32 %v1882_v63, %v6436_v55  ;;  %v6754_v29 = vld [vmem:[#allocation5 + $0x171] sm:$0xff] }
 0x3c9   : > { %v2809_v63 = vld [vmem:[#allocation5 + $0x50] sm:$0xff] }
 0x3ca   : > { %v6742_v0 = vadd.f32 %v2164_v33, %v1944_v52 }
 0x3cb   : > { %v2431_v10 = vpop.f32.mrf.mxu1  ;;  %4818 = vmatmul.msk.f32.gmra.mxu0 %vm1099_vm9, %v3093_v11 }
 0x3cc   : > { %4777 = vmatmul.msk.f32.gmra.mxu2 %vm1099_vm9, %v6675_v19  ;;  %4783 = vmatmul.msk.f32.gmra.mxu3 %vm1099_vm9, %v2808_v31  ;;  %v2503_v42 = vadd.f32 %v2431_v10, %v6662_v3  ;;  %v3094_v19 = vld [vmem:[#allocation5 + $0x79] sm:$0xff] }
 0x3ce   : > { %4745 = vmatmul.msk.f32.gmra.mxu1 %vm1099_vm9, %v6740_v56  ;;  %v2179_v31 = vpop.f32.mrf.mxu0 }
 0x3cf   : > { %v2713_v51 = vpop.f32.mrf.mxu2  ;;  %v1885_v55 = vpop.f32.mrf.mxu3 }
 0x3d0   : > { %v6751_v22 = vadd.f32 %v2713_v51, %v2503_v42  ;;  %v1945_v33 = vadd.f32 %v1885_v55, %v6449_v26  ;;  %v6768_v42 = vld [vmem:[#allocation5 + $0x182] sm:$0xff] }
 0x3d1   : > { %7822 = vst [vmem:[#allocation29_spill] sm:$0xff] %v6768_v42  ;;  %v6770_v55 = vld [vmem:[#allocation5 + $0x181] sm:$0xff] }
 0x3d2   : > { %v6756_v52 = vadd.f32 %v2167_v50, %v1945_v33  ;;  %v2810_v33 = vld [vmem:[#allocation5 + $0x60] sm:$0xff] }
 0x3d3   : > { %v2434_v1 = vpop.f32.mrf.mxu1  ;;  %4819 = vmatmul.msk.f32.gmra.mxu0 %vm1099_vm9, %v3094_v19 }
 0x3d4   : > { %4778 = vmatmul.msk.f32.gmra.mxu2 %vm1099_vm9, %v6693_v15  ;;  %4784 = vmatmul.msk.f32.gmra.mxu3 %vm1099_vm9, %v2809_v63  ;;  %v2504_v11 = vadd.f32 %v2434_v1, %v6680_v28  ;;  %v3095_v1 = vld [vmem:[#allocation5 + $0x81] sm:$0xff] }
 0x3d6   : > { %4746 = vmatmul.msk.f32.gmra.mxu1 %vm1099_vm9, %v6754_v29  ;;  %v2182_v28 = vpop.f32.mrf.mxu0 }
 0x3d7   : > { %v2716_v3 = vpop.f32.mrf.mxu2  ;;  %v1888_v26 = vpop.f32.mrf.mxu3 }
 0x3d8   : > { %v6765_v10 = vadd.f32 %v2716_v3, %v2504_v11  ;;  %v1946_v50 = vadd.f32 %v1888_v26, %v6461_v48  ;;  %v6784_v3 = vld [vmem:[#allocation5 + $0x18a] sm:$0xff] }
 0x3d9   : > { %7824 = vst [vmem:[#allocation31_spill] sm:$0xff] %v6784_v3 }
 0x3da   : > { %7821 = vst [vmem:[#allocation28_spill] sm:$0xff] %v6765_v10  ;;  %v6772_v15 = vadd.f32 %v2170_v62, %v1946_v50  ;;  %v6786_v50 = vld [vmem:[#allocation5 + $0x189] sm:$0xff] }
 0x3db   : > { %v2437_v51 = vpop.f32.mrf.mxu1  ;;  %4820 = vmatmul.msk.f32.gmra.mxu0 %vm1099_vm9, %v3095_v1 }
 0x3dc   : > { %4779 = vmatmul.msk.f32.gmra.mxu2 %vm1099_vm9, %v6768_v42  ;;  %4785 = vmatmul.msk.f32.gmra.mxu3 %vm1099_vm9, %v2810_v33  ;;  %v2505_v48 = vadd.f32 %v2437_v51, %v6698_v16  ;;  %v2811_v42 = vld [vmem:[#allocation5 + $0x68] sm:$0xff]  ;;  %v3096_v51 = vld [vmem:[#allocation5 + $0x91] sm:$0xff] }
 0x3de   : > { %4747 = vmatmul.msk.f32.gmra.mxu1 %vm1099_vm9, %v6770_v55  ;;  %v2185_v16 = vpop.f32.mrf.mxu0 }
 0x3df   : > { %v2719_v19 = vpop.f32.mrf.mxu2  ;;  %v1891_v63 = vpop.f32.mrf.mxu3 }
 0x3e0   : > { %v6781_v11 = vadd.f32 %v2719_v19, %v2505_v48  ;;  %v1947_v62 = vadd.f32 %v1891_v63, %v6471_v30  ;;  %v2812_v63 = vld [vmem:[#allocation5 + $0x78] sm:$0xff] }
 0x3e2   : > { %7823 = vst [vmem:[#allocation30_spill] sm:$0xff] %v6781_v11  ;;  %v6788_v10 = vadd.f32 %v2173_v2, %v1947_v62  ;;  %v3370_v62 = vld [vmem:[#allocation5 + $0x32] sm:$0xff] }
 0x3e3   : > { %v2440_v26 = vpop.f32.mrf.mxu1  ;;  %4821 = vmatmul.msk.f32.gmra.mxu0 %vm1099_vm9, %v3096_v51 }
 0x3e4   : > { %4780 = vmatmul.msk.f32.gmra.mxu2 %vm1099_vm9, %v6784_v3  ;;  %4786 = vmatmul.msk.f32.gmra.mxu3 %vm1099_vm9, %v2811_v42  ;;  %v2506_v30 = vadd.f32 %v2440_v26, %v6714_v23 }
 0x3e6   : > { %4748 = vmatmul.msk.f32.gmra.mxu1 %vm1099_vm9, %v6786_v50  ;;  %v2188_v11 = vpop.f32.mrf.mxu0 }
 0x3e7   : > { %v2722_v33 = vpop.f32.mrf.mxu2  ;;  %v1894_v1 = vpop.f32.mrf.mxu3 }
 0x3e8   : > { %v6797_v48 = vadd.f32 %v2722_v33, %v2506_v30  ;;  %v1948_v2 = vadd.f32 %v1894_v1, %v6482_v34  ;;  %v2813_v33 = vld [vmem:[#allocation5 + $0x80] sm:$0xff] }
 0x3ea   : > { %7825 = vst [vmem:[#allocation32_spill] sm:$0xff] %v6797_v48  ;;  %v6800_v3 = vadd.f32 %v2176_v40, %v1948_v2  ;;  %v3371_v40 = vld [vmem:[#allocation5 + $0x3a] sm:$0xff]  ;;  %v3098_v48 = vld [vmem:[#allocation5 + $0xa9] sm:$0xff] }
 0x3eb   : > { %v2443_v19 = vpop.f32.mrf.mxu1  ;;  %4822 = vmatmul.msk.f32.gmra.mxu0 %vm1099_vm9, %v3097_v57 }
 0x3ec   : > { %4787 = vmatmul.msk.f32.gmra.mxu3 %vm1099_vm9, %v2812_v63  ;;  %v2507_v23 = vadd.f32 %v2443_v19, %v6728_v17 }
 0x3ee   : > { %4845 = vmatmul.msk.f32.vlgmr.msra.gmra.mxu1 %vm1099_vm9, %v3370_v62  ;;  %v2191_v2 = vpop.f32.mrf.mxu0 }
 0x3ef   : > { %v2725_v42 = vpop.f32.mrf.mxu2  ;;  %v1897_v26 = vpop.f32.mrf.mxu3 }
 0x3f0   : > { %v6806_v51 = vadd.f32 %v2725_v42, %v2507_v23  ;;  %v1949_v34 = vadd.f32 %v1897_v26, %v6493_v37  ;;  %v2814_v23 = vld [vmem:[#allocation5 + $0x90] sm:$0xff] }
 0x3f2   : > { %v6809_v1 = vadd.f32 %v2179_v31, %v1949_v34  ;;  %v3372_v31 = vld [vmem:[#allocation5 + $0x4a] sm:$0xff] }
 0x3f3   : > { %v2446_v30 = vpop.f32.mrf.mxu1  ;;  %4823 = vmatmul.msk.f32.gmra.mxu0 %vm1099_vm9, %v3098_v48  ;;  %v3099_v34 = vld [vmem:[#allocation5 + $0xb1] sm:$0xff] }
 0x3f4   : > { %4788 = vmatmul.msk.f32.gmra.mxu3 %vm1099_vm9, %v2813_v33  ;;  %v2508_v17 = vadd.f32 %v2446_v30, %v6742_v0 }
 0x3f6   : > { %4846 = vmatmul.msk.f32.gmra.mxu1 %vm1099_vm9, %v3371_v40  ;;  %v2194_v26 = vpop.f32.mrf.mxu0 }
 0x3f7   : > { %v2728_v19 = vpop.f32.mrf.mxu2  ;;  %v1900_v57 = vpop.f32.mrf.mxu3 }
 0x3f8   : > { %v6815_v63 = vadd.f32 %v2728_v19, %v2508_v17  ;;  %v1950_v37 = vadd.f32 %v1900_v57, %v6507_v45  ;;  %v2815_v17 = vld [vmem:[#allocation5 + $0x98] sm:$0xff] }
 0x3fa   : > { %v6818_v42 = vadd.f32 %v2182_v28, %v1950_v37  ;;  %v3373_v28 = vld [vmem:[#allocation5 + $0x52] sm:$0xff]  ;;  %v3100_v37 = vld [vmem:[#allocation5 + $0xc1] sm:$0xff] }
 0x3fb   : > { %v2449_v62 = vpop.f32.mrf.mxu1  ;;  %4824 = vmatmul.msk.f32.gmra.mxu0 %vm1099_vm9, %v3099_v34 }
 0x3fc   : > { %4789 = vmatmul.msk.f32.gmra.mxu3 %vm1099_vm9, %v2814_v23  ;;  %v2509_v0 = vadd.f32 %v2449_v62, %v6756_v52 }
 0x3fe   : > { %4847 = vmatmul.msk.f32.gmra.mxu1 %vm1099_vm9, %v3372_v31  ;;  %v2197_v57 = vpop.f32.mrf.mxu0 }
 0x3ff   : > { %v2731_v30 = vpop.f32.mrf.mxu2  ;;  %v1903_v48 = vpop.f32.mrf.mxu3 }
 0x400   : > { %v6824_v33 = vadd.f32 %v2731_v30, %v2509_v0  ;;  %v1951_v45 = vadd.f32 %v1903_v48, %v6362_v38  ;;  %v2816_v0 = vld [vmem:[#allocation5 + $0xa8] sm:$0xff] }
 0x402   : > { %v6827_v19 = vadd.f32 %v2185_v16, %v1951_v45  ;;  %v3374_v16 = vld [vmem:[#allocation5 + $0x62] sm:$0xff] }
 0x403   : > { %v2452_v40 = vpop.f32.mrf.mxu1  ;;  %4825 = vmatmul.msk.f32.gmra.mxu0 %vm1099_vm9, %v3100_v37  ;;  %v3101_v45 = vld [vmem:[#allocation5 + $0xc9] sm:$0xff] }
 0x404   : > { %4790 = vmatmul.msk.f32.gmra.mxu3 %vm1099_vm9, %v2815_v17  ;;  %v2510_v52 = vadd.f32 %v2452_v40, %v6772_v15 }
 0x406   : > { %4848 = vmatmul.msk.f32.gmra.mxu1 %vm1099_vm9, %v3373_v28  ;;  %v2200_v48 = vpop.f32.mrf.mxu0 }
 0x407   : > { %v2734_v62 = vpop.f32.mrf.mxu2  ;;  %v1906_v23 = vpop.f32.mrf.mxu3 }
 0x408   : > { %v6833_v31 = vadd.f32 %v2734_v62, %v2510_v52  ;;  %v1952_v38 = vadd.f32 %v1906_v23, %v6373_v4  ;;  %v2817_v52 = vld [vmem:[#allocation5 + $0xb0] sm:$0xff] }
 0x40a   : > { %v6836_v30 = vadd.f32 %v2188_v11, %v1952_v38  ;;  %v3375_v11 = vld [vmem:[#allocation5 + $0x6a] sm:$0xff]  ;;  %v3102_v38 = vld [vmem:[#allocation5 + $0xd9] sm:$0xff] }
 0x40b   : > { %v2455_v34 = vpop.f32.mrf.mxu1  ;;  %4826 = vmatmul.msk.f32.gmra.mxu0 %vm1099_vm9, %v3101_v45 }
 0x40c   : > { %4791 = vmatmul.msk.f32.gmra.mxu3 %vm1099_vm9, %v2816_v0  ;;  %v2511_v15 = vadd.f32 %v2455_v34, %v6788_v10 }
 0x40e   : > { %4849 = vmatmul.msk.f32.gmra.mxu1 %vm1099_vm9, %v3374_v16 }
 0x40f   : > { %v2737_v40 = vpop.f32.mrf.mxu2  ;;  %v1909_v17 = vpop.f32.mrf.mxu3 }
 0x410   : > { %v6842_v28 = vadd.f32 %v2737_v40, %v2511_v15  ;;  %v1953_v4 = vadd.f32 %v1909_v17, %v6384_v27  ;;  %v2203_v23 = vpop.f32.mrf.mxu0  ;;  %v2818_v15 = vld [vmem:[#allocation5 + $0xc0] sm:$0xff] }
 0x412   : > { %v6845_v62 = vadd.f32 %v2191_v2, %v1953_v4  ;;  %v3376_v2 = vld [vmem:[#allocation5 + $0x7a] sm:$0xff] }
 0x413   : > { %v2458_v37 = vpop.f32.mrf.mxu1  ;;  %4827 = vmatmul.msk.f32.gmra.mxu0 %vm1099_vm9, %v3102_v38  ;;  %v3103_v4 = vld [vmem:[#allocation5 + $0xe1] sm:$0xff] }
 0x414   : > { %4792 = vmatmul.msk.f32.gmra.mxu3 %vm1099_vm9, %v2817_v52  ;;  %v2512_v10 = vadd.f32 %v2458_v37, %v6800_v3 }
 0x416   : > { %4850 = vmatmul.msk.f32.gmra.mxu1 %vm1099_vm9, %v3375_v11 }
 0x417   : > { %v2740_v34 = vpop.f32.mrf.mxu2  ;;  %v1912_v0 = vpop.f32.mrf.mxu3 }
 0x418   : > { %v6851_v16 = vadd.f32 %v2740_v34, %v2512_v10  ;;  %v1954_v27 = vadd.f32 %v1912_v0, %v6395_v35  ;;  %v2206_v17 = vpop.f32.mrf.mxu0  ;;  %v2819_v10 = vld [vmem:[#allocation5 + $0xc8] sm:$0xff] }
 0x41a   : > { %v6854_v40 = vadd.f32 %v2194_v26, %v1954_v27  ;;  %v3377_v26 = vld [vmem:[#allocation5 + $0x82] sm:$0xff]  ;;  %v3104_v27 = vld [vmem:[#allocation5 + $0xf1] sm:$0xff] }
 0x41b   : > { %v2461_v45 = vpop.f32.mrf.mxu1  ;;  %4828 = vmatmul.msk.f32.gmra.mxu0 %vm1099_vm9, %v3103_v4 }
 0x41c   : > { %4793 = vmatmul.msk.f32.gmra.mxu3 %vm1099_vm9, %v2818_v15  ;;  %v2513_v3 = vadd.f32 %v2461_v45, %v6809_v1 }
 0x41e   : > { %4851 = vmatmul.msk.f32.gmra.mxu1 %vm1099_vm9, %v3376_v2 }
 0x41f   : > { %v2743_v37 = vpop.f32.mrf.mxu2  ;;  %v1915_v52 = vpop.f32.mrf.mxu3 }
 0x420   : > { %v6860_v11 = vadd.f32 %v2743_v37, %v2513_v3  ;;  %v1955_v35 = vadd.f32 %v1915_v52, %v6406_v5  ;;  %v3242_v0 = vpop.f32.mrf.mxu0  ;;  %v3378_v3 = vld [vmem:[#allocation5 + $0x92] sm:$0xff] }
 0x422   : > { %v6863_v34 = vadd.f32 %v2197_v57, %v1955_v35  ;;  %v2820_v57 = vld [vmem:[#allocation5 + $0xd8] sm:$0xff] }
 0x423   : > { %v2464_v38 = vpop.f32.mrf.mxu1  ;;  %4829 = vmatmul.msk.f32.gmra.mxu0 %vm1099_vm9, %v3104_v27  ;;  %v3105_v35 = vld [vmem:[#allocation5 + $0xf9] sm:$0xff] }
 0x424   : > { %4794 = vmatmul.msk.f32.gmra.mxu3 %vm1099_vm9, %v2819_v10  ;;  %v2514_v1 = vadd.f32 %v2464_v38, %v6818_v42 }
 0x426   : > { %4852 = vmatmul.msk.f32.gmra.mxu1 %vm1099_vm9, %v3377_v26  ;;  %v3379_v26 = vld [vmem:[#allocation5 + $0x9a] sm:$0xff] }
 0x427   : > { %v2746_v45 = vpop.f32.mrf.mxu2  ;;  %v1918_v15 = vpop.f32.mrf.mxu3 }
 0x428   : > { %v6869_v2 = vadd.f32 %v2746_v45, %v2514_v1  ;;  %v1956_v5 = vadd.f32 %v1918_v15, %v6417_v58  ;;  %v3245_v52 = vpop.f32.mrf.mxu0  ;;  %v2821_v58 = vld [vmem:[#allocation5 + $0xe0] sm:$0xff] }
 0x42a   : > { %v6874_v37 = vadd.f32 %v2200_v48, %v1956_v5  ;;  %v3106_v48 = vld [vmem:[#allocation5 + $0x109] sm:$0xff] }
 0x42b   : > { %v6872_v4 = vpop.f32.mrf.mxu1  ;;  %4830 = vmatmul.msk.f32.gmra.mxu0 %vm1099_vm9, %v3105_v35 }
 0x42c   : > { %4795 = vmatmul.msk.f32.gmra.mxu3 %vm1099_vm9, %v2820_v57  ;;  %v3380_v57 = vld [vmem:[#allocation5 + $0xaa] sm:$0xff] }
 0x42e   : > { %4853 = vmatmul.msk.f32.gmra.mxu1 %vm1099_vm9, %v3378_v3 }
 0x42f   : > { %v1921_v42 = vpop.f32.mrf.mxu3 }
 0x430   : > { %v1957_v38 = vadd.f32 %v1921_v42, %v6428_v41  ;;  %v3248_v1 = vpop.f32.mrf.mxu0  ;;  %v2822_v41 = vld [vmem:[#allocation5 + $0xf0] sm:$0xff] }
 0x432   : > { %v6882_v27 = vadd.f32 %v2203_v23, %v1957_v38  ;;  %v3107_v23 = vld [vmem:[#allocation5 + $0x111] sm:$0xff] }
 0x433   : > { %v6880_v10 = vpop.f32.mrf.mxu1  ;;  %4831 = vmatmul.msk.f32.gmra.mxu0 %vm1099_vm9, %v3106_v48 }
 0x434   : > { %4796 = vmatmul.msk.f32.gmra.mxu3 %vm1099_vm9, %v2821_v58 }
 0x436   : > { %4854 = vmatmul.msk.f32.gmra.mxu1 %vm1099_vm9, %v3379_v26  ;;  %v3381_v26 = vld [vmem:[#allocation5 + $0xb2] sm:$0xff] }
 0x437   : > { %v1924_v45 = vpop.f32.mrf.mxu3 }
 0x438   : > { %v1958_v15 = vadd.f32 %v1924_v45, %v6439_v7  ;;  %v3251_v35 = vpop.f32.mrf.mxu0  ;;  %v2823_v7 = vld [vmem:[#allocation5 + $0xf8] sm:$0xff] }
 0x43a   : > { %v6890_v3 = vadd.f32 %v2206_v17, %v1958_v15 }
 0x43b   : > { %v6888_v5 = vpop.f32.mrf.mxu1  ;;  %4832 = vmatmul.msk.f32.gmra.mxu0 %vm1099_vm9, %v3107_v23 }
 0x43c   : > { %4797 = vmatmul.msk.f32.gmra.mxu3 %vm1099_vm9, %v2822_v41 }
 0x43e   : > { %4855 = vmatmul.msk.f32.gmra.mxu1 %vm1099_vm9, %v3380_v57  ;;  %v2824_v57 = vld [vmem:[#allocation5 + $0x108] sm:$0xff] }
 0x43f   : > { %v2960_v42 = vpop.f32.mrf.mxu3 }
 0x440   : > { %v3056_v38 = vadd.f32 %v2960_v42, %v6524_v32  ;;  %v3254_v45 = vpop.f32.mrf.mxu0  ;;  %v3382_v32 = vld [vmem:[#allocation5 + $0xc2] sm:$0xff] }
 0x442   : > { %v3338_v48 = vadd.f32 %v3242_v0, %v3056_v38 }
 0x443   : > { %v6896_v58 = vpop.f32.mrf.mxu1  ;;  %4833 = vmatmul.msk.f32.gmra.mxu0 %vm1099_vm9, %v6636_v21 }
 0x444   : > { %4798 = vmatmul.msk.f32.gmra.mxu3 %vm1099_vm9, %v2823_v7  ;;  %v2825_v7 = vld [vmem:[#allocation5 + $0x110] sm:$0xff] }
 0x446   : > { %4856 = vmatmul.msk.f32.gmra.mxu1 %vm1099_vm9, %v3381_v26 }
 0x447   : > { %v2963_v17 = vpop.f32.mrf.mxu3 }
 0x448   : > { %v3057_v15 = vadd.f32 %v2963_v17, %v6543_v43  ;;  %v3257_v42 = vpop.f32.mrf.mxu0  ;;  %v3383_v43 = vld [vmem:[#allocation5 + $0xca] sm:$0xff] }
 0x44a   : > { %v3339_v23 = vadd.f32 %v3245_v52, %v3057_v15 }
 0x44b   : > { %v6903_v41 = vpop.f32.mrf.mxu1  ;;  %4834 = vmatmul.msk.f32.gmra.mxu0 %vm1099_vm9, %v6659_v14 }
 0x44c   : > { %4799 = vmatmul.msk.f32.gmra.mxu3 %vm1099_vm9, %v2824_v57  ;;  %v2826_v57 = vld [vmem:[#allocation5 + $0x120] sm:$0xff] }
 0x44e   : > { %4857 = vmatmul.msk.f32.gmra.mxu1 %vm1099_vm9, %v3382_v32 }
 0x44f   : > { %v2966_v0 = vpop.f32.mrf.mxu3 }
 0x450   : > { %v3058_v38 = vadd.f32 %v2966_v0, %v6562_v39  ;;  %v3260_v17 = vpop.f32.mrf.mxu0  ;;  %v3384_v39 = vld [vmem:[#allocation5 + $0xda] sm:$0xff] }
 0x452   : > { %v3340_v26 = vadd.f32 %v3248_v1, %v3058_v38 }
 0x453   : > { %v6910_v21 = vpop.f32.mrf.mxu1  ;;  %4835 = vmatmul.msk.f32.gmra.mxu0 %vm1099_vm9, %v6677_v8 }
 0x454   : > { %4800 = vmatmul.msk.f32.gmra.mxu3 %vm1099_vm9, %v2825_v7  ;;  %v2827_v7 = vld [vmem:[#allocation5 + $0x128] sm:$0xff] }
 0x456   : > { %4858 = vmatmul.msk.f32.gmra.mxu1 %vm1099_vm9, %v3383_v43 }
 0x457   : > { %v2969_v52 = vpop.f32.mrf.mxu3 }
 0x458   : > { %v3059_v15 = vadd.f32 %v2969_v52, %v6584_v6  ;;  %v3263_v0 = vpop.f32.mrf.mxu0  ;;  %v3385_v6 = vld [vmem:[#allocation5 + $0xe2] sm:$0xff] }
 0x45a   : > { %v3341_v32 = vadd.f32 %v3251_v35, %v3059_v15 }
 0x45b   : > { %v6917_v14 = vpop.f32.mrf.mxu1  ;;  %4836 = vmatmul.msk.f32.gmra.mxu0 %vm1099_vm9, %v6695_v46 }
 0x45c   : > { %4801 = vmatmul.msk.f32.gmra.mxu3 %vm1099_vm9, %v2826_v57  ;;  %v2828_v57 = vld [vmem:[#allocation5 + $0x138] sm:$0xff] }
 0x45e   : > { %4859 = vmatmul.msk.f32.gmra.mxu1 %vm1099_vm9, %v3384_v39  ;;  %v3386_v39 = vld [vmem:[#allocation5 + $0xf2] sm:$0xff] }
 0x45f   : > { %v2972_v1 = vpop.f32.mrf.mxu3 }
 0x460   : > { %v3060_v38 = vadd.f32 %v2972_v1, %v6608_v44  ;;  %v3266_v52 = vpop.f32.mrf.mxu0 }
 0x462   : > { %v3342_v43 = vadd.f32 %v3254_v45, %v3060_v38 }
 0x463   : > { %v6924_v8 = vpop.f32.mrf.mxu1  ;;  %4837 = vmatmul.msk.f32.gmra.mxu0 %vm1099_vm9, %v6711_v47 }
 0x464   : > { %7826 = vst [vmem:[#allocation33_spill] sm:$0xff] %v6924_v8  ;;  %4802 = vmatmul.msk.f32.gmra.mxu3 %vm1099_vm9, %v2827_v7  ;;  %v3387_v7 = vld [vmem:[#allocation5 + $0xfa] sm:$0xff] }
 0x466   : > { %4860 = vmatmul.msk.f32.gmra.mxu1 %vm1099_vm9, %v3385_v6 }
 0x467   : > { %v2975_v35 = vpop.f32.mrf.mxu3 }
 0x468   : > { %v3061_v15 = vadd.f32 %v2975_v35, %v6631_v60  ;;  %v3269_v8 = vpop.f32.mrf.mxu0 }
 0x46a   : > { %v3343_v44 = vadd.f32 %v3257_v42, %v3061_v15  ;;  %v3388_v15 = vld [vmem:[#allocation5 + $0x10a] sm:$0xff] }
 0x46b   : > { %v3524_v46 = vpop.f32.mrf.mxu1  ;;  %4838 = vmatmul.msk.f32.gmra.mxu0 %vm1099_vm9, %v6726_v59 }
 0x46c   : > { %v6931_v1 = vadd.f32 %v3524_v46, %v3338_v48  ;;  %4803 = vmatmul.msk.f32.gmra.mxu3 %vm1099_vm9, %v2828_v57  ;;  %v3389_v57 = vld [vmem:[#allocation5 + $0x112] sm:$0xff] }
 0x46e   : > { %4861 = vmatmul.msk.f32.gmra.mxu1 %vm1099_vm9, %v3386_v39 }
 0x46f   : > { %v2978_v45 = vpop.f32.mrf.mxu3 }
 0x470   : > { %v3062_v47 = vadd.f32 %v2978_v45, %v6654_v24  ;;  %v3272_v48 = vpop.f32.mrf.mxu0 }
 0x472   : > { %v3344_v60 = vadd.f32 %v3260_v17, %v3062_v47 }
 0x473   : > { %v3527_v38 = vpop.f32.mrf.mxu1  ;;  %4839 = vmatmul.msk.f32.gmra.mxu0 %vm1099_vm9, %v6740_v56 }
 0x474   : > { %v6938_v6 = vadd.f32 %v3527_v38, %v3339_v23  ;;  %4804 = vmatmul.msk.f32.gmra.mxu3 %vm1099_vm9, %v6515_v61 }
 0x476   : > { %4862 = vmatmul.msk.f32.gmra.mxu1 %vm1099_vm9, %v3387_v7 }
 0x477   : > { %v2981_v42 = vpop.f32.mrf.mxu3 }
 0x478   : > { %v3063_v59 = vadd.f32 %v2981_v42, %v6672_v13  ;;  %v3275_v23 = vpop.f32.mrf.mxu0  ;;  %v3392_v42 = vld [vmem:[#allocation5 + $0x13a] sm:$0xff] }
 0x47a   : > { %v3345_v24 = vadd.f32 %v3263_v0, %v3063_v59  ;;  %v3390_v0 = vld [vmem:[#allocation5 + $0x122] sm:$0xff] }
 0x47b   : > { %v3530_v35 = vpop.f32.mrf.mxu1  ;;  %4840 = vmatmul.msk.f32.gmra.mxu0 %vm1099_vm9, %v6754_v29 }
 0x47c   : > { %v6946_v46 = vadd.f32 %v3530_v35, %v3340_v26  ;;  %4805 = vmatmul.msk.f32.gmra.mxu3 %vm1099_vm9, %v6534_v49 }
 0x47e   : > { %4863 = vmatmul.msk.f32.gmra.mxu1 %vm1099_vm9, %v3388_v15 }
 0x47f   : > { %v2984_v61 = vpop.f32.mrf.mxu3 }
 0x480   : > { %v3064_v56 = vadd.f32 %v2984_v61, %v6690_v25  ;;  %v3278_v45 = vpop.f32.mrf.mxu0 }
 0x482   : > { %v3346_v13 = vadd.f32 %v3266_v52, %v3064_v56  ;;  %v3391_v52 = vld [vmem:[#allocation5 + $0x12a] sm:$0xff] }
 0x483   : > { %v3533_v17 = vpop.f32.mrf.mxu1  ;;  %4841 = vmatmul.msk.f32.gmra.mxu0 %vm1099_vm9, %v6770_v55  ;;  %v7827_v56 = vld [vmem:[#allocation24_spill] sm:$0xff] }
 0x484   : > { %v6954_v39 = vadd.f32 %v3533_v17, %v3341_v32  ;;  %4806 = vmatmul.msk.f32.gmra.mxu3 %vm1099_vm9, %v6553_v20  ;;  %v7829_v17 = vld [vmem:[#allocation28_spill] sm:$0xff] }
 0x486   : > { %4864 = vmatmul.msk.f32.gmra.mxu1 %vm1099_vm9, %v3389_v57 }
 0x487   : > { %v2987_v49 = vpop.f32.mrf.mxu3 }
 0x488   : > { %v3065_v29 = vadd.f32 %v2987_v49, %v6708_v53  ;;  %v3281_v7 = vpop.f32.mrf.mxu0 }
 0x48a   : > { %v3347_v25 = vadd.f32 %v3269_v8, %v3065_v29  ;;  %v3118_v8 = vld [vmem:[#allocation5 + $0x199] sm:$0xff] }
 0x48b   : > { %v3536_v26 = vpop.f32.mrf.mxu1  ;;  %4842 = vmatmul.msk.f32.gmra.mxu0 %vm1099_vm9, %v6786_v50  ;;  %v2836_v29 = vld [vmem:[#allocation5 + $0x198] sm:$0xff] }
 0x48c   : > { %v6962_v47 = vadd.f32 %v3536_v26, %v3342_v43  ;;  %4807 = vmatmul.msk.f32.gmra.mxu3 %vm1099_vm9, %v6573_v54 }
 0x48e   : > { %4865 = vmatmul.msk.f32.gmra.mxu1 %vm1099_vm9, %v3390_v0 }
 0x48f   : > { %v2990_v20 = vpop.f32.mrf.mxu3 }
 0x490   : > { %v3066_v55 = vadd.f32 %v2990_v20, %v6723_v9 }
 0x492   : > { %v3348_v53 = vadd.f32 %v3272_v48, %v3066_v55  ;;  %v3119_v48 = vld [vmem:[#allocation5 + $0x1a1] sm:$0xff] }
 0x493   : > { %v3539_v32 = vpop.f32.mrf.mxu1  ;;  %4843 = vmatmul.msk.f32.gmra.mxu0 %vm1099_vm9, %v3118_v8 }
 0x494   : > { %v6970_v38 = vadd.f32 %v3539_v32, %v3343_v44  ;;  %4808 = vmatmul.msk.f32.gmra.mxu3 %vm1099_vm9, %v6596_v12  ;;  %v3284_v44 = vpop.f32.mrf.mxu0  ;;  %v2837_v32 = vld [vmem:[#allocation5 + $0x1a0] sm:$0xff] }
 0x496   : > { %4866 = vmatmul.msk.f32.gmra.mxu1 %vm1099_vm9, %v3391_v52 }
 0x497   : > { %v2993_v54 = vpop.f32.mrf.mxu3 }
 0x498   : > { %v3067_v50 = vadd.f32 %v2993_v54, %v6737_v36 }
 0x49a   : > { %v3349_v9 = vadd.f32 %v3275_v23, %v3067_v50  ;;  %v7832_v50 = vld [vmem:[#allocation25_spill] sm:$0xff] }
 0x49b   : > { %v3542_v43 = vpop.f32.mrf.mxu1  ;;  %4844 = vmatmul.msk.f32.gmra.mxu0 %vm1099_vm9, %v3119_v48 }
 0x49c   : > { %v6977_v59 = vadd.f32 %v3542_v43, %v3344_v60  ;;  %4809 = vmatmul.msk.f32.gmra.mxu3 %vm1099_vm9, %v6621_v18  ;;  %v7828_v60 = vld [vmem:[#allocation26_spill] sm:$0xff]  ;;  %v3287_v18 = vpop.f32.mrf.mxu0 }
 0x49e   : > { %4867 = vmatmul.msk.f32.gmra.mxu1 %vm1099_vm9, %v3392_v42 }
 0x49f   : > { %v2996_v12 = vpop.f32.mrf.mxu3 }
 0x4a0   : > { %v3068_v35 = vadd.f32 %v2996_v12, %v6751_v22  ;;  %v7830_v22 = vld [vmem:[#allocation22_spill] sm:$0xff] }
 0x4a2   : > { %v3350_v61 = vadd.f32 %v3278_v45, %v3068_v35  ;;  %v7831_v45 = vld [vmem:[#allocation30_spill] sm:$0xff] }
 0x4a3   : > { %v3545_v15 = vpop.f32.mrf.mxu1 }
 0x4a4   : > { %v6984_v36 = vadd.f32 %v3545_v15, %v3345_v24  ;;  %4810 = vmatmul.msk.f32.gmra.mxu3 %vm1099_vm9, %v7827_v56  ;;  %v3290_v52 = vpop.f32.mrf.mxu0  ;;  %v7834_v15 = vld [vmem:[#allocation27_spill] sm:$0xff] }
 0x4a6   : > { %4868 = vmatmul.msk.f32.gmra.mxu1 %vm1099_vm9, %v7828_v60 }
 0x4a7   : > { %v2999_v23 = vpop.f32.mrf.mxu3 }
 0x4a8   : > { %v3069_v57 = vadd.f32 %v2999_v23, %v7829_v17  ;;  %v7835_v17 = vld [vmem:[#allocation23_spill] sm:$0xff] }
 0x4aa   : > { %v3351_v26 = vadd.f32 %v3281_v7, %v3069_v57  ;;  %v7833_v7 = vld [vmem:[#allocation32_spill] sm:$0xff] }
 0x4ab   : > { %v3548_v49 = vpop.f32.mrf.mxu1 }
 0x4ac   : > { %v6991_v0 = vadd.f32 %v3548_v49, %v3346_v13  ;;  %4811 = vmatmul.msk.f32.gmra.mxu3 %vm1099_vm9, %v2836_v29  ;;  %v3293_v35 = vpop.f32.mrf.mxu0 }
 0x4ae   : > { %4869 = vmatmul.msk.f32.gmra.mxu1 %vm1099_vm9, %v7830_v22 }
 0x4af   : > { %v3002_v24 = vpop.f32.mrf.mxu3 }
 0x4b0   : > { %v3070_v20 = vadd.f32 %v3002_v24, %v7831_v45  ;;  %v7836_v24 = vld [vmem:[#allocation29_spill] sm:$0xff] }
 0x4b2   : > { %v3352_v8 = vadd.f32 %v3284_v44, %v3070_v20 }
 0x4b3   : > { %v3551_v55 = vpop.f32.mrf.mxu1 }
 0x4b4   : > { %v6997_v54 = vadd.f32 %v3551_v55, %v3347_v25  ;;  %4812 = vmatmul.msk.f32.gmra.mxu3 %vm1099_vm9, %v2837_v32  ;;  %v3296_v57 = vpop.f32.mrf.mxu0 }
 0x4b6   : > { %4870 = vmatmul.msk.f32.gmra.mxu1 %vm1099_vm9, %v7832_v50 }
 0x4b7   : > { %v3005_v13 = vpop.f32.mrf.mxu3 }
 0x4b8   : > { %v3071_v43 = vadd.f32 %v3005_v13, %v7833_v7  ;;  %v3400_v13 = vld [vmem:[#allocation5 + $0x19a] sm:$0xff] }
 0x4ba   : > { %v3353_v48 = vadd.f32 %v3287_v18, %v3071_v43 }
 0x4bb   : > { %v3554_v42 = vpop.f32.mrf.mxu1 }
 0x4bc   : > { %v7003_v12 = vadd.f32 %v3554_v42, %v3348_v53 }
 0x4be   : > { %4871 = vmatmul.msk.f32.gmra.mxu1 %vm1099_vm9, %v7834_v15  ;;  %v3401_v15 = vld [vmem:[#allocation5 + $0x1a2] sm:$0xff] }
 0x4bf   : > { %v3008_v56 = vpop.f32.mrf.mxu3 }
 0x4c0   : > { %v3072_v25 = vadd.f32 %v3008_v56, %v6806_v51  ;;  %v3299_v51 = vpop.f32.mrf.mxu0 }
 0x4c2   : > { %v3354_v60 = vadd.f32 %v3290_v52, %v3072_v25  ;;  %v7837_v52 = vld [vmem:[#allocation31_spill] sm:$0xff] }
 0x4c3   : > { %v3557_v44 = vpop.f32.mrf.mxu1 }
 0x4c4   : > { %v7008_v23 = vadd.f32 %v3557_v44, %v3349_v9 }
 0x4c6   : > { %4872 = vmatmul.msk.f32.gmra.mxu1 %vm1099_vm9, %v7835_v17 }
 0x4c7   : > { %v3011_v49 = vpop.f32.mrf.mxu3 }
 0x4c8   : > { %v3073_v18 = vadd.f32 %v3011_v49, %v6815_v63  ;;  %v3302_v7 = vpop.f32.mrf.mxu0 }
 0x4ca   : > { %v3355_v29 = vadd.f32 %v3293_v35, %v3073_v18 }
 0x4cb   : > { %v3560_v53 = vpop.f32.mrf.mxu1 }
 0x4cc   : > { %v7013_v22 = vadd.f32 %v3560_v53, %v3350_v61 }
 0x4ce   : > { %4873 = vmatmul.msk.f32.gmra.mxu1 %vm1099_vm9, %v7836_v24 }
 0x4cf   : > { %v3014_v45 = vpop.f32.mrf.mxu3 }
 0x4d0   : > { %v3074_v20 = vadd.f32 %v3014_v45, %v6824_v33  ;;  %v3305_v44 = vpop.f32.mrf.mxu0 }
 0x4d2   : > { %v3356_v55 = vadd.f32 %v3296_v57, %v3074_v20 }
 0x4d3   : > { %v3563_v9 = vpop.f32.mrf.mxu1 }
 0x4d4   : > { %v7018_v32 = vadd.f32 %v3563_v9, %v3351_v26 }
 0x4d6   : > { %4874 = vmatmul.msk.f32.gmra.mxu1 %vm1099_vm9, %v7837_v52 }
 0x4d7   : > { %v3017_v63 = vpop.f32.mrf.mxu3 }
 0x4d8   : > { %v3075_v50 = vadd.f32 %v3017_v63, %v6833_v31  ;;  %v3308_v18 = vpop.f32.mrf.mxu0 }
 0x4da   : > { %v3357_v43 = vadd.f32 %v3299_v51, %v3075_v50 }
 0x4db   : > { %v3566_v61 = vpop.f32.mrf.mxu1 }
 0x4dc   : > { %v7023_v42 = vadd.f32 %v3566_v61, %v3352_v8 }
 0x4de   : > { %4875 = vmatmul.msk.f32.gmra.mxu1 %vm1099_vm9, %v3400_v13 }
 0x4df   : > { %v3020_v33 = vpop.f32.mrf.mxu3 }
 0x4e0   : > { %v3076_v35 = vadd.f32 %v3020_v33, %v6842_v28  ;;  %v3311_v20 = vpop.f32.mrf.mxu0 }
 0x4e2   : > { %v3358_v56 = vadd.f32 %v3302_v7, %v3076_v35  ;;  %v2749_v7 = vpop.f32.mrf.mxu2 }
 0x4e3   : > { %v3569_v26 = vpop.f32.mrf.mxu1 }
 0x4e4   : > { %v7027_v25 = vadd.f32 %v3569_v26, %v3353_v48 }
 0x4e6   : > { %4876 = vmatmul.msk.f32.gmra.mxu1 %vm1099_vm9, %v3401_v15 }
 0x4e7   : > { %v3023_v31 = vpop.f32.mrf.mxu3 }
 0x4e8   : > { %v3077_v17 = vadd.f32 %v3023_v31, %v6851_v16  ;;  %v3314_v35 = vpop.f32.mrf.mxu0 }
 0x4ea   : > { %v3359_v8 = vadd.f32 %v3305_v44, %v3077_v17 }
 0x4eb   : > { %v3572_v57 = vpop.f32.mrf.mxu1 }
 0x4ec   : > { %v7032_v49 = vadd.f32 %v3572_v57, %v3354_v60 }
 0x4ef   : > { %v3026_v53 = vpop.f32.mrf.mxu3 }
 0x4f0   : > { %v3078_v28 = vadd.f32 %v3026_v53, %v6860_v11  ;;  %v3317_v31 = vpop.f32.mrf.mxu0 }
 0x4f2   : > { %v3360_v45 = vadd.f32 %v3308_v18, %v3078_v28 }
 0x4f3   : > { %v3575_v24 = vpop.f32.mrf.mxu1 }
 0x4f4   : > { %v7035_v51 = vadd.f32 %v3575_v24, %v3355_v29 }
 0x4f7   : > { %v3029_v48 = vpop.f32.mrf.mxu3 }
 0x4f8   : > { %v3079_v9 = vadd.f32 %v3029_v48, %v6869_v2  ;;  %v2752_v2 = vpop.f32.mrf.mxu2 }
 0x4fa   : > { %v3361_v63 = vadd.f32 %v3311_v20, %v3079_v9  ;;  %v3320_v20 = vpop.f32.mrf.mxu0 }
 0x4fb   : > { %v3578_v52 = vpop.f32.mrf.mxu1 }
 0x4fc   : > { %v7038_v50 = vadd.f32 %v3578_v52, %v3356_v55  ;;  %v2515_v55 = vadd.f32 %v6872_v4, %v6827_v19  ;;  %v2517_v19 = vadd.f32 %v6888_v5, %v6845_v62  ;;  %v2519_v5 = vadd.f32 %v6903_v41, %v6863_v34 }
 0x4fd   : > { %v2521_v41 = vadd.f32 %v6917_v14, %v6882_v27 }
 0x4fe   : > { %v2797_v17 = vadd.f32 %v2749_v7, %v2515_v55 }
 0x4ff   : > { %v3032_v29 = vpop.f32.mrf.mxu3 }
 0x500   : > { %v2755_v18 = vpop.f32.mrf.mxu2 }
 0x503   : > { %v3581_v16 = vpop.f32.mrf.mxu1 }
 0x504   : > { %v7040_v61 = vadd.f32 %v3581_v16, %v3357_v43 }
 0x507   : > { %v3035_v44 = vpop.f32.mrf.mxu3 }
 0x508   : > { %v2758_v52 = vpop.f32.mrf.mxu2 }
 0x50b   : > { %v3584_v60 = vpop.f32.mrf.mxu1 }
 0x50c   : > { %v7042_v13 = vadd.f32 %v3584_v60, %v3358_v56  ;;  %v3080_v56 = vadd.f32 %v3032_v29, %v2797_v17  ;;  %v2799_v60 = vadd.f32 %v2755_v18, %v2517_v19  ;;  %v3323_v29 = vpop.f32.mrf.mxu0 }
 0x50e   : > { %v3362_v28 = vadd.f32 %v3314_v35, %v3080_v56 }
 0x50f   : > { %v3038_v53 = vpop.f32.mrf.mxu3 }
 0x510   : > { %v2761_v35 = vpop.f32.mrf.mxu2 }
 0x511   : > { %v2801_v56 = vadd.f32 %v2761_v35, %v2519_v5 }
 0x513   : > { %v3587_v11 = vpop.f32.mrf.mxu1 }
 0x514   : > { %v7044_v33 = vadd.f32 %v3587_v11, %v3359_v8  ;;  %v2516_v8 = vadd.f32 %v6880_v10, %v6836_v30  ;;  %v3082_v11 = vadd.f32 %v3038_v53, %v2799_v60  ;;  %v2518_v30 = vadd.f32 %v6896_v58, %v6854_v40  ;;  %v3326_v62 = vpop.f32.mrf.mxu0 }
 0x515   : > { %v2520_v58 = vadd.f32 %v6910_v21, %v6874_v37  ;;  %v7838_v21 = vld [vmem:[#allocation33_spill] sm:$0xff] }
 0x516   : > { %v3364_v10 = vadd.f32 %v3320_v20, %v3082_v11 }
 0x518   : > { %v2764_v53 = vpop.f32.mrf.mxu2 }
 0x519   : > { %v2802_v20 = vadd.f32 %v2764_v53, %v2520_v58 }
 0x51b   : > { %v3590_v26 = vpop.f32.mrf.mxu1 }
 0x51c   : > { %v7046_v15 = vadd.f32 %v3590_v26, %v3360_v45  ;;  %v2798_v45 = vadd.f32 %v2752_v2, %v2516_v8  ;;  %v2800_v2 = vadd.f32 %v2758_v52, %v2518_v30  ;;  %v2522_v30 = vadd.f32 %v7838_v21, %v6890_v3 }
 0x51e   : > { %v3081_v9 = vadd.f32 %v3035_v44, %v2798_v45 }
 0x520   : > { %v3363_v4 = vadd.f32 %v3317_v31, %v3081_v9  ;;  %v2767_v19 = vpop.f32.mrf.mxu2 }
 0x523   : > { %v3593_v43 = vpop.f32.mrf.mxu1 }
 0x524   : > { %v7050_v57 = vadd.f32 %v3593_v43, %v3361_v63  ;;  %v3041_v63 = vpop.f32.mrf.mxu3 }
 0x525   : > { %v3083_v43 = vadd.f32 %v3041_v63, %v2800_v2 }
 0x527   : > { %v3365_v31 = vadd.f32 %v3323_v29, %v3083_v43 }
 0x528   : > { %v2770_v37 = vpop.f32.mrf.mxu2 }
 0x529   : > { %v2804_v2 = vadd.f32 %v2770_v37, %v2522_v30 }
 0x52b   : > { %v3596_v24 = vpop.f32.mrf.mxu1 }
 0x52c   : > { %v7054_v48 = vadd.f32 %v3596_v24, %v3362_v28  ;;  %v3044_v55 = vpop.f32.mrf.mxu3  ;;  %v3329_v24 = vpop.f32.mrf.mxu0 }
 0x52d   : > { %v3084_v8 = vadd.f32 %v3044_v55, %v2801_v56 }
 0x52f   : > { %v3366_v28 = vadd.f32 %v3326_v62, %v3084_v8 }
 0x533   : > { %v3599_v16 = vpop.f32.mrf.mxu1 }
 0x534   : > { %v7058_v7 = vadd.f32 %v3599_v16, %v3363_v4  ;;  %v3047_v40 = vpop.f32.mrf.mxu3  ;;  %v2803_v16 = vadd.f32 %v2767_v19, %v2521_v41  ;;  %v3332_v11 = vpop.f32.mrf.mxu0 }
 0x535   : > { %v3085_v52 = vadd.f32 %v3047_v40, %v2802_v20 }
 0x537   : > { %v3367_v4 = vadd.f32 %v3329_v24, %v3085_v52 }
 0x53b   : > { %v3602_v26 = vpop.f32.mrf.mxu1 }
 0x53c   : > { %v7062_v44 = vadd.f32 %v3602_v26, %v3364_v10  ;;  %v3050_v34 = vpop.f32.mrf.mxu3  ;;  %v3335_v62 = vpop.f32.mrf.mxu0 }
 0x53d   : > { %v3086_v29 = vadd.f32 %v3050_v34, %v2803_v16 }
 0x53f   : > { %v3368_v10 = vadd.f32 %v3332_v11, %v3086_v29 }
 0x543   : > { %v3605_v17 = vpop.f32.mrf.mxu1 }
 0x544   : > { %v7066_v18 = vadd.f32 %v3605_v17, %v3365_v31  ;;  %v3053_v35 = vpop.f32.mrf.mxu3 }
 0x545   : > { %v3087_v43 = vadd.f32 %v3053_v35, %v2804_v2 }
 0x547   : > { %v3369_v27 = vadd.f32 %v3335_v62, %v3087_v43 }
 0x54b   : > { %v3608_v45 = vpop.f32.mrf.mxu1 }
 0x54c   : > { %v7070_v9 = vadd.f32 %v3608_v45, %v3366_v28 }
 0x553   : > { %v3611_v63 = vpop.f32.mrf.mxu1 }
 0x554   : > { %v7074_v60 = vadd.f32 %v3611_v63, %v3367_v4 }
 0x55b   : > { %v3614_v26 = vpop.f32.mrf.mxu1 }
 0x55c   : > { %v7078_v55 = vadd.f32 %v3614_v26, %v3368_v10 }
 0x560   : > { %3655 = sbr.rel (%p4877_p9) target bundleno = 1463 (0x5b7), region = 92 }
 0x563   : > { %v3617_v14 = vpop.f32.mrf.mxu1 }
 0x564   : > { %v7080_v5 = vadd.f32 %v3617_v14, %v3369_v27 }
 0x565   : > { %v3657_v31 = vsel %vm1099_vm9, %v6931_v1, 0.0  ;;  %v3658_v3 = vsel %vm1099_vm9, %v6938_v6, 0.0  ;;  %v3660_v17 = vsel %vm1099_vm9, %v6946_v46, 0.0  ;;  %v3662_v53 = vsel %vm1099_vm9, %v6954_v39, 0.0 }
 0x566   : > { %v3659_v56 = vadd.f32 %v3658_v3, %v3657_v31  ;;  %v3664_v40 = vsel %vm1099_vm9, %v6962_v47, 0.0  ;;  %v3666_v28 = vsel %vm1099_vm9, %v6970_v38, 0.0  ;;  %v3668_v45 = vsel %vm1099_vm9, %v6977_v59, 0.0 }
 0x567   : > { %v3729_v20 = vmul.f32 %v6931_v1, %v6931_v1  ;;  %v3730_v19 = vmul.f32 %v6938_v6, %v6938_v6  ;;  %v3731_v34 = vmul.f32 %v6946_v46, %v6946_v46  ;;  %v3670_v41 = vsel %vm1099_vm9, %v6984_v36, 0.0 }
 0x568   : > { %v3661_v8 = vadd.f32 %v3660_v17, %v3659_v56  ;;  %v3732_v63 = vmul.f32 %v6954_v39, %v6954_v39  ;;  %v3672_v16 = vsel %vm1099_vm9, %v6991_v0, 0.0  ;;  %v3733_v37 = vmul.f32 %v6962_v47, %v6962_v47 }
 0x569   : > { %v3761_v11 = vsel %vm1099_vm9, %v3729_v20, 0.0  ;;  %v3762_v21 = vsel %vm1099_vm9, %v3730_v19, 0.0  ;;  %v3764_v30 = vsel %vm1099_vm9, %v3731_v34, 0.0  ;;  %v3674_v10 = vsel %vm1099_vm9, %v6997_v54, 0.0 }
 0x56a   : > { %v3663_v58 = vadd.f32 %v3662_v53, %v3661_v8  ;;  %v3763_v35 = vadd.f32 %v3762_v21, %v3761_v11  ;;  %v3734_v2 = vmul.f32 %v6970_v38, %v6970_v38  ;;  %v3766_v43 = vsel %vm1099_vm9, %v3732_v63, 0.0 }
 0x56b   : > { %v3676_v62 = vsel %vm1099_vm9, %v7003_v12, 0.0  ;;  %v3735_v31 = vmul.f32 %v6977_v59, %v6977_v59  ;;  %v3768_v3 = vsel %vm1099_vm9, %v3733_v37, 0.0  ;;  %v3678_v17 = vsel %vm1099_vm9, %v7008_v23, 0.0 }
 0x56c   : > { %v3665_v24 = vadd.f32 %v3664_v40, %v3663_v58  ;;  %v3765_v27 = vadd.f32 %v3764_v30, %v3763_v35  ;;  %v3736_v8 = vmul.f32 %v6984_v36, %v6984_v36  ;;  %v3770_v40 = vsel %vm1099_vm9, %v3734_v2, 0.0 }
 0x56d   : > { %v3680_v58 = vsel %vm1099_vm9, %v7013_v22, 0.0  ;;  %v3772_v20 = vsel %vm1099_vm9, %v3735_v31, 0.0  ;;  %v3684_v63 = vsel %vm1099_vm9, %v7023_v42, 0.0  ;;  %v3686_v21 = vsel %vm1099_vm9, %v7027_v25, 0.0 }
 0x56e   : > { %v3667_v52 = vadd.f32 %v3666_v28, %v3665_v24  ;;  %v3767_v56 = vadd.f32 %v3766_v43, %v3765_v27  ;;  %v3740_v35 = vmul.f32 %v7008_v23, %v7008_v23  ;;  %v3688_v2 = vsel %vm1099_vm9, %v7032_v49, 0.0 }
 0x56f   : > { %v3741_v27 = vmul.f32 %v7013_v22, %v7013_v22  ;;  %v3690_v31 = vsel %vm1099_vm9, %v7035_v51, 0.0 }
 0x570   : > { %v3669_v4 = vadd.f32 %v3668_v45, %v3667_v52  ;;  %v3769_v28 = vadd.f32 %v3768_v3, %v3767_v56  ;;  %v3737_v45 = vmul.f32 %v6991_v0, %v6991_v0  ;;  %v3682_v52 = vsel %vm1099_vm9, %v7018_v32, 0.0 }
 0x571   : > { %v3742_v56 = vmul.f32 %v7018_v32, %v7018_v32 }
 0x572   : > { %v3671_v29 = vadd.f32 %v3670_v41, %v3669_v4  ;;  %v3771_v19 = vadd.f32 %v3770_v40, %v3769_v28  ;;  %v3738_v41 = vmul.f32 %v6997_v54, %v6997_v54  ;;  %v3774_v4 = vsel %vm1099_vm9, %v3736_v8, 0.0 }
 0x573   : > { %v3776_v37 = vsel %vm1099_vm9, %v3737_v45, 0.0  ;;  %v3692_v8 = vsel %vm1099_vm9, %v7038_v50, 0.0  ;;  %v3743_v28 = vmul.f32 %v7023_v42, %v7023_v42  ;;  %v3694_v45 = vsel %vm1099_vm9, %v7040_v61, 0.0 }
 0x574   : > { %v3673_v26 = vadd.f32 %v3672_v16, %v3671_v29  ;;  %v3773_v16 = vadd.f32 %v3772_v20, %v3771_v19  ;;  %v3739_v29 = vmul.f32 %v7003_v12, %v7003_v12  ;;  %v3744_v19 = vmul.f32 %v7027_v25, %v7027_v25 }
 0x576   : > { %v3675_v14 = vadd.f32 %v3674_v10, %v3673_v26  ;;  %v3775_v30 = vadd.f32 %v3774_v4, %v3773_v16  ;;  %v3778_v26 = vsel %vm1099_vm9, %v3738_v41, 0.0  ;;  %v3696_v41 = vsel %vm1099_vm9, %v7042_v13, 0.0 }
 0x577   : > { %v3745_v16 = vmul.f32 %v7032_v49, %v7032_v49 }
 0x578   : > { %v3677_v53 = vadd.f32 %v3676_v62, %v3675_v14  ;;  %v3777_v43 = vadd.f32 %v3776_v37, %v3775_v30  ;;  %v3780_v14 = vsel %vm1099_vm9, %v3739_v29, 0.0  ;;  %v3698_v29 = vsel %vm1099_vm9, %v7044_v33, 0.0 }
 0x579   : > { %v3746_v30 = vmul.f32 %v7035_v51, %v7035_v51 }
 0x57a   : > { %v3679_v24 = vadd.f32 %v3678_v17, %v3677_v53  ;;  %v3779_v3 = vadd.f32 %v3778_v26, %v3777_v43  ;;  %v3782_v53 = vsel %vm1099_vm9, %v3740_v35, 0.0  ;;  %v3700_v35 = vsel %vm1099_vm9, %v7046_v15, 0.0 }
 0x57b   : > { %v3747_v43 = vmul.f32 %v7038_v50, %v7038_v50 }
 0x57c   : > { %v3681_v34 = vadd.f32 %v3680_v58, %v3679_v24  ;;  %v3781_v40 = vadd.f32 %v3780_v14, %v3779_v3  ;;  %v3784_v24 = vsel %vm1099_vm9, %v3741_v27, 0.0  ;;  %v3702_v27 = vsel %vm1099_vm9, %v7050_v57, 0.0 }
 0x57d   : > { %v3748_v3 = vmul.f32 %v7040_v61, %v7040_v61 }
 0x57e   : > { %v3683_v11 = vadd.f32 %v3682_v52, %v3681_v34  ;;  %v3783_v20 = vadd.f32 %v3782_v53, %v3781_v40  ;;  %v3786_v34 = vsel %vm1099_vm9, %v3742_v56, 0.0  ;;  %v3704_v56 = vsel %vm1099_vm9, %v7054_v48, 0.0 }
 0x57f   : > { %v3749_v40 = vmul.f32 %v7042_v13, %v7042_v13 }
 0x580   : > { %v3685_v10 = vadd.f32 %v3684_v63, %v3683_v11  ;;  %v3785_v4 = vadd.f32 %v3784_v24, %v3783_v20  ;;  %v3788_v11 = vsel %vm1099_vm9, %v3743_v28, 0.0  ;;  %v3706_v28 = vsel %vm1099_vm9, %v7058_v7, 0.0 }
 0x581   : > { %v3750_v20 = vmul.f32 %v7044_v33, %v7044_v33 }
 0x582   : > { %v3687_v62 = vadd.f32 %v3686_v21, %v3685_v10  ;;  %v3787_v37 = vadd.f32 %v3786_v34, %v3785_v4  ;;  %v3790_v10 = vsel %vm1099_vm9, %v3744_v19, 0.0  ;;  %v3708_v19 = vsel %vm1099_vm9, %v7062_v44, 0.0 }
 0x583   : > { %v3751_v4 = vmul.f32 %v7046_v15, %v7046_v15 }
 0x584   : > { %v3689_v17 = vadd.f32 %v3688_v2, %v3687_v62  ;;  %v3789_v26 = vadd.f32 %v3788_v11, %v3787_v37  ;;  %v3792_v62 = vsel %vm1099_vm9, %v3745_v16, 0.0  ;;  %v3710_v16 = vsel %vm1099_vm9, %v7066_v18, 0.0 }
 0x585   : > { %v3752_v37 = vmul.f32 %v7050_v57, %v7050_v57 }
 0x586   : > { %v3691_v58 = vadd.f32 %v3690_v31, %v3689_v17  ;;  %v3791_v14 = vadd.f32 %v3790_v10, %v3789_v26  ;;  %v3794_v17 = vsel %vm1099_vm9, %v3746_v30, 0.0  ;;  %v3712_v30 = vsel %vm1099_vm9, %v7070_v9, 0.0 }
 0x587   : > { %v3753_v26 = vmul.f32 %v7054_v48, %v7054_v48 }
 0x588   : > { %v3693_v52 = vadd.f32 %v3692_v8, %v3691_v58  ;;  %v3793_v53 = vadd.f32 %v3792_v62, %v3791_v14  ;;  %v3796_v58 = vsel %vm1099_vm9, %v3747_v43, 0.0  ;;  %v3714_v43 = vsel %vm1099_vm9, %v7074_v60, 0.0 }
 0x589   : > { %v3754_v14 = vmul.f32 %v7058_v7, %v7058_v7 }
 0x58a   : > { %v3695_v63 = vadd.f32 %v3694_v45, %v3693_v52  ;;  %v3795_v24 = vadd.f32 %v3794_v17, %v3793_v53  ;;  %v3798_v52 = vsel %vm1099_vm9, %v3748_v3, 0.0  ;;  %v3716_v3 = vsel %vm1099_vm9, %v7078_v55, 0.0 }
 0x58b   : > { %v3755_v53 = vmul.f32 %v7062_v44, %v7062_v44 }
 0x58c   : > { %v3697_v21 = vadd.f32 %v3696_v41, %v3695_v63  ;;  %v3797_v34 = vadd.f32 %v3796_v58, %v3795_v24  ;;  %v3800_v63 = vsel %vm1099_vm9, %v3749_v40, 0.0  ;;  %v3718_v40 = vsel %vm1099_vm9, %v7080_v5, 0.0 }
 0x58d   : > { %v3756_v24 = vmul.f32 %v7066_v18, %v7066_v18 }
 0x58e   : > { %v3699_v2 = vadd.f32 %v3698_v29, %v3697_v21  ;;  %v3799_v11 = vadd.f32 %v3798_v52, %v3797_v34  ;;  %v3802_v21 = vsel %vm1099_vm9, %v3750_v20, 0.0  ;;  %v3812_v34 = vsel %vm1099_vm9, %v3755_v53, 0.0 }
 0x590   : > { %v3701_v31 = vadd.f32 %v3700_v35, %v3699_v2  ;;  %v3801_v10 = vadd.f32 %v3800_v63, %v3799_v11  ;;  %v3804_v2 = vsel %vm1099_vm9, %v3751_v4, 0.0  ;;  %v3758_v63 = vmul.f32 %v7074_v60, %v7074_v60 }
 0x592   : > { %v3703_v8 = vadd.f32 %v3702_v27, %v3701_v31  ;;  %v3803_v62 = vadd.f32 %v3802_v21, %v3801_v10  ;;  %v3806_v31 = vsel %vm1099_vm9, %v3752_v37, 0.0  ;;  %v3759_v37 = vmul.f32 %v7078_v55, %v7078_v55 }
 0x594   : > { %v3705_v45 = vadd.f32 %v3704_v56, %v3703_v8  ;;  %v3805_v17 = vadd.f32 %v3804_v2, %v3803_v62  ;;  %v3808_v8 = vsel %vm1099_vm9, %v3753_v26, 0.0  ;;  %v3818_v26 = vsel %vm1099_vm9, %v3758_v63, 0.0 }
 0x595   : > { %v3820_v62 = vsel %vm1099_vm9, %v3759_v37, 0.0 }
 0x596   : > { %v3707_v41 = vadd.f32 %v3706_v28, %v3705_v45  ;;  %v3807_v58 = vadd.f32 %v3806_v31, %v3805_v17  ;;  %v3810_v45 = vsel %vm1099_vm9, %v3754_v14, 0.0 }
 0x598   : > { %v3709_v29 = vadd.f32 %v3708_v19, %v3707_v41  ;;  %v3809_v20 = vadd.f32 %v3808_v8, %v3807_v58  ;;  %v3757_v19 = vmul.f32 %v7070_v9, %v7070_v9 }
 0x59a   : > { %v3711_v35 = vadd.f32 %v3710_v16, %v3709_v29  ;;  %v3811_v41 = vadd.f32 %v3810_v45, %v3809_v20  ;;  %v3814_v16 = vsel %vm1099_vm9, %v3756_v24, 0.0  ;;  %v3816_v21 = vsel %vm1099_vm9, %v3757_v19, 0.0  ;;  %v3728_v20 = vld [vmem:[#allocation3 + $0x1] sm:$0x1] }
 0x59c   : > { %v3713_v27 = vadd.f32 %v3712_v30, %v3711_v35  ;;  %v3813_v11 = vadd.f32 %v3812_v34, %v3811_v41  ;;  %v3760_v35 = vmul.f32 %v7080_v5, %v7080_v5 }
 0x59e   : > { %v3715_v56 = vadd.f32 %v3714_v43, %v3713_v27  ;;  %v3815_v30 = vadd.f32 %v3814_v16, %v3813_v11  ;;  %v3822_v31 = vsel %vm1099_vm9, %v3760_v35, 0.0 }
 0x5a0   : > { %v3717_v28 = vadd.f32 %v3716_v3, %v3715_v56  ;;  %v3817_v2 = vadd.f32 %v3816_v21, %v3815_v30  ;;  %v3656_v3 = vld [vmem:[#allocation3] sm:$0x1] }
 0x5a2   : > { %v3719_v52 = vadd.f32 %v3718_v40, %v3717_v28  ;;  %v3819_v27 = vadd.f32 %v3818_v26, %v3817_v2 }
 0x5a4   : > { %v3720_v4 = vrot.slane %v3719_v52, 4  ;;  %v3821_v17 = vadd.f32 %v3820_v62, %v3819_v27 }
 0x5a6   : > { %v3721_v29 = vadd.f32 %v3720_v4, %v3719_v52  ;;  %v3823_v53 = vadd.f32 %v3822_v31, %v3821_v17 }
 0x5a8   : > { %v3722_v10 = vrot.slane %v3721_v29, 2  ;;  %v3824_v40 = vrot.slane %v3823_v53, 4 }
 0x5aa   : > { %v3723_v43 = vadd.f32 %v3722_v10, %v3721_v29  ;;  %v3825_v58 = vadd.f32 %v3824_v40, %v3823_v53 }
 0x5ac   : > { %v3724_v14 = vrot.slane %v3723_v43, 1  ;;  %v3826_v28 = vrot.slane %v3825_v58, 2 }
 0x5ae   : > { %v3725_v56 = vadd.f32 %v3724_v14, %v3723_v43  ;;  %v3827_v24 = vadd.f32 %v3826_v28, %v3825_v58 }
 0x5b0   : > { %v3726_v8 = vadd.f32 %v3725_v56, %v3656_v3  ;;  %v3828_v45 = vrot.slane %v3827_v24, 1 }
 0x5b2   : > { %3727 = vst.msk [vmem:[#allocation3] sm:$0x1] %vm1108_vm10, %v3726_v8  ;;  %v3829_v52 = vadd.f32 %v3828_v45, %v3827_v24 }
 0x5b4   : > { %v3830_v19 = vadd.f32 %v3829_v52, %v3728_v20 }
 0x5b6   : > { %3831 = vst.msk [vmem:[#allocation3 + $0x1] sm:$0x1] %vm1108_vm10, %v3830_v19 }
 0x5b7 PF: > { %p3832_p10 = pnand %p3652_p8, %p943_p4 }
 0x5b9   : > { %3835 = sbr.rel (%p3832_p10) target bundleno = 1506 (0x5e2), region = 96 }
 0x5be   : > { %v3838_v34 = vld [vmem:[#allocation3] sm:$0x1]  ;;  %v3840_v41 = vld [vmem:[#allocation3 + $0x1] sm:$0x1]  ;;  %v3836_v2 = vld [vmem:[%s7751_s6] sm:$0x1] }
 0x5bf   : > { %v3839_v4 = vmul.f32 0.001953125, %v3838_v34  ;;  %v3841_v63 = vmul.f32 0.001953125, %v3840_v41  ;;  %v3837_v14 = vld [vmem:[%s7752_s7] sm:$0x1] }
 0x5c1   : > { %v3842_v16 = vmul.f32 %v3839_v4, %v3839_v4 }
 0x5c3   : > { %v3843_v11 = vsub.f32 %v3841_v63, %v3842_v16 }
 0x5c5   : > { %v3844_v29 = vmax.f32 %v3843_v11, 0.0 }
 0x5c7   : > { %v3845_v37 = vadd.f32 1e-05, %v3844_v29 }
 0x5c9   : > { %5052 = vrsqrt.f32 %v3845_v37  ;;  %vm3852_vm15 = vweird.f32 %v3845_v37 }
 0x5cf   : > { %v5053_v21 = vpop.eup %5052 }
 0x5d0   : > { %v3847_v30 = vmul.f32 %v5053_v21, %v3845_v37  ;;  %vm3853_vm0 = vweird.f32 %v5053_v21 }
 0x5d1   : > { %vm3854_vm1 = vmor %vm3852_vm15, %vm3853_vm0 }
 0x5d2   : > { %v3848_v10 = vmul.f32 %v5053_v21, %v3847_v30 }
 0x5d4   : > { %v3849_v35 = vmul.f32 0.5, %v3848_v10 }
 0x5d6   : > { %v3850_v26 = vsub.f32 1.5, %v3849_v35 }
 0x5d8   : > { %v3851_v43 = vmul.f32 %v5053_v21, %v3850_v26 }
 0x5da   : > { %v3855_v62 = vsel %vm3854_vm1, %v5053_v21, %v3851_v43 }
 0x5db   : > { %v3856_v27 = vmul.f32 %v3855_v62, %v3836_v2 }
 0x5dd   : > { %3859 = vst.msk [vmem:[#allocation12] sm:$0x1] %vm1108_vm10, %v3856_v27  ;;  %v3857_v31 = vmul.f32 %v3856_v27, %v3839_v4 }
 0x5df   : > { %v3858_v3 = vsub.f32 %v3837_v14, %v3857_v31 }
 0x5e1   : > { %3860 = vst.msk [vmem:[#allocation12 + $0x1] sm:$0x1] %vm1108_vm10, %v3858_v3 }
 0x5e2 PF: > { %s7839_s23 = sld [smem:[#allocation35_spill]]  ;;  %v3863_v8 = vld [vmem:[#allocation3] sm:$0x1]  ;;  %v3865_v40 = vld [vmem:[#allocation3 + $0x1] sm:$0x1]  ;;  %p4207_p11 = scmp.eq.s32.totalorder %s5269_s17, 2 }
 0x5e3   : > { %v3864_v28 = vmul.f32 0.001953125, %v3863_v8  ;;  %v3866_v24 = vmul.f32 0.001953125, %v3865_v40  ;;  %v3861_v30 = vld [vmem:[%s7751_s6] sm:$0x1]  ;;  %s7840_s28 = sld [smem:[#allocation36_spill]]  ;;  %p4910_p12 = scmp.ne.s32.totalorder %s5269_s17, 2 }
 0x5e4   : > { %v3862_v2 = vld [vmem:[%s7752_s7] sm:$0x1] }
 0x5e5   : > { %v3867_v20 = vmul.f32 %v3864_v28, %v3864_v28 }
 0x5e7   : > { %v3868_v19 = vsub.f32 %v3866_v24, %v3867_v20 }
 0x5e8   : > { %v3993_v17 = vld [vmem:[%s7839_s23 + $0x38] sm:$0xff]  ;;  %v3992_v56 = vld [vmem:[%s7839_s23 + $0x30] sm:$0xff]  ;;  %v3991_v53 = vld [vmem:[%s7839_s23 + $0x28] sm:$0xff] }
 0x5e9   : > { %4102 = vmatpush.msra.mxu2 %v3993_v17  ;;  %v3990_v58 = vld [vmem:[%s7839_s23 + $0x20] sm:$0xff]  ;;  %v3989_v45 = vld [vmem:[%s7839_s23 + $0x18] sm:$0xff]  ;;  %v3988_v52 = vld [vmem:[%s7839_s23 + $0x10] sm:$0xff]  ;;  %v3869_v41 = vmax.f32 %v3868_v19, 0.0 }
 0x5ea   : > { %v3987_v34 = vld [vmem:[%s7839_s23 + $0x8] sm:$0xff]  ;;  %v3986_v4 = vld [vmem:[%s7839_s23] sm:$0xff] }
 0x5eb   : > { %4103 = vmatpush.msra.mxu2 %v3992_v56  ;;  %v3870_v63 = vadd.f32 1e-05, %v3869_v41 }
 0x5ed   : > { %4104 = vmatpush.msra.mxu2 %v3991_v53  ;;  %5055 = vrsqrt.f32 %v3870_v63  ;;  %vm3877_vm3 = vweird.f32 %v3870_v63 }
 0x5ef   : > { %4105 = vmatpush.msra.mxu2 %v3990_v58 }
 0x5f1   : > { %4106 = vmatpush.msra.mxu2 %v3989_v45 }
 0x5f3   : > { %4107 = vmatpush.msra.mxu2 %v3988_v52  ;;  %v5056_v16 = vpop.eup %5055 }
 0x5f4   : > { %v3872_v11 = vmul.f32 %v5056_v16, %v3870_v63  ;;  %vm3878_vm4 = vweird.f32 %v5056_v16 }
 0x5f5   : > { %4108 = vmatpush.msra.mxu2 %v3987_v34  ;;  %vm3879_vm5 = vmor %vm3877_vm3, %vm3878_vm4 }
 0x5f6   : > { %v3873_v29 = vmul.f32 %v5056_v16, %v3872_v11 }
 0x5f7   : > { %4109 = vmatpush.msra.mxu2 %v3986_v4 }
 0x5f8   : > { %v3874_v37 = vmul.f32 0.5, %v3873_v29 }
 0x5fa   : > { %v3875_v21 = vsub.f32 1.5, %v3874_v37 }
 0x5fc   : > { %v3876_v10 = vmul.f32 %v5056_v16, %v3875_v21 }
 0x5fe   : > { %v3880_v35 = vsel %vm3879_vm5, %v5056_v16, %v3876_v10 }
 0x5ff   : > { %v3881_v26 = vmul.f32 %v3880_v35, %v3861_v30 }
 0x601   : > { %v3882_v43 = vmul.f32 %v3881_v26, %v3864_v28  ;;  %v7287_v62 = vperm.slane %v3881_v26, 0 }
 0x603   : > { %v3883_v27 = vsub.f32 %v3862_v2, %v3882_v43  ;;  %v3887_v14 = vmul.f32 %v7287_v62, %v6931_v1  ;;  %v3888_v17 = vmul.f32 %v7287_v62, %v6938_v6  ;;  %v3889_v40 = vmul.f32 %v7287_v62, %v6946_v46 }
 0x604   : > { %v3890_v28 = vmul.f32 %v7287_v62, %v6954_v39  ;;  %v3891_v45 = vmul.f32 %v7287_v62, %v6962_v47  ;;  %v3892_v52 = vmul.f32 %v7287_v62, %v6970_v38  ;;  %v3893_v34 = vmul.f32 %v7287_v62, %v6977_v59 }
 0x605   : > { %v7291_v31 = vperm.slane %v3883_v27, 0  ;;  %v3894_v4 = vmul.f32 %v7287_v62, %v6984_v36  ;;  %v3895_v16 = vmul.f32 %v7287_v62, %v6991_v0  ;;  %v3896_v29 = vmul.f32 %v7287_v62, %v6997_v54 }
 0x606   : > { %v3897_v21 = vmul.f32 %v7287_v62, %v7003_v12  ;;  %v3898_v10 = vmul.f32 %v7287_v62, %v7008_v23  ;;  %v3899_v26 = vmul.f32 %v7287_v62, %v7013_v22  ;;  %v3900_v43 = vmul.f32 %v7287_v62, %v7018_v32 }
 0x607   : > { %v3922_v3 = vadd.f32 %v7291_v31, %v3887_v14  ;;  %v3923_v53 = vadd.f32 %v7291_v31, %v3888_v17  ;;  %v3924_v1 = vadd.f32 %v7291_v31, %v3889_v40  ;;  %v3925_v6 = vadd.f32 %v7291_v31, %v3890_v28 }
 0x608   : > { %v3926_v46 = vadd.f32 %v7291_v31, %v3891_v45  ;;  %v3927_v39 = vadd.f32 %v7291_v31, %v3892_v52  ;;  %v3928_v47 = vadd.f32 %v7291_v31, %v3893_v34  ;;  %v3929_v38 = vadd.f32 %v7291_v31, %v3894_v4 }
 0x609   : > { %v3954_v56 = vmax.f32 %v3922_v3, 0.0  ;;  %v3955_v8 = vmax.f32 %v3923_v53, 0.0  ;;  %v3956_v58 = vmax.f32 %v3924_v1, 0.0  ;;  %v3957_v24 = vmax.f32 %v3925_v6, 0.0 }
 0x60a   : > { %v3958_v20 = vmax.f32 %v3926_v46, 0.0  ;;  %v3959_v19 = vmax.f32 %v3927_v39, 0.0  ;;  %v3960_v41 = vmax.f32 %v3928_v47, 0.0  ;;  %v3961_v63 = vmax.f32 %v3929_v38, 0.0 }
 0x60b   : > { %4878 = vmatmul.msk.f32.vlgmr.msra.gmra.mxu2 %vm1099_vm9, %v3954_v56  ;;  %v3930_v59 = vadd.f32 %v7291_v31, %v3895_v16  ;;  %v3931_v36 = vadd.f32 %v7291_v31, %v3896_v29  ;;  %v3932_v0 = vadd.f32 %v7291_v31, %v3897_v21  ;;  %v3933_v54 = vadd.f32 %v7291_v31, %v3898_v10 }
 0x60c   : > { %v3934_v12 = vadd.f32 %v7291_v31, %v3899_v26  ;;  %v3935_v23 = vadd.f32 %v7291_v31, %v3900_v43  ;;  %v3901_v14 = vmul.f32 %v7287_v62, %v7023_v42  ;;  %v3902_v17 = vmul.f32 %v7287_v62, %v7027_v25  ;;  %v7364_v25 = vld [vmem:[%s7840_s28] ss:$0 sm:$0xff] }
 0x60d   : > { %v3962_v11 = vmax.f32 %v3930_v59, 0.0  ;;  %v3963_v37 = vmax.f32 %v3931_v36, 0.0  ;;  %v3964_v30 = vmax.f32 %v3932_v0, 0.0  ;;  %v3965_v35 = vmax.f32 %v3933_v54, 0.0 }
 0x60e   : > { %v3966_v2 = vmax.f32 %v3934_v12, 0.0  ;;  %v3967_v27 = vmax.f32 %v3935_v23, 0.0  ;;  %v3936_v22 = vadd.f32 %v7291_v31, %v3901_v14  ;;  %v3937_v32 = vadd.f32 %v7291_v31, %v3902_v17 }
 0x60f   : > { %v3903_v53 = vmul.f32 %v7287_v62, %v7032_v49  ;;  %v3904_v40 = vmul.f32 %v7287_v62, %v7035_v51  ;;  %v3905_v6 = vmul.f32 %v7287_v62, %v7038_v50  ;;  %v3907_v34 = vmul.f32 %v7287_v62, %v7042_v13 }
 0x610   : > { %v3968_v3 = vmax.f32 %v3936_v22, 0.0  ;;  %v3969_v56 = vmax.f32 %v3937_v32, 0.0  ;;  %v3908_v38 = vmul.f32 %v7287_v62, %v7044_v33  ;;  %v3910_v21 = vmul.f32 %v7287_v62, %v7050_v57 }
 0x611   : > { %v3938_v42 = vadd.f32 %v7291_v31, %v3903_v53  ;;  %v3939_v1 = vadd.f32 %v7291_v31, %v3904_v40  ;;  %v3940_v51 = vadd.f32 %v7291_v31, %v3905_v6  ;;  %v3942_v47 = vadd.f32 %v7291_v31, %v3907_v34 }
 0x612   : > { %v3945_v0 = vadd.f32 %v7291_v31, %v3910_v21  ;;  %v3911_v54 = vmul.f32 %v7287_v62, %v7054_v48  ;;  %v3913_v14 = vmul.f32 %v7287_v62, %v7062_v44  ;;  %v3914_v32 = vmul.f32 %v7287_v62, %v7066_v18 }
 0x613   : > { %4879 = vmatmul.msk.f32.gmra.mxu2 %vm1099_vm9, %v3955_v8  ;;  %v3970_v8 = vmax.f32 %v3938_v42, 0.0  ;;  %v3971_v28 = vmax.f32 %v3939_v1, 0.0  ;;  %v3972_v46 = vmax.f32 %v3940_v51, 0.0 }
 0x614   : > { %v3948_v22 = vadd.f32 %v7291_v31, %v3913_v14 }
 0x61b   : > { %4880 = vmatmul.msk.f32.gmra.mxu2 %vm1099_vm9, %v3956_v58 }
 0x623   : > { %4881 = vmatmul.msk.f32.gmra.mxu2 %vm1099_vm9, %v3957_v24 }
 0x62b   : > { %4882 = vmatmul.msk.f32.gmra.mxu2 %vm1099_vm9, %v3958_v20  ;;  %v3906_v20 = vmul.f32 %v7287_v62, %v7040_v61  ;;  %v3974_v61 = vmax.f32 %v3942_v47, 0.0 }
 0x62d   : > { %v3941_v52 = vadd.f32 %v7291_v31, %v3906_v20 }
 0x62f   : > { %v3973_v50 = vmax.f32 %v3941_v52, 0.0 }
 0x633   : > { %4883 = vmatmul.msk.f32.gmra.mxu2 %vm1099_vm9, %v3959_v19 }
 0x63b   : > { %4884 = vmatmul.msk.f32.gmra.mxu2 %vm1099_vm9, %v3960_v41 }
 0x643   : > { %4885 = vmatmul.msk.f32.gmra.mxu2 %vm1099_vm9, %v3961_v63  ;;  %v3943_v63 = vadd.f32 %v7291_v31, %v3908_v38 }
 0x645   : > { %v3975_v13 = vmax.f32 %v3943_v63, 0.0 }
 0x64b   : > { %4886 = vmatmul.msk.f32.gmra.mxu2 %vm1099_vm9, %v3962_v11  ;;  %v3909_v11 = vmul.f32 %v7287_v62, %v7046_v15  ;;  %v3977_v15 = vmax.f32 %v3945_v0, 0.0 }
 0x64d   : > { %v3944_v29 = vadd.f32 %v7291_v31, %v3909_v11 }
 0x64f   : > { %v3976_v33 = vmax.f32 %v3944_v29, 0.0 }
 0x653   : > { %4887 = vmatmul.msk.f32.gmra.mxu2 %vm1099_vm9, %v3963_v37 }
 0x65b   : > { %4888 = vmatmul.msk.f32.gmra.mxu2 %vm1099_vm9, %v3964_v30 }
 0x663   : > { %4889 = vmatmul.msk.f32.gmra.mxu2 %vm1099_vm9, %v3965_v35  ;;  %v3946_v35 = vadd.f32 %v7291_v31, %v3911_v54 }
 0x665   : > { %v3978_v57 = vmax.f32 %v3946_v35, 0.0 }
 0x66b   : > { %4890 = vmatmul.msk.f32.gmra.mxu2 %vm1099_vm9, %v3966_v2  ;;  %v3912_v2 = vmul.f32 %v7287_v62, %v7058_v7  ;;  %v3980_v7 = vmax.f32 %v3948_v22, 0.0 }
 0x66d   : > { %v3947_v43 = vadd.f32 %v7291_v31, %v3912_v2 }
 0x66f   : > { %v3979_v48 = vmax.f32 %v3947_v43, 0.0 }
 0x673   : > { %4891 = vmatmul.msk.f32.gmra.mxu2 %vm1099_vm9, %v3967_v27 }
 0x67b   : > { %4892 = vmatmul.msk.f32.gmra.mxu2 %vm1099_vm9, %v3968_v3 }
 0x683   : > { %4893 = vmatmul.msk.f32.gmra.mxu2 %vm1099_vm9, %v3969_v56  ;;  %v3949_v56 = vadd.f32 %v7291_v31, %v3914_v32 }
 0x685   : > { %v3981_v44 = vmax.f32 %v3949_v56, 0.0 }
 0x68b   : > { %4894 = vmatmul.msk.f32.gmra.mxu2 %vm1099_vm9, %v3970_v8  ;;  %v3915_v8 = vmul.f32 %v7287_v62, %v7070_v9 }
 0x68d   : > { %v3950_v40 = vadd.f32 %v7291_v31, %v3915_v8 }
 0x68e   : > { %v4111_v58 = vpop.f32.mrf.mxu2 }
 0x68f   : > { %v7368_v49 = vadd.f32 %v7364_v25, %v4111_v58  ;;  %v3982_v18 = vmax.f32 %v3950_v40, 0.0 }
 0x693   : > { %4895 = vmatmul.msk.f32.gmra.mxu2 %vm1099_vm9, %v3971_v28  ;;  %v3916_v28 = vmul.f32 %v7287_v62, %v7074_v60 }
 0x695   : > { %v3951_v6 = vadd.f32 %v7291_v31, %v3916_v28 }
 0x696   : > { %v4114_v24 = vpop.f32.mrf.mxu2 }
 0x697   : > { %v7375_v45 = vadd.f32 %v7364_v25, %v4114_v24  ;;  %v3983_v9 = vmax.f32 %v3951_v6, 0.0 }
 0x69b   : > { %4896 = vmatmul.msk.f32.gmra.mxu2 %vm1099_vm9, %v3972_v46  ;;  %v3917_v46 = vmul.f32 %v7287_v62, %v7078_v55 }
 0x69d   : > { %v3952_v20 = vadd.f32 %v7291_v31, %v3917_v46 }
 0x69e   : > { %v4117_v39 = vpop.f32.mrf.mxu2 }
 0x69f   : > { %v7382_v19 = vadd.f32 %v7364_v25, %v4117_v39  ;;  %v3984_v39 = vmax.f32 %v3952_v20, 0.0 }
 0x6a3   : > { %4897 = vmatmul.msk.f32.gmra.mxu2 %vm1099_vm9, %v3973_v50  ;;  %v3918_v50 = vmul.f32 %v7287_v62, %v7080_v5 }
 0x6a5   : > { %v3953_v34 = vadd.f32 %v7291_v31, %v3918_v50 }
 0x6a6   : > { %v4120_v41 = vpop.f32.mrf.mxu2 }
 0x6a7   : > { %v7389_v4 = vadd.f32 %v7364_v25, %v4120_v41  ;;  %v3985_v55 = vmax.f32 %v3953_v34, 0.0 }
 0x6ab   : > { %4898 = vmatmul.msk.f32.gmra.mxu2 %vm1099_vm9, %v3974_v61 }
 0x6ae   : > { %v4123_v16 = vpop.f32.mrf.mxu2 }
 0x6af   : > { %v7396_v59 = vadd.f32 %v7364_v25, %v4123_v16 }
 0x6b3   : > { %4899 = vmatmul.msk.f32.gmra.mxu2 %vm1099_vm9, %v3975_v13 }
 0x6b6   : > { %v4126_v36 = vpop.f32.mrf.mxu2 }
 0x6b7   : > { %v7403_v37 = vadd.f32 %v7364_v25, %v4126_v36 }
 0x6bb   : > { %4900 = vmatmul.msk.f32.gmra.mxu2 %vm1099_vm9, %v3976_v33 }
 0x6be   : > { %v4129_v30 = vpop.f32.mrf.mxu2 }
 0x6bf   : > { %v7410_v10 = vadd.f32 %v7364_v25, %v4129_v30 }
 0x6c3   : > { %4901 = vmatmul.msk.f32.gmra.mxu2 %vm1099_vm9, %v3977_v15 }
 0x6c6   : > { %v4132_v26 = vpop.f32.mrf.mxu2 }
 0x6c7   : > { %v7417_v12 = vadd.f32 %v7364_v25, %v4132_v26 }
 0x6cb   : > { %4902 = vmatmul.msk.f32.gmra.mxu2 %vm1099_vm9, %v3978_v57 }
 0x6ce   : > { %v4135_v23 = vpop.f32.mrf.mxu2 }
 0x6cf   : > { %v7424_v27 = vadd.f32 %v7364_v25, %v4135_v23 }
 0x6d3   : > { %4903 = vmatmul.msk.f32.gmra.mxu2 %vm1099_vm9, %v3979_v48 }
 0x6d6   : > { %v4138_v3 = vpop.f32.mrf.mxu2 }
 0x6d7   : > { %v7431_v17 = vadd.f32 %v7364_v25, %v4138_v3 }
 0x6db   : > { %4904 = vmatmul.msk.f32.gmra.mxu2 %vm1099_vm9, %v3980_v7 }
 0x6de   : > { %v4141_v53 = vpop.f32.mrf.mxu2 }
 0x6df   : > { %v7438_v42 = vadd.f32 %v7364_v25, %v4141_v53 }
 0x6e3   : > { %4905 = vmatmul.msk.f32.gmra.mxu2 %vm1099_vm9, %v3981_v44 }
 0x6e6   : > { %v4144_v1 = vpop.f32.mrf.mxu2 }
 0x6e7   : > { %v7445_v58 = vadd.f32 %v7364_v25, %v4144_v1 }
 0x6eb   : > { %4906 = vmatmul.msk.f32.gmra.mxu2 %vm1099_vm9, %v3982_v18 }
 0x6ee   : > { %v4147_v51 = vpop.f32.mrf.mxu2 }
 0x6ef   : > { %v7452_v24 = vadd.f32 %v7364_v25, %v4147_v51 }
 0x6f3   : > { %4907 = vmatmul.msk.f32.gmra.mxu2 %vm1099_vm9, %v3983_v9 }
 0x6f6   : > { %v4150_v52 = vpop.f32.mrf.mxu2 }
 0x6f7   : > { %v7459_v60 = vadd.f32 %v7364_v25, %v4150_v52 }
 0x6fb   : > { %4908 = vmatmul.msk.f32.gmra.mxu2 %vm1099_vm9, %v3984_v39 }
 0x6fe   : > { %v4153_v47 = vpop.f32.mrf.mxu2 }
 0x6ff   : > { %v7466_v41 = vadd.f32 %v7364_v25, %v4153_v47 }
 0x703   : > { %4909 = vmatmul.msk.f32.gmra.mxu2 %vm1099_vm9, %v3985_v55 }
 0x706   : > { %v4156_v61 = vpop.f32.mrf.mxu2 }
 0x707   : > { %v7470_v38 = vadd.f32 %v7364_v25, %v4156_v61 }
 0x70e   : > { %v4159_v63 = vpop.f32.mrf.mxu2 }
 0x70f   : > { %v7474_v16 = vadd.f32 %v7364_v25, %v4159_v63 }
 0x716   : > { %v4162_v5 = vpop.f32.mrf.mxu2 }
 0x717   : > { %v7477_v62 = vadd.f32 %v7364_v25, %v4162_v5 }
 0x71e   : > { %v4165_v31 = vpop.f32.mrf.mxu2 }
 0x71f   : > { %v7480_v13 = vadd.f32 %v7364_v25, %v4165_v31 }
 0x726   : > { %v4168_v11 = vpop.f32.mrf.mxu2 }
 0x727   : > { %v7483_v29 = vadd.f32 %v7364_v25, %v4168_v11 }
 0x72e   : > { %v4171_v36 = vpop.f32.mrf.mxu2 }
 0x72f   : > { %v7486_v33 = vadd.f32 %v7364_v25, %v4171_v36 }
 0x736   : > { %v4174_v21 = vpop.f32.mrf.mxu2 }
 0x737   : > { %v7489_v0 = vadd.f32 %v7364_v25, %v4174_v21 }
 0x73e   : > { %v4177_v30 = vpop.f32.mrf.mxu2 }
 0x73f   : > { %v7492_v15 = vadd.f32 %v7364_v25, %v4177_v30 }
 0x746   : > { %v4180_v54 = vpop.f32.mrf.mxu2 }
 0x747   : > { %v7495_v35 = vadd.f32 %v7364_v25, %v4180_v54 }
 0x74e   : > { %v4183_v26 = vpop.f32.mrf.mxu2 }
 0x74f   : > { %v7498_v57 = vadd.f32 %v7364_v25, %v4183_v26 }
 0x756   : > { %v4186_v2 = vpop.f32.mrf.mxu2 }
 0x757   : > { %v7501_v43 = vadd.f32 %v7364_v25, %v4186_v2 }
 0x75e   : > { %v4189_v23 = vpop.f32.mrf.mxu2 }
 0x75f   : > { %v7504_v48 = vadd.f32 %v7364_v25, %v4189_v23 }
 0x766   : > { %v4192_v14 = vpop.f32.mrf.mxu2 }
 0x767   : > { %v7507_v22 = vadd.f32 %v7364_v25, %v4192_v14 }
 0x76e   : > { %v4195_v3 = vpop.f32.mrf.mxu2 }
 0x76f   : > { %v7510_v7 = vadd.f32 %v7364_v25, %v4195_v3 }
 0x776   : > { %v4198_v32 = vpop.f32.mrf.mxu2 }
 0x777   : > { %v7513_v56 = vadd.f32 %v7364_v25, %v4198_v32 }
 0x77e   : > { %v4201_v53 = vpop.f32.mrf.mxu2 }
 0x77f   : > { %v7516_v44 = vadd.f32 %v7364_v25, %v4201_v53 }
 0x783   : > { %4210 = sbr.rel (%p4910_p12) target bundleno = 2010 (0x7da), region = 100 }
 0x786   : > { %v4204_v8 = vpop.f32.mrf.mxu2 }
 0x787   : > { %v7519_v40 = vadd.f32 %v7364_v25, %v4204_v8 }
 0x788   : > { %v4212_v1 = vsel %vm552_vm2, %v7368_v49, 0.0  ;;  %v4213_v18 = vsel %vm552_vm2, %v7375_v45, 0.0  ;;  %v4215_v28 = vsel %vm552_vm2, %v7382_v19, 0.0  ;;  %v4217_v51 = vsel %vm552_vm2, %v7389_v4, 0.0 }
 0x789   : > { %v4214_v6 = vadd.f32 %v4213_v18, %v4212_v1  ;;  %v4219_v25 = vsel %vm552_vm2, %v7396_v59, 0.0  ;;  %v4221_v20 = vsel %vm552_vm2, %v7403_v37, 0.0  ;;  %v4223_v39 = vsel %vm552_vm2, %v7410_v10, 0.0 }
 0x78a   : > { %v4285_v50 = vmul.f32 %v7368_v49, %v7368_v49  ;;  %v4286_v47 = vmul.f32 %v7375_v45, %v7375_v45  ;;  %v4287_v55 = vmul.f32 %v7382_v19, %v7382_v19  ;;  %v4225_v61 = vsel %vm552_vm2, %v7417_v12, 0.0 }
 0x78b   : > { %v4216_v9 = vadd.f32 %v4215_v28, %v4214_v6  ;;  %v4288_v5 = vmul.f32 %v7389_v4, %v7389_v4  ;;  %v4227_v31 = vsel %vm552_vm2, %v7424_v27, 0.0  ;;  %v4289_v36 = vmul.f32 %v7396_v59, %v7396_v59 }
 0x78c   : > { %v4317_v11 = vsel %vm552_vm2, %v4285_v50, 0.0  ;;  %v4318_v45 = vsel %vm552_vm2, %v4286_v47, 0.0  ;;  %v4320_v19 = vsel %vm552_vm2, %v4287_v55, 0.0  ;;  %v4229_v21 = vsel %vm552_vm2, %v7431_v17, 0.0 }
 0x78d   : > { %v4218_v46 = vadd.f32 %v4217_v51, %v4216_v9  ;;  %v4319_v30 = vadd.f32 %v4318_v45, %v4317_v11  ;;  %v4290_v4 = vmul.f32 %v7403_v37, %v7403_v37  ;;  %v4322_v26 = vsel %vm552_vm2, %v4288_v5, 0.0 }
 0x78e   : > { %v4231_v2 = vsel %vm552_vm2, %v7438_v42, 0.0  ;;  %v4291_v59 = vmul.f32 %v7410_v10, %v7410_v10  ;;  %v4324_v3 = vsel %vm552_vm2, %v4289_v36, 0.0  ;;  %v4233_v32 = vsel %vm552_vm2, %v7445_v58, 0.0 }
 0x78f   : > { %v4220_v52 = vadd.f32 %v4219_v25, %v4218_v46  ;;  %v4321_v23 = vadd.f32 %v4320_v19, %v4319_v30  ;;  %v4292_v37 = vmul.f32 %v7417_v12, %v7417_v12  ;;  %v4326_v1 = vsel %vm552_vm2, %v4290_v4, 0.0 }
 0x790   : > { %v4235_v18 = vsel %vm552_vm2, %v7452_v24, 0.0  ;;  %v4293_v10 = vmul.f32 %v7424_v27, %v7424_v27  ;;  %v4328_v51 = vsel %vm552_vm2, %v4291_v59, 0.0  ;;  %v4237_v9 = vsel %vm552_vm2, %v7459_v60, 0.0 }
 0x791   : > { %v4222_v34 = vadd.f32 %v4221_v20, %v4220_v52  ;;  %v4323_v53 = vadd.f32 %v4322_v26, %v4321_v23  ;;  %v4294_v12 = vmul.f32 %v7431_v17, %v7431_v17  ;;  %v4330_v20 = vsel %vm552_vm2, %v4292_v37, 0.0 }
 0x792   : > { %v4239_v52 = vsel %vm552_vm2, %v7466_v41, 0.0  ;;  %v4295_v27 = vmul.f32 %v7438_v42, %v7438_v42  ;;  %v4241_v47 = vsel %vm552_vm2, %v7470_v38, 0.0  ;;  %v4296_v17 = vmul.f32 %v7445_v58, %v7445_v58 }
 0x793   : > { %v4224_v63 = vadd.f32 %v4223_v39, %v4222_v34  ;;  %v4325_v28 = vadd.f32 %v4324_v3, %v4323_v53  ;;  %v4332_v34 = vsel %vm552_vm2, %v4293_v10, 0.0  ;;  %v4243_v5 = vsel %vm552_vm2, %v7474_v16, 0.0 }
 0x794   : > { %v4297_v42 = vmul.f32 %v7452_v24, %v7452_v24  ;;  %v4245_v36 = vsel %vm552_vm2, %v7477_v62, 0.0  ;;  %v4298_v58 = vmul.f32 %v7459_v60, %v7459_v60  ;;  %v4247_v30 = vsel %vm552_vm2, %v7480_v13, 0.0 }
 0x795   : > { %v4226_v49 = vadd.f32 %v4225_v61, %v4224_v63  ;;  %v4327_v25 = vadd.f32 %v4326_v1, %v4325_v28  ;;  %v4334_v63 = vsel %vm552_vm2, %v4294_v12, 0.0  ;;  %v4299_v24 = vmul.f32 %v7466_v41, %v7466_v41 }
 0x796   : > { %v4340_v26 = vsel %vm552_vm2, %v4297_v42, 0.0  ;;  %v4300_v60 = vmul.f32 %v7470_v38, %v7470_v38  ;;  %v4342_v59 = vsel %vm552_vm2, %v4298_v58, 0.0  ;;  %v4251_v3 = vsel %vm552_vm2, %v7486_v33, 0.0 }
 0x797   : > { %v4228_v54 = vadd.f32 %v4227_v31, %v4226_v49  ;;  %v4329_v39 = vadd.f32 %v4328_v51, %v4327_v25  ;;  %v4336_v49 = vsel %vm552_vm2, %v4295_v27, 0.0  ;;  %v4301_v41 = vmul.f32 %v7474_v16, %v7474_v16 }
 0x798   : > { %v4253_v37 = vsel %vm552_vm2, %v7489_v0, 0.0  ;;  %v4302_v38 = vmul.f32 %v7477_v62, %v7477_v62  ;;  %v4346_v28 = vsel %vm552_vm2, %v4300_v60, 0.0  ;;  %v4303_v16 = vmul.f32 %v7480_v13, %v7480_v13 }
 0x799   : > { %v4230_v14 = vadd.f32 %v4229_v21, %v4228_v54  ;;  %v4331_v55 = vadd.f32 %v4330_v20, %v4329_v39  ;;  %v4338_v21 = vsel %vm552_vm2, %v4296_v17, 0.0  ;;  %v4257_v25 = vsel %vm552_vm2, %v7495_v35, 0.0 }
 0x79a   : > { %v4304_v62 = vmul.f32 %v7483_v29, %v7483_v29  ;;  %v4350_v20 = vsel %vm552_vm2, %v4302_v38, 0.0  ;;  %v4305_v13 = vmul.f32 %v7486_v33, %v7486_v33  ;;  %v4352_v27 = vsel %vm552_vm2, %v4303_v16, 0.0 }
 0x79b   : > { %v4232_v8 = vadd.f32 %v4231_v2, %v4230_v14  ;;  %v4333_v31 = vadd.f32 %v4332_v34, %v4331_v55  ;;  %v4249_v2 = vsel %vm552_vm2, %v7483_v29, 0.0  ;;  %v4261_v34 = vsel %vm552_vm2, %v7501_v43, 0.0 }
 0x79c   : > { %v4306_v29 = vmul.f32 %v7489_v0, %v7489_v0  ;;  %v4263_v17 = vsel %vm552_vm2, %v7504_v48, 0.0  ;;  %v4307_v33 = vmul.f32 %v7492_v15, %v7492_v15  ;;  %v4308_v0 = vmul.f32 %v7495_v35, %v7495_v35 }
 0x79d   : > { %v4234_v6 = vadd.f32 %v4233_v32, %v4232_v8  ;;  %v4335_v45 = vadd.f32 %v4334_v63, %v4333_v31  ;;  %v4344_v8 = vsel %vm552_vm2, %v4299_v24, 0.0  ;;  %v4356_v31 = vsel %vm552_vm2, %v4305_v13, 0.0 }
 0x79e   : > { %v4310_v35 = vmul.f32 %v7501_v43, %v7501_v43  ;;  %v4362_v24 = vsel %vm552_vm2, %v4308_v0, 0.0  ;;  %v4273_v60 = vsel %vm552_vm2, %v7519_v40, 0.0  ;;  %v4312_v43 = vmul.f32 %v7507_v22, %v7507_v22 }
 0x79f   : > { %v4236_v46 = vadd.f32 %v4235_v18, %v4234_v6  ;;  %v4337_v54 = vadd.f32 %v4336_v49, %v4335_v45  ;;  %v4255_v6 = vsel %vm552_vm2, %v7492_v15, 0.0  ;;  %v4267_v45 = vsel %vm552_vm2, %v7510_v7, 0.0 }
 0x7a0   : > { %v4309_v15 = vmul.f32 %v7498_v57, %v7498_v57  ;;  %v4370_v38 = vsel %vm552_vm2, %v4312_v43, 0.0  ;;  %vm4282_vm6 = vcmask 253952  }
 0x7a1   : > { %v4238_v50 = vadd.f32 %v4237_v9, %v4236_v46  ;;  %v4339_v23 = vadd.f32 %v4338_v21, %v4337_v54  ;;  %v4348_v9 = vsel %vm552_vm2, %v4301_v41, 0.0  ;;  %v4360_v21 = vsel %vm552_vm2, %v4307_v33, 0.0 }
 0x7a3   : > { %v4240_v61 = vadd.f32 %v4239_v52, %v4238_v50  ;;  %v4341_v32 = vadd.f32 %v4340_v26, %v4339_v23  ;;  %v4259_v52 = vsel %vm552_vm2, %v7498_v57, 0.0  ;;  %v4271_v26 = vsel %vm552_vm2, %v7516_v44, 0.0 }
 0x7a4   : > { %v4311_v57 = vmul.f32 %v7504_v48, %v7504_v48 }
 0x7a5   : > { %v4242_v11 = vadd.f32 %v4241_v47, %v4240_v61  ;;  %v4343_v1 = vadd.f32 %v4342_v59, %v4341_v32  ;;  %v4354_v61 = vsel %vm552_vm2, %v4304_v62, 0.0  ;;  %v4366_v32 = vsel %vm552_vm2, %v4310_v35, 0.0 }
 0x7a7   : > { %v4244_v19 = vadd.f32 %v4243_v5, %v4242_v11  ;;  %v4345_v10 = vadd.f32 %v4344_v8, %v4343_v1  ;;  %v4265_v11 = vsel %vm552_vm2, %v7507_v22, 0.0  ;;  %v4313_v8 = vmul.f32 %v7510_v7, %v7510_v7 }
 0x7a8   : > { %v4315_v22 = vmul.f32 %v7516_v44, %v7516_v44  ;;  %v4316_v7 = vmul.f32 %v7519_v40, %v7519_v40 }
 0x7a9   : > { %v4246_v4 = vadd.f32 %v4245_v36, %v4244_v19  ;;  %v4347_v46 = vadd.f32 %v4346_v28, %v4345_v10  ;;  %v4358_v36 = vsel %vm552_vm2, %v4306_v29, 0.0  ;;  %v4372_v10 = vsel %vm552_vm2, %v4313_v8, 0.0  ;;  %v4284_v29 = vld [vmem:[#allocation4 + $0x1] sm:$0x1] }
 0x7ab   : > { %v4248_v14 = vadd.f32 %v4247_v30, %v4246_v4  ;;  %v4349_v39 = vadd.f32 %v4348_v9, %v4347_v46  ;;  %v4269_v30 = vsel %vm552_vm2, %v7513_v56, 0.0 }
 0x7ad   : > { %v4250_v53 = vadd.f32 %v4249_v2, %v4248_v14  ;;  %v4351_v47 = vadd.f32 %v4350_v20, %v4349_v39  ;;  %v4364_v14 = vsel %vm552_vm2, %v4309_v15, 0.0  ;;  %v4378_v20 = vsel %vm552_vm2, %v4316_v7, 0.0 }
 0x7af   : > { %v4252_v18 = vadd.f32 %v4251_v3, %v4250_v53  ;;  %v4353_v63 = vadd.f32 %v4352_v27, %v4351_v47 }
 0x7b1   : > { %v4254_v51 = vadd.f32 %v4253_v37, %v4252_v18  ;;  %v4355_v42 = vadd.f32 %v4354_v61, %v4353_v63  ;;  %v4368_v37 = vsel %vm552_vm2, %v4311_v57, 0.0  ;;  %v4314_v18 = vmul.f32 %v7513_v56, %v7513_v56 }
 0x7b2   : > { %v4376_v56 = vsel %vm552_vm2, %v4315_v22, 0.0 }
 0x7b3   : > { %v4256_v12 = vadd.f32 %v4255_v6, %v4254_v51  ;;  %v4357_v19 = vadd.f32 %v4356_v31, %v4355_v42  ;;  %v4374_v9 = vsel %vm552_vm2, %v4314_v18, 0.0 }
 0x7b5   : > { %v4258_v50 = vadd.f32 %v4257_v25, %v4256_v12  ;;  %v4359_v54 = vadd.f32 %v4358_v36, %v4357_v19 }
 0x7b7   : > { %v4260_v55 = vadd.f32 %v4259_v52, %v4258_v50  ;;  %v4361_v2 = vadd.f32 %v4360_v21, %v4359_v54  ;;  %v4211_v52 = vld [vmem:[#allocation4] sm:$0x1] }
 0x7b9   : > { %v4262_v5 = vadd.f32 %v4261_v34, %v4260_v55  ;;  %v4363_v59 = vadd.f32 %v4362_v24, %v4361_v2 }
 0x7bb   : > { %v4264_v49 = vadd.f32 %v4263_v17, %v4262_v5  ;;  %v4365_v53 = vadd.f32 %v4364_v14, %v4363_v59 }
 0x7bd   : > { %v4266_v58 = vadd.f32 %v4265_v11, %v4264_v49  ;;  %v4367_v48 = vadd.f32 %v4366_v32, %v4365_v53 }
 0x7bf   : > { %v4268_v4 = vadd.f32 %v4267_v45, %v4266_v58  ;;  %v4369_v28 = vadd.f32 %v4368_v37, %v4367_v48 }
 0x7c1   : > { %v4270_v23 = vadd.f32 %v4269_v30, %v4268_v4  ;;  %v4371_v51 = vadd.f32 %v4370_v38, %v4369_v28 }
 0x7c3   : > { %v4272_v3 = vadd.f32 %v4271_v26, %v4270_v23  ;;  %v4373_v25 = vadd.f32 %v4372_v10, %v4371_v51 }
 0x7c5   : > { %v4274_v41 = vadd.f32 %v4273_v60, %v4272_v3  ;;  %v4375_v12 = vadd.f32 %v4374_v9, %v4373_v25 }
 0x7c7   : > { %v4275_v1 = vrot.slane %v4274_v41, 4  ;;  %v4377_v39 = vadd.f32 %v4376_v56, %v4375_v12 }
 0x7c9   : > { %v4276_v6 = vadd.f32 %v4275_v1, %v4274_v41  ;;  %v4379_v50 = vadd.f32 %v4378_v20, %v4377_v39 }
 0x7cb   : > { %v4277_v16 = vrot.slane %v4276_v6, 2  ;;  %v4380_v27 = vrot.slane %v4379_v50, 4 }
 0x7cd   : > { %v4278_v46 = vadd.f32 %v4277_v16, %v4276_v6  ;;  %v4381_v34 = vadd.f32 %v4380_v27, %v4379_v50 }
 0x7cf   : > { %v4279_v62 = vrot.slane %v4278_v46, 1  ;;  %v4382_v40 = vrot.slane %v4381_v34, 2 }
 0x7d1   : > { %v4280_v44 = vadd.f32 %v4279_v62, %v4278_v46  ;;  %v4383_v47 = vadd.f32 %v4382_v40, %v4381_v34 }
 0x7d3   : > { %v4281_v13 = vadd.f32 %v4280_v44, %v4211_v52  ;;  %v4384_v55 = vrot.slane %v4383_v47, 1 }
 0x7d5   : > { %4283 = vst.msk [vmem:[#allocation4] sm:$0x1] %vm4282_vm6, %v4281_v13  ;;  %v4385_v61 = vadd.f32 %v4384_v55, %v4383_v47 }
 0x7d7   : > { %v4386_v17 = vadd.f32 %v4385_v61, %v4284_v29 }
 0x7d9   : > { %4387 = vst.msk [vmem:[#allocation4 + $0x1] sm:$0x1] %vm4282_vm6, %v4386_v17 }
 0x7da PF: > { %p4388_p13 = pnand %p4207_p11, %p943_p4 }
 0x7db   : > { %s7841_s14 = sld [smem:[#allocation37_spill]] (!%p4388_p13) }
 0x7dc   : > { %4391 = sbr.rel (%p4388_p13) target bundleno = 2053 (0x805), region = 104  ;;  %s7842_s21 = sld [smem:[#allocation38_spill]] (!%p4388_p13) }
 0x7e1   : > { %v4394_v63 = vld [vmem:[#allocation4] sm:$0x1]  ;;  %v4396_v5 = vld [vmem:[#allocation4 + $0x1] sm:$0x1]  ;;  %v4392_v21 = vld [vmem:[%s7841_s14] sm:$0x1] }
 0x7e2   : > { %v4395_v33 = vmul.f32 0.001953125, %v4394_v63  ;;  %v4397_v31 = vmul.f32 0.001953125, %v4396_v5  ;;  %vm4415_vm9 = vcmask 253952   ;;  %v4393_v35 = vld [vmem:[%s7842_s21] sm:$0x1] }
 0x7e4   : > { %v4398_v11 = vmul.f32 %v4395_v33, %v4395_v33 }
 0x7e6   : > { %v4399_v42 = vsub.f32 %v4397_v31, %v4398_v11 }
 0x7e8   : > { %v4400_v49 = vmax.f32 %v4399_v42, 0.0 }
 0x7ea   : > { %v4401_v0 = vadd.f32 1e-05, %v4400_v49 }
 0x7ec   : > { %5057 = vrsqrt.f32 %v4401_v0  ;;  %vm4408_vm2 = vweird.f32 %v4401_v0 }
 0x7f2   : > { %v5058_v36 = vpop.eup %5057 }
 0x7f3   : > { %v4403_v45 = vmul.f32 %v5058_v36, %v4401_v0  ;;  %vm4409_vm7 = vweird.f32 %v5058_v36 }
 0x7f4   : > { %vm4410_vm8 = vmor %vm4408_vm2, %vm4409_vm7 }
 0x7f5   : > { %v4404_v19 = vmul.f32 %v5058_v36, %v4403_v45 }
 0x7f7   : > { %v4405_v58 = vmul.f32 0.5, %v4404_v19 }
 0x7f9   : > { %v4406_v15 = vsub.f32 1.5, %v4405_v58 }
 0x7fb   : > { %v4407_v30 = vmul.f32 %v5058_v36, %v4406_v15 }
 0x7fd   : > { %v4411_v54 = vsel %vm4410_vm8, %v5058_v36, %v4407_v30 }
 0x7fe   : > { %v4412_v4 = vmul.f32 %v4411_v54, %v4392_v21 }
 0x800   : > { %4416 = vst.msk [vmem:[#allocation14] sm:$0x1] %vm4415_vm9, %v4412_v4  ;;  %v4413_v24 = vmul.f32 %v4412_v4, %v4395_v33 }
 0x802   : > { %v4414_v26 = vsub.f32 %v4393_v35, %v4413_v24 }
 0x804   : > { %4417 = vst.msk [vmem:[#allocation14 + $0x1] sm:$0x1] %vm4415_vm9, %v4414_v26 }
 0x805 PF: > { %s7843_s5 = sadd.s32 4294967295, %s5281_s20   ;;  %s5288_s9 = smov [#allocation12]  }
 0x806   : > { %p7694_p0 = scmp.eq.s32.totalorder %s7843_s5, 5  ;;  %s4436_s10 = sshll.u32 %s5288_s9, 4  ;;  %s4437_s10 = int_to_ptr.vmem [resolvable:$true] %s4436_s10 }
 0x807   : > { %s7845_s22 = sld [smem:[#allocation40_spill]]  ;;  %s5289_s24 = smov [#allocation11]  }
 0x808   : > { %s4424_s25 = sshll.u32 %s5289_s24, 4  ;;  %s7846_s16 = sld [smem:[#allocation39_spill]]  ;;  %s4425_s25 = int_to_ptr.vmem [resolvable:$true] %s4424_s25 }
 0x809   : > { %s7847_s13 = sld [smem:[#allocation41_spill]]  ;;  %s5290_s5 = smov [#allocation14]  }
 0x80a   : > { %s4448_s9 = sshll.u32 %s5290_s5, 4  ;;  %s4449_s9 = int_to_ptr.vmem [resolvable:$true] %s4448_s9 }
 0x80d   : > { %s4438_s27 = sshll.u32 %s7845_s22, 4  ;;  %s4439_s27 = int_to_ptr.hbm [resolvable:$true] %s4438_s27 }
 0x80e   : > { %4949 = dma.vmem_to_hbm [thread:$0]  (%p7694_p0), %s4437_s10, 32, %s4439_s27, [#allocation13]  }
 0x80f   : > { %s4426_s17 = sshll.u32 %s7846_s16, 4  ;;  %s4450_s21 = sshll.u32 %s7847_s13, 4  ;;  %s4427_s17 = int_to_ptr.hbm [resolvable:$true] %s4426_s17  ;;  %s4451_s21 = int_to_ptr.hbm [resolvable:$true] %s4450_s21 }
 0x810   : > { %4947 = dma.vmem_to_hbm [thread:$0]  (%p7694_p0), %s4425_s25, 32, %s4427_s17, [#allocation8]  }
 0x811   : > { %4951 = dma.vmem_to_hbm [thread:$0]  (%p7694_p0), %s4449_s9, 32, %s4451_s21, [#allocation13]  }
 0x812   : > { %5244 = dma.done.wait (%p7694_p0), [#allocation8], 32  }
 0x813   : > { %5246 = vsyncadd (%p7694_p0), [#allocation8], 4294967264 }
 0x814   : > { %5248 = dma.done.wait (%p7694_p0), [#allocation13], 64  }
 0x815   : > { %5250 = vsyncadd (%p7694_p0), [#allocation13], 4294967232 }
 0x816 PF: > { %s31_s20 = sadd.s32 1, %s5281_s20   ;;  %s7848_s17 = sld [smem:[#allocation19_spill]] }
 0x817   : > { %p28_p2 = scmp.ge.s32.totalorder %s31_s20, 8   ;;  %s7849_s10 = sld [smem:[#allocation20_spill]] }
 0x818   : > { %s7850_s19 = sld [smem:[#allocation21_spill]]  ;;  %s7851_s29 = smov %s5257_s30 }
 0x819   : > { %s7852_s30 = smov %s5261_s15  ;;  %s7853_s15 = smov %s5452_s26 }
 0x81a   : > { %s7854_s16 = smov %s5273_s18  ;;  %30 = sbr.rel (!%p28_p2) target bundleno = 17 (0x11), region = 164 }
 0x81d   : > { %s7855_s18 = smov %s7849_s10 }
 0x81f   :  { %4474 = vsyncpa [#allocation7], 1 }
 0x820   :  { %4476 = vsyncpa [#allocation7 + $0x1], 1 }
 0x821   :  { %4477 = vsyncpa [#allocation10], 1 }
 0x822   :  { %4478 = vsyncpa [#allocation8], 1 }
 0x823   :  { %4480 = vsyncpa [#allocation8 + $0x1], 1 }
 0x824   :  { %4481 = vsyncpa [#allocation13], 1 }

</bundles_post_ra>
